<compile_context>
chip_gen: v6e
topology: v6e:2x2x1
jax: 0.10.0
libtpu: 0.0.40
codegen_flags: <defaults>
</compile_context>

<pallas_src>
import functools
import math

import jax
import jax.numpy as jnp
from jax.experimental import pallas as pl
from jax.experimental.pallas import tpu as pltpu

# ----------------------- model hyper-parameters (small) ----------------------
B = 2            # batch
S = 8            # sequence length
H = 32           # hidden size
NUM_HEADS = 4
HEAD_DIM = H // NUM_HEADS
I = 64           # intermediate (FFN) size
L = 2            # number of encoder layers
VOCAB = 100
MAX_POS = 16
TYPE_VOCAB = 2
NUM_LABELS = 2   # config['final_out_features'] default
PAD_ID = 1       # RoBERTa padding_idx
LN_EPS = 1e-5

_VMEM = pl.BlockSpec(memory_space=pltpu.MemorySpace.VMEM)


def _layernorm(x, g, b, eps=LN_EPS):
    # Single-pass LN: sum(x) and sum(x*x) are independent reductions.
    n = x.shape[-1]
    inv_n = 1.0 / n
    s1 = jnp.sum(x, axis=-1, keepdims=True)
    s2 = jnp.sum(x * x, axis=-1, keepdims=True)
    mu = s1 * inv_n
    var = s2 * inv_n - mu * mu
    return (x - mu) * jax.lax.rsqrt(var + eps) * g + b


# ------------------------------ fused Pallas kernel ---------------------------
def fused_roberta_kernel(emb_ref, bias_ref, head_vec_ref,
                         wqkv_ref, wo_ref, w1_ref, w2_ref, lvec_ref,
                         cls_w_ref, o_ref, *, num_heads, num_layers):
    b, s, h = emb_ref.shape
    d_h = h // num_heads
    inter = w1_ref.shape[2]
    num_labels = o_ref.shape[-1]
    bs = b * s

    # Packed embedding-LN / classifier small params.
    hv = head_vec_ref[0]                                  # (3H + NUM_LABELS,)
    emb_g = hv[0:h]
    emb_b = hv[h:2 * h]
    cls_db = hv[2 * h:3 * h]
    cls_ob = hv[3 * h:3 * h + num_labels]

    # Embedding LayerNorm (f32); activations stay resident in VMEM as (B*S, H).
    x = _layernorm(emb_ref[...], emb_g, emb_b).reshape(bs, h)

    # Additive attention bias, broadcast ONCE for all layers/heads: (B*nh, 1, S).
    bias_bh = jnp.broadcast_to(bias_ref[...][:, None, :, :],
                               (b, num_heads, 1, s)).reshape(b * num_heads, 1, s)

    for l in range(num_layers):                            # static, tiny L
        # Packed per-layer 1-D params.
        vec = lvec_ref[l]                                  # (9H + I,)
        bq = vec[0:h]
        bk = vec[h:2 * h]
        bv = vec[2 * h:3 * h]
        bo = vec[3 * h:4 * h]
        ln1g = vec[4 * h:5 * h]
        ln1b = vec[5 * h:6 * h]
        b1 = vec[6 * h:6 * h + inter]
        b2 = vec[6 * h + inter:7 * h + inter]
        ln2g = vec[7 * h + inter:8 * h + inter]
        ln2b = vec[8 * h + inter:9 * h + inter]

        xb = x.astype(jnp.bfloat16)
        # Three (H,H) projections (no sub-128-lane slices of a fused QKV slab).
        # The 1/sqrt(d_h) softmax scale is already folded into wq/bq.
        q = jnp.dot(xb, wqkv_ref[l, 0], preferred_element_type=jnp.float32) + bq
        k = jnp.dot(xb, wqkv_ref[l, 1], preferred_element_type=jnp.float32) + bk
        v = jnp.dot(xb, wqkv_ref[l, 2], preferred_element_type=jnp.float32) + bv

        # One head split per tensor per layer (hoisted out of any head loop).
        q4 = q.reshape(b, s, num_heads, d_h).transpose(0, 2, 1, 3).reshape(
            b * num_heads, s, d_h).astype(jnp.bfloat16)
        k4 = k.reshape(b, s, num_heads, d_h).transpose(0, 2, 1, 3).reshape(
            b * num_heads, s, d_h).astype(jnp.bfloat16)
        v4 = v.reshape(b, s, num_heads, d_h).transpose(0, 2, 1, 3).reshape(
            b * num_heads, s, d_h).astype(jnp.bfloat16)

        sc = jnp.einsum('bqd,bkd->bqk', q4, k4,
                        preferred_element_type=jnp.float32) + bias_bh
        sc = sc - jnp.max(sc, axis=-1, keepdims=True)
        p = jnp.exp(sc)
        p = p * pl.reciprocal(jnp.sum(p, axis=-1, keepdims=True), approx=True)
        ctx = jnp.einsum('bqk,bkd->bqd', p.astype(jnp.bfloat16), v4,
                         preferred_element_type=jnp.float32)   # (B*nh, S, dh)
        # Merge heads back (head-major along H, matching concat-of-heads @ Wo).
        ctx = ctx.reshape(b, num_heads, s, d_h).transpose(0, 2, 1, 3).reshape(bs, h)

        # Single output projection (replaces per-head matmuls + accumulate adds).
        attn = jnp.dot(ctx.astype(jnp.bfloat16), wo_ref[l],
                       preferred_element_type=jnp.float32) + bo
        x1 = _layernorm(x + attn, ln1g, ln1b)

        # FFN.
        hdn = jnp.dot(x1.astype(jnp.bfloat16), w1_ref[l],
                      preferred_element_type=jnp.float32) + b1
        # TODO(synk): HF RoBERTa default is exact erf-GELU; tanh-approximate GELU
        # is used here for guaranteed Mosaic lowering (difference ~1e-3).
        hdn = jax.nn.gelu(hdn, approximate=True)
        ffn = jnp.dot(hdn.astype(jnp.bfloat16), w2_ref[l],
                      preferred_element_type=jnp.float32) + b2
        x = _layernorm(x1 + ffn, ln2g, ln2b)

    # RobertaClassificationHead on the <s> token: dense -> tanh -> out_proj.
    x_cls = x.reshape(b, s, h)[:, 0, :]                    # (B, H)
    cls_w = cls_w_ref[...]                                 # (H, H + NUM_LABELS) bf16
    hcls = jnp.tanh(jnp.dot(x_cls.astype(jnp.bfloat16), cls_w[:, :h],
                            preferred_element_type=jnp.float32) + cls_db)
    logits = jnp.dot(hcls.astype(jnp.bfloat16), cls_w[:, h:],
                     preferred_element_type=jnp.float32) + cls_ob
    o_ref[...] = logits[:, None, :]


# ------------------------------ parameter init --------------------------------
def init_params(key):
    def normal(k, shape, scale=0.02):
        return (scale * jax.random.normal(k, shape)).astype(jnp.float32)

    keys = jax.random.split(key, 8 + 8 * L)
    ki = iter(keys)
    params = {
        'word_emb': normal(next(ki), (VOCAB, H)),
        'pos_emb': normal(next(ki), (MAX_POS, H)),
        'type_emb': normal(next(ki), (TYPE_VOCAB, H)),
        'emb_ln_g': jnp.ones((H,), jnp.float32),
        'emb_ln_b': jnp.zeros((H,), jnp.float32),
        'cls_dense_w': normal(next(ki), (H, H)),
        'cls_dense_b': jnp.zeros((H,), jnp.float32),
        'cls_out_w': normal(next(ki), (H, NUM_LABELS)),
        'cls_out_b': jnp.zeros((NUM_LABELS,), jnp.float32),
        'layers': [],
    }
    for _ in range(L):
        layer = {
            'wq': normal(next(ki), (H, H)), 'bq': jnp.zeros((H,), jnp.float32),
            'wk': normal(next(ki), (H, H)), 'bk': jnp.zeros((H,), jnp.float32),
            'wv': normal(next(ki), (H, H)), 'bv': jnp.zeros((H,), jnp.float32),
            'wo': normal(next(ki), (H, H)), 'bo': jnp.zeros((H,), jnp.float32),
            'ln1g': jnp.ones((H,), jnp.float32), 'ln1b': jnp.zeros((H,), jnp.float32),
            'w1': normal(next(ki), (H, I)), 'b1': jnp.zeros((I,), jnp.float32),
            'w2': normal(next(ki), (I, H)), 'b2': jnp.zeros((H,), jnp.float32),
            'ln2g': jnp.ones((H,), jnp.float32), 'ln2b': jnp.zeros((H,), jnp.float32),
        }
        params['layers'].append(layer)
    return params


def _stack_layers(layers):
    scale = 1.0 / math.sqrt(HEAD_DIM)
    st = lambda name: jnp.stack([lyr[name] for lyr in layers], axis=0)
    # (L, 3, H, H); the softmax 1/sqrt(d_h) scale is folded into the Q weights here.
    wqkv = jnp.stack(
        [jnp.stack([lyr['wq'] * scale, lyr['wk'], lyr['wv']], 0) for lyr in layers], 0)
    # Pack all per-layer 1-D params into one (L, 9H+I) slab (fewer entry DMAs).
    lvec = jnp.stack(
        [jnp.concatenate([lyr['bq'] * scale, lyr['bk'], lyr['bv'], lyr['bo'],
                          lyr['ln1g'], lyr['ln1b'], lyr['b1'], lyr['b2'],
                          lyr['ln2g'], lyr['ln2b']]) for lyr in layers], 0)
    return dict(wqkv=wqkv, wo=st('wo'), w1=st('w1'), w2=st('w2'), lvec=lvec)


def _use_batch_grid():
    # v7x has 2 TensorCores/chip: shard independent batch items across them.
    # On v5e/v6e (1 TC) a grid step is pure ~0.35us overhead, so stay gridless.
    try:
        kind = jax.devices()[0].device_kind.lower()
    except Exception:
        return False
    return ('v7' in kind) or ('7x' in kind)


# ------------------------------ full forward -----------------------------------
def forward(params, input_ids, segment_ids, input_mask):
    bsz, seq = input_ids.shape
    # RoBERTa position ids: cumsum over non-pad tokens, offset by padding_idx.
    not_pad = (input_ids != PAD_ID).astype(jnp.int32)
    position_ids = jnp.cumsum(not_pad, axis=1) * not_pad + PAD_ID

    # Embedding gathers (pure indexing) stay in JAX glue; everything downstream
    # runs inside one fused Pallas kernel.
    emb = (params['word_emb'][input_ids]
           + params['pos_emb'][position_ids]
           + params['type_emb'][segment_ids]).astype(jnp.float32)
    # HF-style additive attention bias, computed once for all layers.  (B, 1, S)
    attn_bias = ((1.0 - input_mask.astype(jnp.float32)) * -10000.0)[:, None, :]

    stk = _stack_layers(params['layers'])
    bf16 = jnp.bfloat16
    head_vec = jnp.concatenate([params['emb_ln_g'], params['emb_ln_b'],
                                params['cls_dense_b'],
                                params['cls_out_b']])[None, :]          # (1, 3H+NL)
    cls_w = jnp.concatenate([params['cls_dense_w'], params['cls_out_w']],
                            axis=1).astype(bf16)                        # (H, H+NL)

    args = (
        emb, attn_bias, head_vec,
        stk['wqkv'].astype(bf16), stk['wo'].astype(bf16),
        stk['w1'].astype(bf16), stk['w2'].astype(bf16),
        stk['lvec'], cls_w,
    )
    kernel = functools.partial(fused_roberta_kernel,
                               num_heads=NUM_HEADS,
                               num_layers=len(params['layers']))
    out_shape = jax.ShapeDtypeStruct((bsz, 1, NUM_LABELS), jnp.float32)

    if _use_batch_grid():
        hv_len = head_vec.shape[1]
        p_len = stk['lvec'].shape[1]
        in_specs = [
            pl.BlockSpec((1, seq, H), lambda i: (i, 0, 0)),
            pl.BlockSpec((1, 1, seq), lambda i: (i, 0, 0)),
            pl.BlockSpec((1, hv_len), lambda i: (0, 0)),
            pl.BlockSpec((L, 3, H, H), lambda i: (0, 0, 0, 0)),
            pl.BlockSpec((L, H, H), lambda i: (0, 0, 0)),
            pl.BlockSpec((L, H, I), lambda i: (0, 0, 0)),
            pl.BlockSpec((L, I, H), lambda i: (0, 0, 0)),
            pl.BlockSpec((L, p_len), lambda i: (0, 0)),
            pl.BlockSpec((H, H + NUM_LABELS), lambda i: (0, 0)),
        ]
        logits3 = pl.pallas_call(
            kernel,
            out_shape=out_shape,
            grid=(bsz,),
            in_specs=in_specs,
            out_specs=pl.BlockSpec((1, 1, NUM_LABELS), lambda i: (i, 0, 0)),
            compiler_params=pltpu.CompilerParams(
                dimension_semantics=("parallel",)),
        )(*args)
    else:
        logits3 = pl.pallas_call(
            kernel,
            out_shape=out_shape,
            in_specs=[_VMEM] * len(args),
            out_specs=_VMEM,
        )(*args)

    logits = logits3.reshape(bsz, NUM_LABELS)
    # torch .squeeze(-1) semantics: only squeeze when the last dim is 1.
    if logits.shape[-1] == 1:
        logits = jnp.squeeze(logits, axis=-1)
    return logits


if __name__ == "__main__":
    key = jax.random.PRNGKey(0)
    pkey, ikey = jax.random.split(key)
    params = init_params(pkey)

    # Example inputs: token ids in [2, VOCAB), with padding at the tail of row 1.
    input_ids = jax.random.randint(ikey, (B, S), 2, VOCAB, dtype=jnp.int32)
    input_ids = input_ids.at[1, -2:].set(PAD_ID)
    input_mask = (input_ids != PAD_ID).astype(jnp.int32)
    segment_ids = jnp.concatenate(
        [jnp.zeros((B, S // 2), jnp.int32), jnp.ones((B, S - S // 2), jnp.int32)],
        axis=1)

    logits = forward(params, input_ids, segment_ids, input_mask)
    logits = jax.block_until_ready(logits)
    assert logits.shape == (B, NUM_LABELS) and logits.dtype == jnp.float32
    print("KERNEL_OK")
</pallas_src>

<mosaic_0001>
module attributes {stable_mosaic.version = 11 : i64} {
  func.func @fused_roberta_kernel(%arg0: memref<2x8x32xf32, #tpu.memory_space<vmem>>, %arg1: memref<2x1x8xf32, #tpu.memory_space<vmem>>, %arg2: memref<1x98xf32, #tpu.memory_space<vmem>>, %arg3: memref<2x3x32x32xbf16, #tpu.memory_space<vmem>>, %arg4: memref<2x32x32xbf16, #tpu.memory_space<vmem>>, %arg5: memref<2x32x64xbf16, #tpu.memory_space<vmem>>, %arg6: memref<2x64x32xbf16, #tpu.memory_space<vmem>>, %arg7: memref<2x352xf32, #tpu.memory_space<vmem>>, %arg8: memref<32x34xbf16, #tpu.memory_space<vmem>>, %arg9: memref<2x1x2xf32, #tpu.memory_space<vmem>>) attributes {dimension_semantics = [], scalar_prefetch = 0 : i64, scratch_operands = 0 : i64, tpu.core_type = #tpu.core_type<tc>} {
    %c0 = arith.constant 0 : index
    %c0_0 = arith.constant 0 : index
    %0 = vector.load %arg2[%c0, %c0_0] : memref<1x98xf32, #tpu.memory_space<vmem>>, vector<1x98xf32>
    %1 = vector.shape_cast %0 : vector<1x98xf32> to vector<98xf32>
    %2 = vector.extract_strided_slice %1 {offsets = [0], sizes = [32], strides = [1]} : vector<98xf32> to vector<32xf32>
    %3 = vector.extract_strided_slice %1 {offsets = [32], sizes = [32], strides = [1]} : vector<98xf32> to vector<32xf32>
    %4 = vector.extract_strided_slice %1 {offsets = [64], sizes = [32], strides = [1]} : vector<98xf32> to vector<32xf32>
    %5 = vector.extract_strided_slice %1 {offsets = [96], sizes = [2], strides = [1]} : vector<98xf32> to vector<2xf32>
    %c0_1 = arith.constant 0 : index
    %c0_2 = arith.constant 0 : index
    %c0_3 = arith.constant 0 : index
    %6 = vector.load %arg0[%c0_1, %c0_2, %c0_3] : memref<2x8x32xf32, #tpu.memory_space<vmem>>, vector<2x8x32xf32>
    %cst = arith.constant dense<0.000000e+00> : vector<2x8xf32>
    %7 = vector.multi_reduction <add>, %6, %cst [2] : vector<2x8x32xf32> to vector<2x8xf32>
    %8 = vector.shape_cast %7 : vector<2x8xf32> to vector<2x8x1xf32>
    %9 = arith.mulf %6, %6 : vector<2x8x32xf32>
    %cst_4 = arith.constant dense<0.000000e+00> : vector<2x8xf32>
    %10 = vector.multi_reduction <add>, %9, %cst_4 [2] : vector<2x8x32xf32> to vector<2x8xf32>
    %11 = vector.shape_cast %10 : vector<2x8xf32> to vector<2x8x1xf32>
    %cst_5 = arith.constant 3.125000e-02 : f32
    %12 = vector.broadcast %cst_5 : f32 to vector<2x8x1xf32>
    %13 = arith.mulf %8, %12 : vector<2x8x1xf32>
    %cst_6 = arith.constant 3.125000e-02 : f32
    %14 = vector.broadcast %cst_6 : f32 to vector<2x8x1xf32>
    %15 = arith.mulf %11, %14 : vector<2x8x1xf32>
    %16 = arith.mulf %13, %13 : vector<2x8x1xf32>
    %17 = arith.subf %15, %16 : vector<2x8x1xf32>
    %18 = vector.broadcast %13 : vector<2x8x1xf32> to vector<2x8x32xf32>
    %19 = arith.subf %6, %18 : vector<2x8x32xf32>
    %cst_7 = arith.constant 9.99999974E-6 : f32
    %20 = vector.broadcast %cst_7 : f32 to vector<2x8x1xf32>
    %21 = arith.addf %17, %20 : vector<2x8x1xf32>
    %22 = math.rsqrt %21 : vector<2x8x1xf32>
    %23 = vector.broadcast %22 : vector<2x8x1xf32> to vector<2x8x32xf32>
    %24 = arith.mulf %19, %23 : vector<2x8x32xf32>
    %25 = vector.shape_cast %2 : vector<32xf32> to vector<1x1x32xf32>
    %26 = vector.broadcast %25 : vector<1x1x32xf32> to vector<2x8x32xf32>
    %27 = arith.mulf %24, %26 : vector<2x8x32xf32>
    %28 = vector.shape_cast %3 : vector<32xf32> to vector<1x1x32xf32>
    %29 = vector.broadcast %28 : vector<1x1x32xf32> to vector<2x8x32xf32>
    %30 = arith.addf %27, %29 : vector<2x8x32xf32>
    %31 = vector.shape_cast %30 : vector<2x8x32xf32> to vector<16x32xf32>
    %c0_8 = arith.constant 0 : index
    %c0_9 = arith.constant 0 : index
    %c0_10 = arith.constant 0 : index
    %32 = vector.load %arg1[%c0_8, %c0_9, %c0_10] : memref<2x1x8xf32, #tpu.memory_space<vmem>>, vector<2x1x8xf32>
    %33 = vector.shape_cast %32 : vector<2x1x8xf32> to vector<2x1x1x8xf32>
    %34 = vector.shape_cast %33 : vector<2x1x1x8xf32> to vector<2x1x1x8xf32>
    %35 = vector.broadcast %34 : vector<2x1x1x8xf32> to vector<2x4x1x8xf32>
    %36 = vector.shape_cast %35 : vector<2x4x1x8xf32> to vector<8x1x8xf32>
    %c0_11 = arith.constant 0 : index
    %c0_12 = arith.constant 0 : index
    %37 = vector.load %arg7[%c0_11, %c0_12] : memref<2x352xf32, #tpu.memory_space<vmem>>, vector<1x352xf32>
    %38 = vector.shape_cast %37 : vector<1x352xf32> to vector<352xf32>
    %39 = vector.extract_strided_slice %38 {offsets = [0], sizes = [32], strides = [1]} : vector<352xf32> to vector<32xf32>
    %40 = vector.extract_strided_slice %38 {offsets = [32], sizes = [32], strides = [1]} : vector<352xf32> to vector<32xf32>
    %41 = vector.extract_strided_slice %38 {offsets = [64], sizes = [32], strides = [1]} : vector<352xf32> to vector<32xf32>
    %42 = vector.extract_strided_slice %38 {offsets = [96], sizes = [32], strides = [1]} : vector<352xf32> to vector<32xf32>
    %43 = vector.extract_strided_slice %38 {offsets = [128], sizes = [32], strides = [1]} : vector<352xf32> to vector<32xf32>
    %44 = vector.extract_strided_slice %38 {offsets = [160], sizes = [32], strides = [1]} : vector<352xf32> to vector<32xf32>
    %45 = vector.extract_strided_slice %38 {offsets = [192], sizes = [64], strides = [1]} : vector<352xf32> to vector<64xf32>
    %46 = vector.extract_strided_slice %38 {offsets = [256], sizes = [32], strides = [1]} : vector<352xf32> to vector<32xf32>
    %47 = vector.extract_strided_slice %38 {offsets = [288], sizes = [32], strides = [1]} : vector<352xf32> to vector<32xf32>
    %48 = vector.extract_strided_slice %38 {offsets = [320], sizes = [32], strides = [1]} : vector<352xf32> to vector<32xf32>
    %49 = arith.truncf %31 : vector<16x32xf32> to vector<16x32xbf16>
    %c0_13 = arith.constant 0 : index
    %c0_14 = arith.constant 0 : index
    %c0_15 = arith.constant 0 : index
    %c0_16 = arith.constant 0 : index
    %50 = vector.load %arg3[%c0_13, %c0_14, %c0_15, %c0_16] : memref<2x3x32x32xbf16, #tpu.memory_space<vmem>>, vector<1x1x32x32xbf16>
    %51 = vector.shape_cast %50 : vector<1x1x32x32xbf16> to vector<32x32xbf16>
    %cst_17 = arith.constant dense<0.000000e+00> : vector<16x32xf32>
    %52 = tpu.matmul %49, %51, %cst_17 {dimension_numbers = #tpu.dot_dimension_numbers<[1], [0], [0], [1], [0, 0, 1, 1], [], []>} : vector<16x32xbf16>, vector<32x32xbf16>, vector<16x32xf32> -> vector<16x32xf32>
    %53 = vector.shape_cast %39 : vector<32xf32> to vector<1x32xf32>
    %54 = vector.broadcast %53 : vector<1x32xf32> to vector<16x32xf32>
    %55 = arith.addf %52, %54 : vector<16x32xf32>
    %c0_18 = arith.constant 0 : index
    %c1 = arith.constant 1 : index
    %c0_19 = arith.constant 0 : index
    %c0_20 = arith.constant 0 : index
    %56 = vector.load %arg3[%c0_18, %c1, %c0_19, %c0_20] : memref<2x3x32x32xbf16, #tpu.memory_space<vmem>>, vector<1x1x32x32xbf16>
    %57 = vector.shape_cast %56 : vector<1x1x32x32xbf16> to vector<32x32xbf16>
    %cst_21 = arith.constant dense<0.000000e+00> : vector<16x32xf32>
    %58 = tpu.matmul %49, %57, %cst_21 {dimension_numbers = #tpu.dot_dimension_numbers<[1], [0], [0], [1], [0, 0, 1, 1], [], []>} : vector<16x32xbf16>, vector<32x32xbf16>, vector<16x32xf32> -> vector<16x32xf32>
    %59 = vector.shape_cast %40 : vector<32xf32> to vector<1x32xf32>
    %60 = vector.broadcast %59 : vector<1x32xf32> to vector<16x32xf32>
    %61 = arith.addf %58, %60 : vector<16x32xf32>
    %c0_22 = arith.constant 0 : index
    %c2 = arith.constant 2 : index
    %c0_23 = arith.constant 0 : index
    %c0_24 = arith.constant 0 : index
    %62 = vector.load %arg3[%c0_22, %c2, %c0_23, %c0_24] : memref<2x3x32x32xbf16, #tpu.memory_space<vmem>>, vector<1x1x32x32xbf16>
    %63 = vector.shape_cast %62 : vector<1x1x32x32xbf16> to vector<32x32xbf16>
    %cst_25 = arith.constant dense<0.000000e+00> : vector<16x32xf32>
    %64 = tpu.matmul %49, %63, %cst_25 {dimension_numbers = #tpu.dot_dimension_numbers<[1], [0], [0], [1], [0, 0, 1, 1], [], []>} : vector<16x32xbf16>, vector<32x32xbf16>, vector<16x32xf32> -> vector<16x32xf32>
    %65 = vector.shape_cast %41 : vector<32xf32> to vector<1x32xf32>
    %66 = vector.broadcast %65 : vector<1x32xf32> to vector<16x32xf32>
    %67 = arith.addf %64, %66 : vector<16x32xf32>
    %68 = vector.shape_cast %55 : vector<16x32xf32> to vector<2x8x4x8xf32>
    %69 = tpu.transpose %68, [0, 2, 1, 3] : vector<2x8x4x8xf32> -> vector<2x4x8x8xf32>
    %70 = vector.shape_cast %69 : vector<2x4x8x8xf32> to vector<8x8x8xf32>
    %71 = arith.truncf %70 : vector<8x8x8xf32> to vector<8x8x8xbf16>
    %72 = vector.shape_cast %61 : vector<16x32xf32> to vector<2x8x4x8xf32>
    %73 = tpu.transpose %72, [0, 2, 1, 3] : vector<2x8x4x8xf32> -> vector<2x4x8x8xf32>
    %74 = vector.shape_cast %73 : vector<2x4x8x8xf32> to vector<8x8x8xf32>
    %75 = arith.truncf %74 : vector<8x8x8xf32> to vector<8x8x8xbf16>
    %76 = vector.shape_cast %67 : vector<16x32xf32> to vector<2x8x4x8xf32>
    %77 = tpu.transpose %76, [0, 2, 1, 3] : vector<2x8x4x8xf32> -> vector<2x4x8x8xf32>
    %78 = vector.shape_cast %77 : vector<2x4x8x8xf32> to vector<8x8x8xf32>
    %79 = arith.truncf %78 : vector<8x8x8xf32> to vector<8x8x8xbf16>
    "tpu.trace_start"() <{level = 10 : i32, message = "bqd,bkd->bqk"}> : () -> ()
    %cst_26 = arith.constant dense<0.000000e+00> : vector<8x8x8xf32>
    %80 = tpu.matmul %71, %75, %cst_26 {dimension_numbers = #tpu.dot_dimension_numbers<[2], [2], [1], [1], [0, 0, 0, 1, 1, 1], [0], [0]>} : vector<8x8x8xbf16>, vector<8x8x8xbf16>, vector<8x8x8xf32> -> vector<8x8x8xf32>
    "tpu.trace_stop"() : () -> ()
    %81 = vector.broadcast %36 : vector<8x1x8xf32> to vector<8x8x8xf32>
    %82 = arith.addf %80, %81 : vector<8x8x8xf32>
    %cst_27 = arith.constant dense<0xFF800000> : vector<8x8xf32>
    %83 = vector.multi_reduction <maximumf>, %82, %cst_27 [2] : vector<8x8x8xf32> to vector<8x8xf32>
    %84 = vector.shape_cast %83 : vector<8x8xf32> to vector<8x8x1xf32>
    %85 = vector.broadcast %84 : vector<8x8x1xf32> to vector<8x8x8xf32>
    %86 = arith.subf %82, %85 : vector<8x8x8xf32>
    %87 = math.exp %86 : vector<8x8x8xf32>
    %cst_28 = arith.constant dense<0.000000e+00> : vector<8x8xf32>
    %88 = vector.multi_reduction <add>, %87, %cst_28 [2] : vector<8x8x8xf32> to vector<8x8xf32>
    %89 = vector.shape_cast %88 : vector<8x8xf32> to vector<8x8x1xf32>
    %90 = tpu.reciprocal %89 {approx = true} : vector<8x8x1xf32> -> vector<8x8x1xf32>
    %91 = vector.broadcast %90 : vector<8x8x1xf32> to vector<8x8x8xf32>
    %92 = arith.mulf %87, %91 : vector<8x8x8xf32>
    %93 = arith.truncf %92 : vector<8x8x8xf32> to vector<8x8x8xbf16>
    "tpu.trace_start"() <{level = 10 : i32, message = "bqk,bkd->bqd"}> : () -> ()
    %cst_29 = arith.constant dense<0.000000e+00> : vector<8x8x8xf32>
    %94 = tpu.matmul %93, %79, %cst_29 {dimension_numbers = #tpu.dot_dimension_numbers<[2], [1], [1], [2], [0, 0, 0, 1, 1, 2], [0], [0]>} : vector<8x8x8xbf16>, vector<8x8x8xbf16>, vector<8x8x8xf32> -> vector<8x8x8xf32>
    "tpu.trace_stop"() : () -> ()
    %95 = vector.shape_cast %94 : vector<8x8x8xf32> to vector<2x4x8x8xf32>
    %96 = tpu.transpose %95, [0, 2, 1, 3] : vector<2x4x8x8xf32> -> vector<2x8x4x8xf32>
    %97 = vector.shape_cast %96 : vector<2x8x4x8xf32> to vector<16x32xf32>
    %98 = arith.truncf %97 : vector<16x32xf32> to vector<16x32xbf16>
    %c0_30 = arith.constant 0 : index
    %c0_31 = arith.constant 0 : index
    %c0_32 = arith.constant 0 : index
    %99 = vector.load %arg4[%c0_30, %c0_31, %c0_32] : memref<2x32x32xbf16, #tpu.memory_space<vmem>>, vector<1x32x32xbf16>
    %100 = vector.shape_cast %99 : vector<1x32x32xbf16> to vector<32x32xbf16>
    %cst_33 = arith.constant dense<0.000000e+00> : vector<16x32xf32>
    %101 = tpu.matmul %98, %100, %cst_33 {dimension_numbers = #tpu.dot_dimension_numbers<[1], [0], [0], [1], [0, 0, 1, 1], [], []>} : vector<16x32xbf16>, vector<32x32xbf16>, vector<16x32xf32> -> vector<16x32xf32>
    %102 = vector.shape_cast %42 : vector<32xf32> to vector<1x32xf32>
    %103 = vector.broadcast %102 : vector<1x32xf32> to vector<16x32xf32>
    %104 = arith.addf %101, %103 : vector<16x32xf32>
    %105 = arith.addf %31, %104 : vector<16x32xf32>
    %cst_34 = arith.constant dense<0.000000e+00> : vector<16xf32>
    %106 = vector.multi_reduction <add>, %105, %cst_34 [1] : vector<16x32xf32> to vector<16xf32>
    %107 = vector.shape_cast %106 : vector<16xf32> to vector<16x1xf32>
    %108 = arith.mulf %105, %105 : vector<16x32xf32>
    %cst_35 = arith.constant dense<0.000000e+00> : vector<16xf32>
    %109 = vector.multi_reduction <add>, %108, %cst_35 [1] : vector<16x32xf32> to vector<16xf32>
    %110 = vector.shape_cast %109 : vector<16xf32> to vector<16x1xf32>
    %cst_36 = arith.constant 3.125000e-02 : f32
    %111 = vector.broadcast %cst_36 : f32 to vector<16x1xf32>
    %112 = arith.mulf %107, %111 : vector<16x1xf32>
    %cst_37 = arith.constant 3.125000e-02 : f32
    %113 = vector.broadcast %cst_37 : f32 to vector<16x1xf32>
    %114 = arith.mulf %110, %113 : vector<16x1xf32>
    %115 = arith.mulf %112, %112 : vector<16x1xf32>
    %116 = arith.subf %114, %115 : vector<16x1xf32>
    %117 = vector.broadcast %112 : vector<16x1xf32> to vector<16x32xf32>
    %118 = arith.subf %105, %117 : vector<16x32xf32>
    %cst_38 = arith.constant 9.99999974E-6 : f32
    %119 = vector.broadcast %cst_38 : f32 to vector<16x1xf32>
    %120 = arith.addf %116, %119 : vector<16x1xf32>
    %121 = math.rsqrt %120 : vector<16x1xf32>
    %122 = vector.broadcast %121 : vector<16x1xf32> to vector<16x32xf32>
    %123 = arith.mulf %118, %122 : vector<16x32xf32>
    %124 = vector.shape_cast %43 : vector<32xf32> to vector<1x32xf32>
    %125 = vector.broadcast %124 : vector<1x32xf32> to vector<16x32xf32>
    %126 = arith.mulf %123, %125 : vector<16x32xf32>
    %127 = vector.shape_cast %44 : vector<32xf32> to vector<1x32xf32>
    %128 = vector.broadcast %127 : vector<1x32xf32> to vector<16x32xf32>
    %129 = arith.addf %126, %128 : vector<16x32xf32>
    %130 = arith.truncf %129 : vector<16x32xf32> to vector<16x32xbf16>
    %c0_39 = arith.constant 0 : index
    %c0_40 = arith.constant 0 : index
    %c0_41 = arith.constant 0 : index
    %131 = vector.load %arg5[%c0_39, %c0_40, %c0_41] : memref<2x32x64xbf16, #tpu.memory_space<vmem>>, vector<1x32x64xbf16>
    %132 = vector.shape_cast %131 : vector<1x32x64xbf16> to vector<32x64xbf16>
    %cst_42 = arith.constant dense<0.000000e+00> : vector<16x64xf32>
    %133 = tpu.matmul %130, %132, %cst_42 {dimension_numbers = #tpu.dot_dimension_numbers<[1], [0], [0], [1], [0, 0, 1, 1], [], []>} : vector<16x32xbf16>, vector<32x64xbf16>, vector<16x64xf32> -> vector<16x64xf32>
    %134 = vector.shape_cast %45 : vector<64xf32> to vector<1x64xf32>
    %135 = vector.broadcast %134 : vector<1x64xf32> to vector<16x64xf32>
    %136 = arith.addf %133, %135 : vector<16x64xf32>
    %137 = arith.mulf %136, %136 : vector<16x64xf32>
    %138 = arith.mulf %136, %137 : vector<16x64xf32>
    %cst_43 = arith.constant 4.471500e-02 : f32
    %139 = vector.broadcast %cst_43 : f32 to vector<16x64xf32>
    %140 = arith.mulf %139, %138 : vector<16x64xf32>
    %141 = arith.addf %136, %140 : vector<16x64xf32>
    %cst_44 = arith.constant 0.797884583 : f32
    %142 = vector.broadcast %cst_44 : f32 to vector<16x64xf32>
    %143 = arith.mulf %142, %141 : vector<16x64xf32>
    %144 = math.tanh %143 : vector<16x64xf32>
    %cst_45 = arith.constant 1.000000e+00 : f32
    %145 = vector.broadcast %cst_45 : f32 to vector<16x64xf32>
    %146 = arith.addf %145, %144 : vector<16x64xf32>
    %cst_46 = arith.constant 5.000000e-01 : f32
    %147 = vector.broadcast %cst_46 : f32 to vector<16x64xf32>
    %148 = arith.mulf %147, %146 : vector<16x64xf32>
    %149 = arith.mulf %136, %148 : vector<16x64xf32>
    %150 = arith.truncf %149 : vector<16x64xf32> to vector<16x64xbf16>
    %c0_47 = arith.constant 0 : index
    %c0_48 = arith.constant 0 : index
    %c0_49 = arith.constant 0 : index
    %151 = vector.load %arg6[%c0_47, %c0_48, %c0_49] : memref<2x64x32xbf16, #tpu.memory_space<vmem>>, vector<1x64x32xbf16>
    %152 = vector.shape_cast %151 : vector<1x64x32xbf16> to vector<64x32xbf16>
    %cst_50 = arith.constant dense<0.000000e+00> : vector<16x32xf32>
    %153 = tpu.matmul %150, %152, %cst_50 {dimension_numbers = #tpu.dot_dimension_numbers<[1], [0], [0], [1], [0, 0, 1, 1], [], []>} : vector<16x64xbf16>, vector<64x32xbf16>, vector<16x32xf32> -> vector<16x32xf32>
    %154 = vector.shape_cast %46 : vector<32xf32> to vector<1x32xf32>
    %155 = vector.broadcast %154 : vector<1x32xf32> to vector<16x32xf32>
    %156 = arith.addf %153, %155 : vector<16x32xf32>
    %157 = arith.addf %129, %156 : vector<16x32xf32>
    %cst_51 = arith.constant dense<0.000000e+00> : vector<16xf32>
    %158 = vector.multi_reduction <add>, %157, %cst_51 [1] : vector<16x32xf32> to vector<16xf32>
    %159 = vector.shape_cast %158 : vector<16xf32> to vector<16x1xf32>
    %160 = arith.mulf %157, %157 : vector<16x32xf32>
    %cst_52 = arith.constant dense<0.000000e+00> : vector<16xf32>
    %161 = vector.multi_reduction <add>, %160, %cst_52 [1] : vector<16x32xf32> to vector<16xf32>
    %162 = vector.shape_cast %161 : vector<16xf32> to vector<16x1xf32>
    %cst_53 = arith.constant 3.125000e-02 : f32
    %163 = vector.broadcast %cst_53 : f32 to vector<16x1xf32>
    %164 = arith.mulf %159, %163 : vector<16x1xf32>
    %cst_54 = arith.constant 3.125000e-02 : f32
    %165 = vector.broadcast %cst_54 : f32 to vector<16x1xf32>
    %166 = arith.mulf %162, %165 : vector<16x1xf32>
    %167 = arith.mulf %164, %164 : vector<16x1xf32>
    %168 = arith.subf %166, %167 : vector<16x1xf32>
    %169 = vector.broadcast %164 : vector<16x1xf32> to vector<16x32xf32>
    %170 = arith.subf %157, %169 : vector<16x32xf32>
    %cst_55 = arith.constant 9.99999974E-6 : f32
    %171 = vector.broadcast %cst_55 : f32 to vector<16x1xf32>
    %172 = arith.addf %168, %171 : vector<16x1xf32>
    %173 = math.rsqrt %172 : vector<16x1xf32>
    %174 = vector.broadcast %173 : vector<16x1xf32> to vector<16x32xf32>
    %175 = arith.mulf %170, %174 : vector<16x32xf32>
    %176 = vector.shape_cast %47 : vector<32xf32> to vector<1x32xf32>
    %177 = vector.broadcast %176 : vector<1x32xf32> to vector<16x32xf32>
    %178 = arith.mulf %175, %177 : vector<16x32xf32>
    %179 = vector.shape_cast %48 : vector<32xf32> to vector<1x32xf32>
    %180 = vector.broadcast %179 : vector<1x32xf32> to vector<16x32xf32>
    %181 = arith.addf %178, %180 : vector<16x32xf32>
    %c1_56 = arith.constant 1 : index
    %c0_57 = arith.constant 0 : index
    %182 = vector.load %arg7[%c1_56, %c0_57] : memref<2x352xf32, #tpu.memory_space<vmem>>, vector<1x352xf32>
    %183 = vector.shape_cast %182 : vector<1x352xf32> to vector<352xf32>
    %184 = vector.extract_strided_slice %183 {offsets = [0], sizes = [32], strides = [1]} : vector<352xf32> to vector<32xf32>
    %185 = vector.extract_strided_slice %183 {offsets = [32], sizes = [32], strides = [1]} : vector<352xf32> to vector<32xf32>
    %186 = vector.extract_strided_slice %183 {offsets = [64], sizes = [32], strides = [1]} : vector<352xf32> to vector<32xf32>
    %187 = vector.extract_strided_slice %183 {offsets = [96], sizes = [32], strides = [1]} : vector<352xf32> to vector<32xf32>
    %188 = vector.extract_strided_slice %183 {offsets = [128], sizes = [32], strides = [1]} : vector<352xf32> to vector<32xf32>
    %189 = vector.extract_strided_slice %183 {offsets = [160], sizes = [32], strides = [1]} : vector<352xf32> to vector<32xf32>
    %190 = vector.extract_strided_slice %183 {offsets = [192], sizes = [64], strides = [1]} : vector<352xf32> to vector<64xf32>
    %191 = vector.extract_strided_slice %183 {offsets = [256], sizes = [32], strides = [1]} : vector<352xf32> to vector<32xf32>
    %192 = vector.extract_strided_slice %183 {offsets = [288], sizes = [32], strides = [1]} : vector<352xf32> to vector<32xf32>
    %193 = vector.extract_strided_slice %183 {offsets = [320], sizes = [32], strides = [1]} : vector<352xf32> to vector<32xf32>
    %194 = arith.truncf %181 : vector<16x32xf32> to vector<16x32xbf16>
    %c1_58 = arith.constant 1 : index
    %c0_59 = arith.constant 0 : index
    %c0_60 = arith.constant 0 : index
    %c0_61 = arith.constant 0 : index
    %195 = vector.load %arg3[%c1_58, %c0_59, %c0_60, %c0_61] : memref<2x3x32x32xbf16, #tpu.memory_space<vmem>>, vector<1x1x32x32xbf16>
    %196 = vector.shape_cast %195 : vector<1x1x32x32xbf16> to vector<32x32xbf16>
    %cst_62 = arith.constant dense<0.000000e+00> : vector<16x32xf32>
    %197 = tpu.matmul %194, %196, %cst_62 {dimension_numbers = #tpu.dot_dimension_numbers<[1], [0], [0], [1], [0, 0, 1, 1], [], []>} : vector<16x32xbf16>, vector<32x32xbf16>, vector<16x32xf32> -> vector<16x32xf32>
    %198 = vector.shape_cast %184 : vector<32xf32> to vector<1x32xf32>
    %199 = vector.broadcast %198 : vector<1x32xf32> to vector<16x32xf32>
    %200 = arith.addf %197, %199 : vector<16x32xf32>
    %c1_63 = arith.constant 1 : index
    %c1_64 = arith.constant 1 : index
    %c0_65 = arith.constant 0 : index
    %c0_66 = arith.constant 0 : index
    %201 = vector.load %arg3[%c1_63, %c1_64, %c0_65, %c0_66] : memref<2x3x32x32xbf16, #tpu.memory_space<vmem>>, vector<1x1x32x32xbf16>
    %202 = vector.shape_cast %201 : vector<1x1x32x32xbf16> to vector<32x32xbf16>
    %cst_67 = arith.constant dense<0.000000e+00> : vector<16x32xf32>
    %203 = tpu.matmul %194, %202, %cst_67 {dimension_numbers = #tpu.dot_dimension_numbers<[1], [0], [0], [1], [0, 0, 1, 1], [], []>} : vector<16x32xbf16>, vector<32x32xbf16>, vector<16x32xf32> -> vector<16x32xf32>
    %204 = vector.shape_cast %185 : vector<32xf32> to vector<1x32xf32>
    %205 = vector.broadcast %204 : vector<1x32xf32> to vector<16x32xf32>
    %206 = arith.addf %203, %205 : vector<16x32xf32>
    %c1_68 = arith.constant 1 : index
    %c2_69 = arith.constant 2 : index
    %c0_70 = arith.constant 0 : index
    %c0_71 = arith.constant 0 : index
    %207 = vector.load %arg3[%c1_68, %c2_69, %c0_70, %c0_71] : memref<2x3x32x32xbf16, #tpu.memory_space<vmem>>, vector<1x1x32x32xbf16>
    %208 = vector.shape_cast %207 : vector<1x1x32x32xbf16> to vector<32x32xbf16>
    %cst_72 = arith.constant dense<0.000000e+00> : vector<16x32xf32>
    %209 = tpu.matmul %194, %208, %cst_72 {dimension_numbers = #tpu.dot_dimension_numbers<[1], [0], [0], [1], [0, 0, 1, 1], [], []>} : vector<16x32xbf16>, vector<32x32xbf16>, vector<16x32xf32> -> vector<16x32xf32>
    %210 = vector.shape_cast %186 : vector<32xf32> to vector<1x32xf32>
    %211 = vector.broadcast %210 : vector<1x32xf32> to vector<16x32xf32>
    %212 = arith.addf %209, %211 : vector<16x32xf32>
    %213 = vector.shape_cast %200 : vector<16x32xf32> to vector<2x8x4x8xf32>
    %214 = tpu.transpose %213, [0, 2, 1, 3] : vector<2x8x4x8xf32> -> vector<2x4x8x8xf32>
    %215 = vector.shape_cast %214 : vector<2x4x8x8xf32> to vector<8x8x8xf32>
    %216 = arith.truncf %215 : vector<8x8x8xf32> to vector<8x8x8xbf16>
    %217 = vector.shape_cast %206 : vector<16x32xf32> to vector<2x8x4x8xf32>
    %218 = tpu.transpose %217, [0, 2, 1, 3] : vector<2x8x4x8xf32> -> vector<2x4x8x8xf32>
    %219 = vector.shape_cast %218 : vector<2x4x8x8xf32> to vector<8x8x8xf32>
    %220 = arith.truncf %219 : vector<8x8x8xf32> to vector<8x8x8xbf16>
    %221 = vector.shape_cast %212 : vector<16x32xf32> to vector<2x8x4x8xf32>
    %222 = tpu.transpose %221, [0, 2, 1, 3] : vector<2x8x4x8xf32> -> vector<2x4x8x8xf32>
    %223 = vector.shape_cast %222 : vector<2x4x8x8xf32> to vector<8x8x8xf32>
    %224 = arith.truncf %223 : vector<8x8x8xf32> to vector<8x8x8xbf16>
    "tpu.trace_start"() <{level = 10 : i32, message = "bqd,bkd->bqk"}> : () -> ()
    %cst_73 = arith.constant dense<0.000000e+00> : vector<8x8x8xf32>
    %225 = tpu.matmul %216, %220, %cst_73 {dimension_numbers = #tpu.dot_dimension_numbers<[2], [2], [1], [1], [0, 0, 0, 1, 1, 1], [0], [0]>} : vector<8x8x8xbf16>, vector<8x8x8xbf16>, vector<8x8x8xf32> -> vector<8x8x8xf32>
    "tpu.trace_stop"() : () -> ()
    %226 = vector.broadcast %36 : vector<8x1x8xf32> to vector<8x8x8xf32>
    %227 = arith.addf %225, %226 : vector<8x8x8xf32>
    %cst_74 = arith.constant dense<0xFF800000> : vector<8x8xf32>
    %228 = vector.multi_reduction <maximumf>, %227, %cst_74 [2] : vector<8x8x8xf32> to vector<8x8xf32>
    %229 = vector.shape_cast %228 : vector<8x8xf32> to vector<8x8x1xf32>
    %230 = vector.broadcast %229 : vector<8x8x1xf32> to vector<8x8x8xf32>
    %231 = arith.subf %227, %230 : vector<8x8x8xf32>
    %232 = math.exp %231 : vector<8x8x8xf32>
    %cst_75 = arith.constant dense<0.000000e+00> : vector<8x8xf32>
    %233 = vector.multi_reduction <add>, %232, %cst_75 [2] : vector<8x8x8xf32> to vector<8x8xf32>
    %234 = vector.shape_cast %233 : vector<8x8xf32> to vector<8x8x1xf32>
    %235 = tpu.reciprocal %234 {approx = true} : vector<8x8x1xf32> -> vector<8x8x1xf32>
    %236 = vector.broadcast %235 : vector<8x8x1xf32> to vector<8x8x8xf32>
    %237 = arith.mulf %232, %236 : vector<8x8x8xf32>
    %238 = arith.truncf %237 : vector<8x8x8xf32> to vector<8x8x8xbf16>
    "tpu.trace_start"() <{level = 10 : i32, message = "bqk,bkd->bqd"}> : () -> ()
    %cst_76 = arith.constant dense<0.000000e+00> : vector<8x8x8xf32>
    %239 = tpu.matmul %238, %224, %cst_76 {dimension_numbers = #tpu.dot_dimension_numbers<[2], [1], [1], [2], [0, 0, 0, 1, 1, 2], [0], [0]>} : vector<8x8x8xbf16>, vector<8x8x8xbf16>, vector<8x8x8xf32> -> vector<8x8x8xf32>
    "tpu.trace_stop"() : () -> ()
    %240 = vector.shape_cast %239 : vector<8x8x8xf32> to vector<2x4x8x8xf32>
    %241 = tpu.transpose %240, [0, 2, 1, 3] : vector<2x4x8x8xf32> -> vector<2x8x4x8xf32>
    %242 = vector.shape_cast %241 : vector<2x8x4x8xf32> to vector<16x32xf32>
    %243 = arith.truncf %242 : vector<16x32xf32> to vector<16x32xbf16>
    %c1_77 = arith.constant 1 : index
    %c0_78 = arith.constant 0 : index
    %c0_79 = arith.constant 0 : index
    %244 = vector.load %arg4[%c1_77, %c0_78, %c0_79] : memref<2x32x32xbf16, #tpu.memory_space<vmem>>, vector<1x32x32xbf16>
    %245 = vector.shape_cast %244 : vector<1x32x32xbf16> to vector<32x32xbf16>
    %cst_80 = arith.constant dense<0.000000e+00> : vector<16x32xf32>
    %246 = tpu.matmul %243, %245, %cst_80 {dimension_numbers = #tpu.dot_dimension_numbers<[1], [0], [0], [1], [0, 0, 1, 1], [], []>} : vector<16x32xbf16>, vector<32x32xbf16>, vector<16x32xf32> -> vector<16x32xf32>
    %247 = vector.shape_cast %187 : vector<32xf32> to vector<1x32xf32>
    %248 = vector.broadcast %247 : vector<1x32xf32> to vector<16x32xf32>
    %249 = arith.addf %246, %248 : vector<16x32xf32>
    %250 = arith.addf %181, %249 : vector<16x32xf32>
    %cst_81 = arith.constant dense<0.000000e+00> : vector<16xf32>
    %251 = vector.multi_reduction <add>, %250, %cst_81 [1] : vector<16x32xf32> to vector<16xf32>
    %252 = vector.shape_cast %251 : vector<16xf32> to vector<16x1xf32>
    %253 = arith.mulf %250, %250 : vector<16x32xf32>
    %cst_82 = arith.constant dense<0.000000e+00> : vector<16xf32>
    %254 = vector.multi_reduction <add>, %253, %cst_82 [1] : vector<16x32xf32> to vector<16xf32>
    %255 = vector.shape_cast %254 : vector<16xf32> to vector<16x1xf32>
    %cst_83 = arith.constant 3.125000e-02 : f32
    %256 = vector.broadcast %cst_83 : f32 to vector<16x1xf32>
    %257 = arith.mulf %252, %256 : vector<16x1xf32>
    %cst_84 = arith.constant 3.125000e-02 : f32
    %258 = vector.broadcast %cst_84 : f32 to vector<16x1xf32>
    %259 = arith.mulf %255, %258 : vector<16x1xf32>
    %260 = arith.mulf %257, %257 : vector<16x1xf32>
    %261 = arith.subf %259, %260 : vector<16x1xf32>
    %262 = vector.broadcast %257 : vector<16x1xf32> to vector<16x32xf32>
    %263 = arith.subf %250, %262 : vector<16x32xf32>
    %cst_85 = arith.constant 9.99999974E-6 : f32
    %264 = vector.broadcast %cst_85 : f32 to vector<16x1xf32>
    %265 = arith.addf %261, %264 : vector<16x1xf32>
    %266 = math.rsqrt %265 : vector<16x1xf32>
    %267 = vector.broadcast %266 : vector<16x1xf32> to vector<16x32xf32>
    %268 = arith.mulf %263, %267 : vector<16x32xf32>
    %269 = vector.shape_cast %188 : vector<32xf32> to vector<1x32xf32>
    %270 = vector.broadcast %269 : vector<1x32xf32> to vector<16x32xf32>
    %271 = arith.mulf %268, %270 : vector<16x32xf32>
    %272 = vector.shape_cast %189 : vector<32xf32> to vector<1x32xf32>
    %273 = vector.broadcast %272 : vector<1x32xf32> to vector<16x32xf32>
    %274 = arith.addf %271, %273 : vector<16x32xf32>
    %275 = arith.truncf %274 : vector<16x32xf32> to vector<16x32xbf16>
    %c1_86 = arith.constant 1 : index
    %c0_87 = arith.constant 0 : index
    %c0_88 = arith.constant 0 : index
    %276 = vector.load %arg5[%c1_86, %c0_87, %c0_88] : memref<2x32x64xbf16, #tpu.memory_space<vmem>>, vector<1x32x64xbf16>
    %277 = vector.shape_cast %276 : vector<1x32x64xbf16> to vector<32x64xbf16>
    %cst_89 = arith.constant dense<0.000000e+00> : vector<16x64xf32>
    %278 = tpu.matmul %275, %277, %cst_89 {dimension_numbers = #tpu.dot_dimension_numbers<[1], [0], [0], [1], [0, 0, 1, 1], [], []>} : vector<16x32xbf16>, vector<32x64xbf16>, vector<16x64xf32> -> vector<16x64xf32>
    %279 = vector.shape_cast %190 : vector<64xf32> to vector<1x64xf32>
    %280 = vector.broadcast %279 : vector<1x64xf32> to vector<16x64xf32>
    %281 = arith.addf %278, %280 : vector<16x64xf32>
    %282 = arith.mulf %281, %281 : vector<16x64xf32>
    %283 = arith.mulf %281, %282 : vector<16x64xf32>
    %cst_90 = arith.constant 4.471500e-02 : f32
    %284 = vector.broadcast %cst_90 : f32 to vector<16x64xf32>
    %285 = arith.mulf %284, %283 : vector<16x64xf32>
    %286 = arith.addf %281, %285 : vector<16x64xf32>
    %cst_91 = arith.constant 0.797884583 : f32
    %287 = vector.broadcast %cst_91 : f32 to vector<16x64xf32>
    %288 = arith.mulf %287, %286 : vector<16x64xf32>
    %289 = math.tanh %288 : vector<16x64xf32>
    %cst_92 = arith.constant 1.000000e+00 : f32
    %290 = vector.broadcast %cst_92 : f32 to vector<16x64xf32>
    %291 = arith.addf %290, %289 : vector<16x64xf32>
    %cst_93 = arith.constant 5.000000e-01 : f32
    %292 = vector.broadcast %cst_93 : f32 to vector<16x64xf32>
    %293 = arith.mulf %292, %291 : vector<16x64xf32>
    %294 = arith.mulf %281, %293 : vector<16x64xf32>
    %295 = arith.truncf %294 : vector<16x64xf32> to vector<16x64xbf16>
    %c1_94 = arith.constant 1 : index
    %c0_95 = arith.constant 0 : index
    %c0_96 = arith.constant 0 : index
    %296 = vector.load %arg6[%c1_94, %c0_95, %c0_96] : memref<2x64x32xbf16, #tpu.memory_space<vmem>>, vector<1x64x32xbf16>
    %297 = vector.shape_cast %296 : vector<1x64x32xbf16> to vector<64x32xbf16>
    %cst_97 = arith.constant dense<0.000000e+00> : vector<16x32xf32>
    %298 = tpu.matmul %295, %297, %cst_97 {dimension_numbers = #tpu.dot_dimension_numbers<[1], [0], [0], [1], [0, 0, 1, 1], [], []>} : vector<16x64xbf16>, vector<64x32xbf16>, vector<16x32xf32> -> vector<16x32xf32>
    %299 = vector.shape_cast %191 : vector<32xf32> to vector<1x32xf32>
    %300 = vector.broadcast %299 : vector<1x32xf32> to vector<16x32xf32>
    %301 = arith.addf %298, %300 : vector<16x32xf32>
    %302 = arith.addf %274, %301 : vector<16x32xf32>
    %cst_98 = arith.constant dense<0.000000e+00> : vector<16xf32>
    %303 = vector.multi_reduction <add>, %302, %cst_98 [1] : vector<16x32xf32> to vector<16xf32>
    %304 = vector.shape_cast %303 : vector<16xf32> to vector<16x1xf32>
    %305 = arith.mulf %302, %302 : vector<16x32xf32>
    %cst_99 = arith.constant dense<0.000000e+00> : vector<16xf32>
    %306 = vector.multi_reduction <add>, %305, %cst_99 [1] : vector<16x32xf32> to vector<16xf32>
    %307 = vector.shape_cast %306 : vector<16xf32> to vector<16x1xf32>
    %cst_100 = arith.constant 3.125000e-02 : f32
    %308 = vector.broadcast %cst_100 : f32 to vector<16x1xf32>
    %309 = arith.mulf %304, %308 : vector<16x1xf32>
    %cst_101 = arith.constant 3.125000e-02 : f32
    %310 = vector.broadcast %cst_101 : f32 to vector<16x1xf32>
    %311 = arith.mulf %307, %310 : vector<16x1xf32>
    %312 = arith.mulf %309, %309 : vector<16x1xf32>
    %313 = arith.subf %311, %312 : vector<16x1xf32>
    %314 = vector.broadcast %309 : vector<16x1xf32> to vector<16x32xf32>
    %315 = arith.subf %302, %314 : vector<16x32xf32>
    %cst_102 = arith.constant 9.99999974E-6 : f32
    %316 = vector.broadcast %cst_102 : f32 to vector<16x1xf32>
    %317 = arith.addf %313, %316 : vector<16x1xf32>
    %318 = math.rsqrt %317 : vector<16x1xf32>
    %319 = vector.broadcast %318 : vector<16x1xf32> to vector<16x32xf32>
    %320 = arith.mulf %315, %319 : vector<16x32xf32>
    %321 = vector.shape_cast %192 : vector<32xf32> to vector<1x32xf32>
    %322 = vector.broadcast %321 : vector<1x32xf32> to vector<16x32xf32>
    %323 = arith.mulf %320, %322 : vector<16x32xf32>
    %324 = vector.shape_cast %193 : vector<32xf32> to vector<1x32xf32>
    %325 = vector.broadcast %324 : vector<1x32xf32> to vector<16x32xf32>
    %326 = arith.addf %323, %325 : vector<16x32xf32>
    %327 = vector.shape_cast %326 : vector<16x32xf32> to vector<2x8x32xf32>
    %328 = vector.extract_strided_slice %327 {offsets = [0, 0, 0], sizes = [2, 1, 32], strides = [1, 1, 1]} : vector<2x8x32xf32> to vector<2x1x32xf32>
    %329 = vector.shape_cast %328 : vector<2x1x32xf32> to vector<2x32xf32>
    %c0_103 = arith.constant 0 : index
    %c0_104 = arith.constant 0 : index
    %330 = vector.load %arg8[%c0_103, %c0_104] : memref<32x34xbf16, #tpu.memory_space<vmem>>, vector<32x34xbf16>
    %331 = arith.truncf %329 : vector<2x32xf32> to vector<2x32xbf16>
    %332 = vector.extract_strided_slice %330 {offsets = [0, 0], sizes = [32, 32], strides = [1, 1]} : vector<32x34xbf16> to vector<32x32xbf16>
    %cst_105 = arith.constant dense<0.000000e+00> : vector<2x32xf32>
    %333 = tpu.matmul %331, %332, %cst_105 {dimension_numbers = #tpu.dot_dimension_numbers<[1], [0], [0], [1], [0, 0, 1, 1], [], []>} : vector<2x32xbf16>, vector<32x32xbf16>, vector<2x32xf32> -> vector<2x32xf32>
    %334 = vector.shape_cast %4 : vector<32xf32> to vector<1x32xf32>
    %335 = vector.broadcast %334 : vector<1x32xf32> to vector<2x32xf32>
    %336 = arith.addf %333, %335 : vector<2x32xf32>
    %337 = math.tanh %336 : vector<2x32xf32>
    %338 = arith.truncf %337 : vector<2x32xf32> to vector<2x32xbf16>
    %339 = vector.extract_strided_slice %330 {offsets = [0, 32], sizes = [32, 2], strides = [1, 1]} : vector<32x34xbf16> to vector<32x2xbf16>
    %cst_106 = arith.constant dense<0.000000e+00> : vector<2x2xf32>
    %340 = tpu.matmul %338, %339, %cst_106 {dimension_numbers = #tpu.dot_dimension_numbers<[1], [0], [0], [1], [0, 0, 1, 1], [], []>} : vector<2x32xbf16>, vector<32x2xbf16>, vector<2x2xf32> -> vector<2x2xf32>
    %341 = vector.shape_cast %5 : vector<2xf32> to vector<1x2xf32>
    %342 = vector.broadcast %341 : vector<1x2xf32> to vector<2x2xf32>
    %343 = arith.addf %340, %342 : vector<2x2xf32>
    %344 = vector.shape_cast %343 : vector<2x2xf32> to vector<2x1x2xf32>
    %c0_107 = arith.constant 0 : index
    %c0_108 = arith.constant 0 : index
    %c0_109 = arith.constant 0 : index
    %345 = vector.load %arg9[%c0_107, %c0_108, %c0_109] : memref<2x1x2xf32, #tpu.memory_space<vmem>>, vector<2x1x2xf32>
    tpu.vector_store %arg9[%c0_107, %c0_108, %c0_109], %344 {strides = array<i32>} : memref<2x1x2xf32, #tpu.memory_space<vmem>>, vector<2x1x2xf32>,
    return
  }
}

</mosaic_0001>

<bundles_post_ra>
// kernel: tpu_custom_call.1
= control target key start
LH: loop header
LB: loop body
LE: loop exit
PB: predicated region body
PF: predicated region fallthrough
CT: control target
= control target key end

     0   :  { %14 = vsyncpa [#allocation3], 0  ;;  %s7473_s0 = inlined_call_operand.hbm [shape: f32[2,8,32], index: 0, kind: input, shape index: {}]   ;;  %s7474_s1 = inlined_call_operand.hbm [shape: f32[2,1,8], index: 1, kind: input, shape index: {}]   ;;  %s7475_s2 = inlined_call_operand.vmem [shape: f32[1,98], index: 2, kind: input, shape index: {}]   ;;  %s7476_s3 = inlined_call_operand.vmem [shape: bf16[2,3,32,32], index: 3, kind: input, shape index: {}]   ;;  %s7477_s4 = inlined_call_operand.hbm [shape: bf16[2,32,32], index: 4, kind: input, shape index: {}]   ;;  %s7478_s5 = inlined_call_operand.hbm [shape: bf16[2,32,64], index: 5, kind: input, shape index: {}]   ;;  %s7479_s6 = inlined_call_operand.vmem [shape: bf16[2,64,32], index: 6, kind: input, shape index: {}]   ;;  %s7480_s7 = inlined_call_operand.vmem [shape: f32[2,352], index: 7, kind: input, shape index: {}]   ;;  %s7481_s8 = inlined_call_operand.hbm [shape: bf16[32,34], index: 8, kind: input, shape index: {}]   ;;  %s7482_s9 = inlined_call_operand.hbm [shape: f32[2,1,2], index: 9, kind: output, shape index: {}]  }
   0x1   :  { %15 = vsyncpa [#allocation6], 0 }
   0x2   :  { %16 = vsyncpa [#allocation9], 0 }
   0x3   :  { %17 = vsyncpa [#allocation4], 0  ;;  %s6330_s30 = smov [#allocation5]  }
   0x4   :  { %s35_s10 = sshll.u32 %s6330_s30, 4  ;;  %s36_s10 = int_to_ptr.vmem [resolvable:$true] %s35_s10 }
   0x5   :  { %s6210_s11 = scalar_lea.vmem %s36_s10, 32  ;;  %p6215_p1 = scmp.lt.s32.totalorder %s36_s10, %s36_s10 }
   0x6   :  { %p6211_p0 = scmp.ne.s32.totalorder %s36_s10, %s6210_s11  ;;  %p6216_p2 = scmp.lt.s32.totalorder %s6210_s11, %s6210_s11 }
   0x8   :  { %p6217_p3 = por %p6216_p2, %p6215_p1 }
   0xa   :  { %p6218_p4 = pnand %p6217_p3, %p6211_p0 }
   0xc   :  { %6221 = shalt.err (!%p6218_p4)
}
   0xd   :  { %s6331_s12 = smov 16   ;;  %s6332_s13 = smov 1  }
   0xe   :  { %41 = dma.hbm_to_vmem [thread:$0]  %s7474_s1, 32, %s36_s10, [#allocation6], %s6331_s12, %s6331_s12, %s6332_s13  }
   0xf   :  { %s6333_s16 = smov [#allocation8]   ;;  %s6334_s18 = smov [#allocation2]  }
  0x10   :  { %s63_s17 = sshll.u32 %s6333_s16, 4  ;;  %s23_s19 = sshll.u32 %s6334_s18, 4  ;;  %s64_s17 = int_to_ptr.vmem [resolvable:$true] %s63_s17  ;;  %s24_s19 = int_to_ptr.vmem [resolvable:$true] %s23_s19 }
  0x11   :  { %s6230_s20 = scalar_lea.vmem %s64_s17, 512  ;;  %p6235_p6 = scmp.lt.s32.totalorder %s64_s17, %s64_s17 }
  0x12   :  { %p6231_p5 = scmp.ne.s32.totalorder %s64_s17, %s6230_s20  ;;  %p6236_p7 = scmp.lt.s32.totalorder %s6230_s20, %s6230_s20 }
  0x14   :  { %p6237_p8 = por %p6236_p7, %p6235_p6 }
  0x16   :  { %p6238_p9 = pnand %p6237_p8, %p6231_p5 }
  0x18   :  { %6241 = shalt.err (!%p6238_p9)
}
  0x19   :  { %s6335_s21 = smov 64   ;;  %s6336_s22 = smov 4  }
  0x1a   :  { %69 = dma.hbm_to_vmem [thread:$0]  %s7478_s5, 512, %s64_s17, [#allocation9], %s6335_s21, %s6335_s21, %s6336_s22  }
  0x1b   :  { %s6250_s1 = scalar_lea.vmem %s24_s19, 256  ;;  %p6255_p11 = scmp.lt.s32.totalorder %s24_s19, %s24_s19 }
  0x1c   :  { %p6251_p10 = scmp.ne.s32.totalorder %s24_s19, %s6250_s1  ;;  %p6256_p12 = scmp.lt.s32.totalorder %s6250_s1, %s6250_s1 }
  0x1e   :  { %p6257_p13 = por %p6256_p12, %p6255_p11 }
  0x20   :  { %p6258_p0 = pnand %p6257_p13, %p6251_p10 }
  0x22   :  { %6261 = shalt.err (!%p6258_p0)
}
  0x23   :  { %s6337_s25 = smov 128   ;;  %s6338_s26 = smov 8  }
  0x24   :  { %29 = dma.hbm_to_vmem [thread:$0]  %s7473_s0, 256, %s24_s19, [#allocation3], %s6337_s25, %s6337_s25, %s6338_s26  }
  0x25   :  { %s6339_s29 = smov [#allocation7]   ;;  %s6340_s10 = smov [#allocation10]  }
  0x26   :  { %s51_s30 = sshll.u32 %s6339_s29, 4  ;;  %s79_s5 = sshll.u32 %s6340_s10, 4  ;;  %s52_s30 = int_to_ptr.vmem [resolvable:$true] %s51_s30  ;;  %s80_s5 = int_to_ptr.vmem [resolvable:$true] %s79_s5 }
  0x27   :  { %s6270_s11 = scalar_lea.vmem %s52_s30, 512  ;;  %p6275_p2 = scmp.lt.s32.totalorder %s52_s30, %s52_s30 }
  0x28   :  { %p6271_p1 = scmp.ne.s32.totalorder %s52_s30, %s6270_s11  ;;  %p6276_p3 = scmp.lt.s32.totalorder %s6270_s11, %s6270_s11 }
  0x2a   :  { %p6277_p4 = por %p6276_p3, %p6275_p2 }
  0x2c   :  { %p6278_p5 = pnand %p6277_p4, %p6271_p1 }
  0x2e   :  { %6281 = shalt.err (!%p6278_p5)
}
  0x2f   :  { %57 = dma.hbm_to_vmem [thread:$0]  %s7477_s4, 512, %s52_s30, [#allocation6], %s6335_s21, %s6335_s21, %s6336_s22  }
  0x30   :  { %s6290_s0 = scalar_lea.vmem %s80_s5, 256  ;;  %p6295_p7 = scmp.lt.s32.totalorder %s80_s5, %s80_s5 }
  0x31   :  { %p6291_p6 = scmp.ne.s32.totalorder %s80_s5, %s6290_s0  ;;  %p6296_p8 = scmp.lt.s32.totalorder %s6290_s0, %s6290_s0 }
  0x33   :  { %p6297_p9 = por %p6296_p8, %p6295_p7 }
  0x35   :  { %p6298_p10 = pnand %p6297_p9, %p6291_p6 }
  0x37   :  { %6301 = shalt.err (!%p6298_p10)
}
  0x38   :  { %85 = dma.hbm_to_vmem [thread:$0]  %s7481_s8, 256, %s80_s5, [#allocation9], %s6335_s21, %s6335_s21, %s6336_s22  }
  0x39   :  { %6322 = dma.done.wait [#allocation3], 256  }
  0x3a   :  { %6323 = vsyncadd [#allocation3], 4294967040 }
  0x3b   :  { %6324 = dma.done.wait [#allocation6], 544  }
  0x3c   :  { %6325 = vsyncadd [#allocation6], 4294966752 }
  0x3d   :  { %6326 = dma.done.wait [#allocation9], 768  }
  0x3e   :  { %6327 = vsyncadd [#allocation9], 4294966528  ;;  %vm105_vm0 = vcmask 261120   ;;  %v103_v0 = vld [vmem:[#allocation2] sm:$0xff]  ;;  %v104_v1 = vld [vmem:[#allocation2 + $0x8] sm:$0xff]  ;;  %s6341_s18 = smov 96   ;;  %v158_v14 = vlaneseq }
  0x3f   :  { %v106_v2 = vsel %vm105_vm0, %v103_v0, 0.0  ;;  %v112_v3 = vmul.f32 %v103_v0, %v103_v0  ;;  %v109_v4 = vsel %vm105_vm0, %v104_v1, 0.0  ;;  %v113_v5 = vmul.f32 %v104_v1, %v104_v1  ;;  %v5458_v8 = vld [vmem:[%s7475_s2] ss:$0 sm:$0xff]  ;;  %v6073_v9 = vld [vmem:[%s7476_s3 + $0x8] sm:$0xff]   ;;  %v6074_v10 = vld [vmem:[%s7476_s3 + $0x18] sm:$0xff]  }
  0x40   :  { %107 = vadd.xlane.f32.xlu0 %v106_v2  ;;  %v6342_v11 = vmov 0.0   ;;  %v6075_v12 = vld [vmem:[%s7476_s3] sm:$0xff]   ;;  %v6076_v13 = vld [vmem:[%s7476_s3 + $0x10] sm:$0xff]   ;;  %vm6343_vm1 = vmmov 0   ;;  %v6461_v15 = vshrl.u32 %v158_v14, 7  ;;  %v6077_v44 = vld [vmem:[%s7476_s3 + $0x28] sm:$0xff]  }
  0x41   :  { %v114_v6 = vsel %vm105_vm0, %v112_v3, 0.0  ;;  %v117_v7 = vsel %vm105_vm0, %v113_v5, 0.0  ;;  %5708 = vmatprep.subr.bf16.mxu0 %v6342_v11  ;;  %5716 = vmatprep.subr.bf16.mxu1 %v6342_v11  ;;  %v151_v16 = vld [vmem:[%s7480_s7] ss:$2 sm:$0x7]  ;;  %s6344_s14 = smov 104  }
  0x42   :  { %115 = vadd.xlane.f32.xlu1 %v114_v6  ;;  %5709 = vmatpush3.bf16.msra.mxu0 %v6073_v9  ;;  %v6467_v17 = vsub.s32 0, %v6461_v15  ;;  %v6078_v46 = vld [vmem:[%s7476_s3 + $0x20] sm:$0xff]   ;;  %s6345_s15 = smov 120   ;;  %s6346_s0 = smov 112   ;;  %v6348_v2 = vmov 1934713408  }
  0x43   :  { %5717 = vmatpush3.bf16.msra.mxu1 %v6074_v10  ;;  %5710 = vmatprep.subr.bf16.mxu0 %v6342_v11  ;;  %v396_v3 = vunpack.c.l.s4 %v6348_v2  ;;  %vm1253_vm2 = vcmask 64512   ;;  %vm1721_vm3 = vcmask 1043456   ;;  %s6349_s16 = smov 24   ;;  %s6350_s17 = smov 32   ;;  %vm2385_vm4 = vcmask 130048  }
  0x44   :  { %110 = vadd.xlane.f32.xlu0 %v109_v4  ;;  %5718 = vmatprep.subr.bf16.mxu1 %v6342_v11  ;;  %v6470_v18 = vrot.slane %v151_v16, %v6467_v17  ;;  %vm2388_vm5 = vcmask 195584   ;;  %vm2631_vm6 = vcmask 523264   ;;  %vm5296_vm7 = vcmask 1041409  }
  0x45   :  { %5712 = vmatprep.mubr.msk.bf16.mxu0 %vm6343_vm1, %v6342_v11  ;;  %5720 = vmatprep.mubr.msk.bf16.mxu1 %vm6343_vm1, %v6342_v11  ;;  %vm5436_vm8 = vcmask 8192  }
  0x46   :  { %118 = vadd.xlane.f32.xlu1 %v117_v7  ;;  %5711 = vmatpush3.bf16.msra.mxu0 %v6075_v12  ;;  %v397_v7 = vunpack.c.0.s8 %v396_v3 }
  0x47   :  { %5719 = vmatpush3.bf16.msra.mxu1 %v6076_v13  ;;  %5724 = vmatprep.subr.bf16.mxu0 %v6342_v11 }
  0x48   :  { %5732 = vmatprep.subr.bf16.mxu1 %v6342_v11 }
  0x57   :  { %236 = vrot.lane.b32.xlu1 %v6470_v18, %s6341_s18 }
  0x5a   :  { %144 = vrot.lane.b32.xlu0 %v5458_v8, %s6341_s18 }
  0xc9   :  { %v108_v19 = vpop.xlane.xlu0 %107 }
  0xca   :  { %v120_v20 = vmul.f32 0.03125, %v108_v19  ;;  %v6531_v19 = vsub.s32 %v397_v7, %v6461_v15 }
  0xcb   :  { %v116_v21 = vpop.xlane.xlu1 %115 }
  0xcc   :  { %v124_v22 = vmul.f32 %v120_v20, %v120_v20  ;;  %v122_v23 = vmul.f32 0.03125, %v116_v21  ;;  %v128_v33 = vsub.f32 %v103_v0, %v120_v20  ;;  %v6347_v0 = vmov 1983009808  }
  0xcd   :  { %v111_v24 = vpop.xlane.xlu0 %110 }
  0xce   :  { %v126_v25 = vsub.f32 %v122_v23, %v124_v22  ;;  %v121_v26 = vmul.f32 0.03125, %v111_v24 }
  0xcf   :  { %v119_v27 = vpop.xlane.xlu1 %118 }
  0xd0   :  { %v130_v28 = vadd.f32 1e-05, %v126_v25  ;;  %v125_v29 = vmul.f32 %v121_v26, %v121_v26  ;;  %v123_v30 = vmul.f32 0.03125, %v119_v27  ;;  %v129_v36 = vsub.f32 %v104_v1, %v121_v26 }
  0xd1   :  { %v145_v40 = vpop.permute.xlu0 %144  ;;  %v364_v1 = vunpack.c.l.s4 %v6347_v0 }
  0xd2   :  { %6103 = vrsqrt.f32 %v130_v28  ;;  %v127_v31 = vsub.f32 %v123_v30, %v125_v29 }
  0xd3   :  { %v237_v47 = vpop.permute.xlu1 %236  ;;  %v365_v4 = vunpack.c.0.s8 %v364_v1 }
  0xd4   :  { %v131_v32 = vadd.f32 1e-05, %v127_v31 }
  0xd6   :  { %6105 = vrsqrt.f32 %v131_v32 }
  0xdf   :  { %v6104_v34 = vpop.eup %6103 }
  0xe0   :  { %v134_v35 = vmul.f32 %v6104_v34, %v128_v33 }
  0xe2   :  { %v142_v39 = vmul.f32 %v5458_v8, %v134_v35 }
  0xe3   :  { %v6106_v37 = vpop.eup %6105 }
  0xe4   :  { %v135_v38 = vmul.f32 %v6106_v37, %v129_v36  ;;  %v6474_v42 = vadd.f32 %v145_v40, %v142_v39 }
  0xe6   :  { %v143_v41 = vmul.f32 %v5458_v8, %v135_v38  ;;  %v6528_v8 = vsub.s32 %v365_v4, %v6461_v15 }
  0xe8   :  { %v6476_v43 = vadd.f32 %v145_v40, %v143_v41 }
  0xea   :  { %v152_v45 = vpack.c.bf16 %v6476_v43, %v6474_v42 }
  0xec   :  { %5713 = vmatmul.mubr.msk.bf16.vlgmr.msra.gmra.mxu0 %vm105_vm0, %v152_v45  ;;  %5721 = vmatmul.mubr.msk.bf16.vlgmr.msra.gmra.mxu1 %vm105_vm0, %v152_v45 }
  0xed   :  { %5725 = vmatpush3.bf16.msra.mxu0 %v6077_v44  ;;  %5728 = vmatprep.mubr.msk.bf16.mxu0 %vm6343_vm1, %v6342_v11 }
  0xee   :  { %5726 = vmatprep.subr.bf16.mxu0 %v6342_v11  ;;  %5734 = vmatprep.mubr.msk.bf16.mxu1 %vm6343_vm1, %v6342_v11 }
  0xf1   :  { %5727 = vmatpush3.bf16.msra.mxu0 %v6078_v46 }
  0xf2   :  { %5738 = vmatprep.subr.bf16.mxu0 %v6342_v11 }
  0xf4   :  { %5729 = vmatmul.mubr.msk.bf16.vlgmr.msra.gmra.mxu0 %vm105_vm0, %v152_v45 }
  0xf5   :  { %5740 = vmatprep.mubr.msk.bf16.mxu0 %vm6343_vm1, %v6342_v11 }
 0x1ac   :  { %v212_v48 = vpop.f32.mrf.mxu0  ;;  %v273_v49 = vpop.f32.mrf.mxu1 }
 0x1ad   :  { %v274_v50 = vadd.f32 %v273_v49, %v237_v47  ;;  %v213_v55 = vadd.f32 %v212_v48, %v6470_v18 }
 0x1ae   :  { %v5714_v51 = vpop.f32.mrf.mxu0  ;;  %v5722_v52 = vpop.f32.mrf.mxu1 }
 0x1af   :  { %655 = vrot.lane.b32.xlu0 %v274_v50, %s6344_s14  ;;  %643 = vrot.lane.b32.xlu1 %v274_v50, %s6345_s15 }
 0x1b0   :  { %v215_v53 = vpop.f32.mrf.mxu0  ;;  %v276_v54 = vpop.f32.mrf.mxu1 }
 0x1b1   :  { %v6504_v59 = vadd.f32 %v276_v54, %v237_v47  ;;  %v6515_v63 = vadd.f32 %v215_v53, %v6470_v18 }
 0x1b2   :  { %v5715_v56 = vpop.f32.mrf.mxu0  ;;  %v5723_v57 = vpop.f32.mrf.mxu1 }
 0x1b3   :  { %649 = vrot.lane.b32.xlu1 %v274_v50, %s6346_s0  ;;  %349 = vrot.lane.b32.xlu0 %v213_v55, %s6346_s0 }
 0x1b4   :  { %v6502_v58 = vpop.f32.mrf.mxu0 }
 0x1b6   :  { %v5730_v60 = vpop.f32.mrf.mxu0 }
 0x1b7   :  { %645 = vrot.lane.b32.xlu0 %v6504_v59, %s6345_s15  ;;  %343 = vrot.lane.b32.xlu1 %v213_v55, %s6345_s15 }
 0x1b8   :  { %v6509_v61 = vpop.f32.mrf.mxu0 }
 0x1ba   :  { %v5731_v62 = vpop.f32.mrf.mxu0 }
 0x1bb   :  { %657 = vrot.lane.b32.xlu0 %v6504_v59, %s6344_s14  ;;  %355 = vrot.lane.b32.xlu1 %v213_v55, %s6344_s14 }
 0x1bf   :  { %651 = vrot.lane.b32.xlu1 %v6504_v59, %s6346_s0  ;;  %351 = vrot.lane.b32.xlu0 %v6515_v63, %s6346_s0 }
 0x1c3   :  { %297 = vrot.lane.b32.xlu0 %v6470_v18, %s6335_s21  ;;  %345 = vrot.lane.b32.xlu1 %v6515_v63, %s6345_s15 }
 0x1c7   :  { %357 = vrot.lane.b32.xlu1 %v6515_v63, %s6344_s14 }
 0x221   :  { %v656_v5 = vpop.permute.xlu0 %655  ;;  %v644_v6 = vpop.permute.xlu1 %643 }
 0x222   :  { %v677_v9 = vcombine.low %v644_v6, %v656_v5  ;;  %v678_v10 = vcombine.high %v644_v6, %v656_v5 }
 0x224   :  { %v685_v20 = vrot.slane %v677_v9, %v6528_v8  ;;  %v692_v21 = vrot.slane %v678_v10, %v6528_v8 }
 0x225   :  { %v650_v12 = vpop.permute.xlu1 %649  ;;  %v350_v13 = vpop.permute.xlu0 %349 }
 0x226   :  { %v661_v14 = vcombine.low %v274_v50, %v650_v12  ;;  %v662_v16 = vcombine.high %v274_v50, %v650_v12  ;;  %v361_v32 = vcombine.low %v213_v55, %v350_v13  ;;  %v362_v33 = vcombine.high %v213_v55, %v350_v13 }
 0x228   :  { %v669_v22 = vrot.slane %v661_v14, %v6528_v8  ;;  %v676_v23 = vrot.slane %v662_v16, %v6528_v8  ;;  %v369_v44 = vrot.slane %v361_v32, %v6528_v8  ;;  %v376_v45 = vrot.slane %v362_v33, %v6528_v8 }
 0x229   :  { %v646_v24 = vpop.permute.xlu0 %645  ;;  %v344_v25 = vpop.permute.xlu1 %343 }
 0x22a   :  { %v693_v26 = vcombine.low %v669_v22, %v685_v20  ;;  %v694_v27 = vcombine.high %v669_v22, %v685_v20  ;;  %v709_v28 = vcombine.low %v676_v23, %v692_v21  ;;  %v710_v29 = vcombine.high %v676_v23, %v692_v21 }
 0x22c   :  { %v701_v30 = vrot.slane %v693_v26, %v6531_v19  ;;  %v708_v31 = vrot.slane %v694_v27, %v6531_v19  ;;  %v717_v34 = vrot.slane %v709_v28, %v6531_v19  ;;  %v724_v35 = vrot.slane %v710_v29, %v6531_v19 }
 0x22d   :  { %v658_v36 = vpop.permute.xlu0 %657  ;;  %v356_v37 = vpop.permute.xlu1 %355 }
 0x22e   :  { %v797_v38 = vcombine.low %v701_v30, %v708_v31  ;;  %v5480_v39 = vcombine.high %v701_v30, %v708_v31  ;;  %v377_v40 = vcombine.low %v344_v25, %v356_v37  ;;  %v378_v41 = vcombine.high %v344_v25, %v356_v37 }
 0x22f   :  { %v745_v46 = vcombine.low %v646_v24, %v658_v36  ;;  %v746_v47 = vcombine.high %v646_v24, %v658_v36  ;;  %v813_v48 = vcombine.low %v717_v34, %v724_v35  ;;  %v5481_v49 = vcombine.high %v717_v34, %v724_v35 }
 0x230   :  { %v385_v50 = vrot.slane %v377_v40, %v6528_v8  ;;  %v392_v51 = vrot.slane %v378_v41, %v6528_v8  ;;  %v6548_v55 = vrot.slane %v797_v38, %v6528_v8  ;;  %v6551_v56 = vrot.slane %v5480_v39, %v6528_v8 }
 0x231   :  { %v652_v52 = vpop.permute.xlu1 %651  ;;  %v753_v1 = vrot.slane %v745_v46, %v6528_v8  ;;  %v760_v2 = vrot.slane %v746_v47, %v6528_v8  ;;  %v352_v5 = vpop.permute.xlu0 %351  ;;  %v828_v36 = vrot.slane %v5481_v49, %v6528_v8 }
 0x232   :  { %v729_v53 = vcombine.low %v6504_v59, %v652_v52  ;;  %v730_v54 = vcombine.high %v6504_v59, %v652_v52  ;;  %v393_v57 = vcombine.low %v369_v44, %v385_v50  ;;  %v394_v60 = vcombine.high %v369_v44, %v385_v50 }
 0x233   :  { %v409_v62 = vcombine.low %v376_v45, %v392_v51  ;;  %v410_v0 = vcombine.high %v376_v45, %v392_v51  ;;  %v429_v26 = vcombine.low %v6515_v63, %v352_v5  ;;  %v430_v27 = vcombine.high %v6515_v63, %v352_v5 }
 0x234   :  { %v737_v3 = vrot.slane %v729_v53, %v6528_v8  ;;  %v744_v4 = vrot.slane %v730_v54, %v6528_v8  ;;  %v401_v59 = vrot.slane %v393_v57, %v6531_v19  ;;  %v408_v6 = vrot.slane %v394_v60, %v6531_v19 }
 0x235   :  { %v417_v7 = vrot.slane %v409_v62, %v6531_v19  ;;  %v424_v9 = vrot.slane %v410_v0, %v6531_v19  ;;  %v346_v10 = vpop.permute.xlu1 %345  ;;  %v6579_v34 = vpop.permute.xlu0 %297  ;;  %v820_v63 = vrot.slane %v813_v48, %v6528_v8  ;;  %v437_v39 = vrot.slane %v429_v26, %v6528_v8 }
 0x236   :  { %v761_v12 = vcombine.low %v737_v3, %v753_v1  ;;  %v762_v13 = vcombine.high %v737_v3, %v753_v1  ;;  %v777_v14 = vcombine.low %v744_v4, %v760_v2  ;;  %v778_v16 = vcombine.high %v744_v4, %v760_v2 }
 0x237   :  { %v497_v20 = vcombine.low %v401_v59, %v408_v6  ;;  %v5476_v21 = vcombine.high %v401_v59, %v408_v6  ;;  %v513_v22 = vcombine.low %v417_v7, %v424_v9  ;;  %v5477_v23 = vcombine.high %v417_v7, %v424_v9 }
 0x238   :  { %v769_v24 = vrot.slane %v761_v12, %v6531_v19  ;;  %v776_v25 = vrot.slane %v762_v13, %v6531_v19  ;;  %v785_v32 = vrot.slane %v777_v14, %v6531_v19  ;;  %v792_v33 = vrot.slane %v778_v16, %v6531_v19 }
 0x239   :  { %v6566_v28 = vrot.slane %v497_v20, %v6528_v8  ;;  %v6569_v29 = vrot.slane %v5476_v21, %v6528_v8  ;;  %v6572_v30 = vrot.slane %v513_v22, %v6528_v8  ;;  %v6575_v31 = vrot.slane %v5477_v23, %v6528_v8  ;;  %v358_v35 = vpop.permute.xlu1 %357 }
 0x23a   :  { %v444_v40 = vrot.slane %v430_v27, %v6528_v8  ;;  %v865_v41 = vcombine.low %v769_v24, %v776_v25  ;;  %v6591_v44 = vadd.f32 %v6502_v58, %v6579_v34  ;;  %v445_v45 = vcombine.low %v346_v10, %v358_v35 }
 0x23b   :  { %v529_v37 = vcombine.low %v6566_v28, %v6569_v29  ;;  %v545_v38 = vcombine.low %v6572_v30, %v6575_v31  ;;  %v446_v46 = vcombine.high %v346_v10, %v358_v35  ;;  %v5482_v47 = vcombine.high %v769_v24, %v776_v25 }
 0x23c   :  { %v881_v48 = vcombine.low %v785_v32, %v792_v33  ;;  %v829_v49 = vcombine.low %v6548_v55, %v6551_v56  ;;  %v845_v50 = vcombine.low %v820_v63, %v828_v36  ;;  %943 = vrot.lane.b32.xlu1 %v6591_v44, %s6345_s15  ;;  %v453_v51 = vrot.slane %v445_v45, %v6528_v8 }
 0x23d   :  { %v460_v52 = vrot.slane %v446_v46, %v6528_v8  ;;  %v537_v53 = vrot.slane %v529_v37, %v6531_v19  ;;  %v553_v58 = vrot.slane %v545_v38, %v6531_v19  ;;  %v830_v60 = vcombine.high %v6548_v55, %v6551_v56 }
 0x23e   :  { %v837_v54 = vrot.slane %v829_v49, %v6531_v19  ;;  %v853_v57 = vrot.slane %v845_v50, %v6531_v19  ;;  %v846_v62 = vcombine.high %v820_v63, %v828_v36  ;;  %v461_v0 = vcombine.low %v437_v39, %v453_v51 }
 0x23f   :  { %v462_v1 = vcombine.high %v437_v39, %v453_v51  ;;  %v477_v2 = vcombine.low %v444_v40, %v460_v52  ;;  %v478_v3 = vcombine.high %v444_v40, %v460_v52  ;;  %v6606_v4 = vrot.slane %v865_v41, %v6528_v8 }
 0x240   :  { %v5483_v5 = vcombine.high %v785_v32, %v792_v33  ;;  %v861_v59 = vcombine.low %v837_v54, %v853_v57  ;;  %v862_v6 = vcombine.high %v837_v54, %v853_v57  ;;  %v469_v7 = vrot.slane %v461_v0, %v6531_v19 }
 0x241   :  { %v476_v9 = vrot.slane %v462_v1, %v6531_v19  ;;  %v485_v10 = vrot.slane %v477_v2, %v6531_v19  ;;  %v492_v12 = vrot.slane %v478_v3, %v6531_v19  ;;  %v844_v13 = vrot.slane %v830_v60, %v6531_v19 }
 0x242   :  { %v933_v55 = vpack.c.bf16 %v861_v59, %v861_v59  ;;  %v934_v56 = vpack.c.bf16 %v862_v6, %v862_v6  ;;  %v860_v14 = vrot.slane %v846_v62, %v6531_v19  ;;  %v880_v16 = vrot.slane %v5482_v47, %v6528_v8 }
 0x243   :  { %v888_v20 = vrot.slane %v881_v48, %v6528_v8  ;;  %v561_v21 = vcombine.low %v537_v53, %v553_v58  ;;  %v562_v22 = vcombine.high %v537_v53, %v553_v58  ;;  %v565_v23 = vcombine.low %v469_v7, %v476_v9 }
 0x244   :  { %v1258_v24 = vsel %vm1253_vm2, %v933_v55, 0  ;;  %v1304_v25 = vsel %vm1253_vm2, %v934_v56, 0  ;;  %v863_v26 = vcombine.low %v844_v13, %v860_v14  ;;  %v896_v27 = vrot.slane %v5483_v5, %v6528_v8 }
 0x245   :  { %v5478_v32 = vcombine.high %v469_v7, %v476_v9  ;;  %v581_v33 = vcombine.low %v485_v10, %v492_v12  ;;  %5733 = vmatpush3.bf16.xpose.msra.mxu1 %v1258_v24  ;;  %v864_v35 = vcombine.high %v844_v13, %v860_v14  ;;  %v530_v63 = vcombine.high %v6566_v28, %v6569_v29 }
 0x246   :  { %v546_v36 = vcombine.high %v6572_v30, %v6575_v31  ;;  %v5479_v37 = vcombine.high %v485_v10, %v492_v12  ;;  %5739 = vmatpush3.bf16.xpose.msra.mxu0 %v1304_v25  ;;  %5744 = vmatprep.subr.bf16.mxu1 %v6342_v11  ;;  %v633_v38 = vpack.c.bf16 %v561_v21, %v561_v21 }
 0x247   :  { %5750 = vmatprep.subr.bf16.mxu0 %v6342_v11  ;;  %v572_v39 = vrot.slane %v565_v23, %v6528_v8  ;;  %v634_v40 = vpack.c.bf16 %v562_v22, %v562_v22  ;;  %v935_v41 = vpack.c.bf16 %v863_v26, %v863_v26  ;;  %v897_v45 = vcombine.low %v6606_v4, %v880_v16 }
 0x248   :  { %v580_v46 = vrot.slane %v5478_v32, %v6528_v8  ;;  %v588_v28 = vrot.slane %v581_v33, %v6528_v8  ;;  %v936_v29 = vpack.c.bf16 %v864_v35, %v864_v35  ;;  %v913_v47 = vcombine.low %v888_v20, %v896_v27 }
 0x249   :  { %v596_v30 = vrot.slane %v5479_v37, %v6528_v8  ;;  %v544_v31 = vrot.slane %v530_v63, %v6531_v19  ;;  %v560_v48 = vrot.slane %v546_v36, %v6531_v19  ;;  %v905_v49 = vrot.slane %v897_v45, %v6531_v19  ;;  %v5488_v37 = vld [vmem:[#allocation5] ss:$0 sm:$0xff] }
 0x24a   :  { %v921_v50 = vrot.slane %v913_v47, %v6531_v19  ;;  %v1350_v51 = vsel %vm1253_vm2, %v935_v41, 0  ;;  %v898_v52 = vcombine.high %v6606_v4, %v880_v16  ;;  %v914_v53 = vcombine.high %v888_v20, %v896_v27 }
 0x24b   :  { %v1396_v58 = vsel %vm1253_vm2, %v936_v29, 0  ;;  %v597_v60 = vcombine.low %v572_v39, %v580_v46  ;;  %v613_v62 = vcombine.low %v588_v28, %v596_v30  ;;  %v563_v0 = vcombine.low %v544_v31, %v560_v48 }
 0x24c   :  { %5735 = vmatmul.mubr.msk.bf16.vlgmr.msra.gmra.mxu1 %vm1253_vm2, %v633_v38  ;;  %v929_v54 = vcombine.low %v905_v49, %v921_v50  ;;  %v930_v57 = vcombine.high %v905_v49, %v921_v50  ;;  %v564_v1 = vcombine.high %v544_v31, %v560_v48  ;;  %v912_v3 = vrot.slane %v898_v52, %v6531_v19 }
 0x24d   :  { %5741 = vmatmul.mubr.msk.bf16.vlgmr.msra.gmra.mxu0 %vm1253_vm2, %v634_v40  ;;  %5745 = vmatpush3.bf16.xpose.msra.mxu1 %v1350_v51  ;;  %v928_v4 = vrot.slane %v914_v53, %v6531_v19  ;;  %v635_v59 = vpack.c.bf16 %v563_v0, %v563_v0  ;;  %v605_v6 = vrot.slane %v597_v60, %v6531_v19  ;;  %v5489_v0 = vld [vmem:[#allocation5 + $0x1] ss:$0 sm:$0xff] }
 0x24e   :  { %5751 = vmatpush3.bf16.xpose.msra.mxu0 %v1396_v58  ;;  %5746 = vmatprep.mubr.msk.bf16.mxu1 %vm6343_vm1, %v6342_v11  ;;  %v937_v2 = vpack.c.bf16 %v929_v54, %v929_v54  ;;  %v938_v5 = vpack.c.bf16 %v930_v57, %v930_v57  ;;  %v621_v7 = vrot.slane %v613_v62, %v6531_v19 }
 0x24f   :  { %5752 = vmatprep.mubr.msk.bf16.mxu0 %vm6343_vm1, %v6342_v11  ;;  %5756 = vmatprep.subr.bf16.mxu1 %v6342_v11  ;;  %v636_v9 = vpack.c.bf16 %v564_v1, %v564_v1  ;;  %v931_v12 = vcombine.low %v912_v3, %v928_v4  ;;  %v932_v56 = vcombine.high %v912_v3, %v928_v4 }
 0x250   :  { %5762 = vmatprep.subr.bf16.mxu0 %v6342_v11  ;;  %v1442_v10 = vsel %vm1253_vm2, %v937_v2, 0  ;;  %v1488_v55 = vsel %vm1253_vm2, %v938_v5, 0  ;;  %v598_v13 = vcombine.high %v572_v39, %v580_v46  ;;  %v614_v14 = vcombine.high %v588_v28, %v596_v30 }
 0x251   :  { %v629_v16 = vcombine.low %v605_v6, %v621_v7  ;;  %v630_v20 = vcombine.high %v605_v6, %v621_v7  ;;  %v939_v21 = vpack.c.bf16 %v931_v12, %v931_v12  ;;  %v940_v22 = vpack.c.bf16 %v932_v56, %v932_v56 }
 0x252   :  { %v612_v24 = vrot.slane %v598_v13, %v6531_v19  ;;  %v628_v25 = vrot.slane %v614_v14, %v6531_v19 }
 0x253   :  { %v637_v23 = vpack.c.bf16 %v629_v16, %v629_v16  ;;  %v638_v26 = vpack.c.bf16 %v630_v20, %v630_v20  ;;  %v1534_v27 = vsel %vm1253_vm2, %v939_v21, 0  ;;  %v1580_v32 = vsel %vm1253_vm2, %v940_v22, 0 }
 0x254   :  { %5747 = vmatmul.mubr.msk.bf16.vlgmr.msra.gmra.mxu1 %vm1253_vm2, %v635_v59  ;;  %v631_v33 = vcombine.low %v612_v24, %v628_v25  ;;  %v632_v35 = vcombine.high %v612_v24, %v628_v25 }
 0x255   :  { %5753 = vmatmul.mubr.msk.bf16.vlgmr.msra.gmra.mxu0 %vm1253_vm2, %v636_v9  ;;  %5757 = vmatpush3.bf16.xpose.msra.mxu1 %v1442_v10 }
 0x256   :  { %5763 = vmatpush3.bf16.xpose.msra.mxu0 %v1488_v55  ;;  %5758 = vmatprep.mubr.msk.bf16.mxu1 %vm6343_vm1, %v6342_v11  ;;  %v639_v63 = vpack.c.bf16 %v631_v33, %v631_v33  ;;  %v640_v36 = vpack.c.bf16 %v632_v35, %v632_v35 }
 0x257   :  { %5764 = vmatprep.mubr.msk.bf16.mxu0 %vm6343_vm1, %v6342_v11  ;;  %5768 = vmatprep.subr.bf16.mxu1 %v6342_v11 }
 0x258   :  { %5774 = vmatprep.subr.bf16.mxu0 %v6342_v11 }
 0x25c   :  { %5759 = vmatmul.mubr.msk.bf16.vlgmr.msra.gmra.mxu1 %vm1253_vm2, %v637_v23 }
 0x25d   :  { %5765 = vmatmul.mubr.msk.bf16.vlgmr.msra.gmra.mxu0 %vm1253_vm2, %v638_v26  ;;  %5769 = vmatpush3.bf16.xpose.msra.mxu1 %v1534_v27 }
 0x25e   :  { %5775 = vmatpush3.bf16.xpose.msra.mxu0 %v1580_v32  ;;  %5770 = vmatprep.mubr.msk.bf16.mxu1 %vm6343_vm1, %v6342_v11 }
 0x25f   :  { %5776 = vmatprep.mubr.msk.bf16.mxu0 %vm6343_vm1, %v6342_v11  ;;  %5780 = vmatprep.subr.bf16.mxu1 %v6342_v11 }
 0x260   :  { %5786 = vmatprep.subr.bf16.mxu0 %v6342_v11 }
 0x264   :  { %5771 = vmatmul.mubr.msk.bf16.vlgmr.msra.gmra.mxu1 %vm1253_vm2, %v639_v63 }
 0x265   :  { %5777 = vmatmul.mubr.msk.bf16.vlgmr.msra.gmra.mxu0 %vm1253_vm2, %v640_v36  ;;  %5782 = vmatprep.mubr.msk.bf16.mxu1 %vm6343_vm1, %v6342_v11 }
 0x266   :  { %5788 = vmatprep.mubr.msk.bf16.mxu0 %vm6343_vm1, %v6342_v11 }
 0x2ae   :  { %v944_v35 = vpop.permute.xlu1 %943 }
 0x30c   :  { %v1294_v38 = vpop.f32.mrf.mxu1 }
 0x30d   :  { %v6677_v39 = vadd.f32 %v5488_v37, %v1294_v38  ;;  %v1340_v40 = vpop.f32.mrf.mxu0 }
 0x30e   :  { %v1341_v41 = vadd.f32 %v5488_v37, %v1340_v40  ;;  %v5736_v45 = vpop.f32.mrf.mxu1 }
 0x30f   :  { %v5742_v46 = vpop.f32.mrf.mxu0  ;;  %v1622_v28 = vsel %vm1253_vm2, %v6677_v39, -inf }
 0x310   :  { %v1297_v29 = vpop.f32.mrf.mxu1  ;;  %1623 = vmax.xlane.f32.xlu0 %v1622_v28  ;;  %v1625_v47 = vsel %vm1253_vm2, %v1341_v41, -inf }
 0x311   :  { %1626 = vmax.xlane.f32.xlu1 %v1625_v47  ;;  %v1343_v30 = vpop.f32.mrf.mxu0 }
 0x312   :  { %v5737_v31 = vpop.f32.mrf.mxu1 }
 0x313   :  { %v5743_v48 = vpop.f32.mrf.mxu0 }
 0x314   :  { %v1386_v49 = vpop.f32.mrf.mxu1 }
 0x315   :  { %v1387_v50 = vadd.f32 %v5488_v37, %v1386_v49  ;;  %v1432_v51 = vpop.f32.mrf.mxu0 }
 0x316   :  { %v5748_v52 = vpop.f32.mrf.mxu1  ;;  %v1433_v53 = vadd.f32 %v5488_v37, %v1432_v51 }
 0x317   :  { %v5754_v58 = vpop.f32.mrf.mxu0  ;;  %v1628_v54 = vsel %vm1253_vm2, %v1387_v50, -inf }
 0x318   :  { %v1389_v57 = vpop.f32.mrf.mxu1  ;;  %1629 = vmax.xlane.f32.xlu0 %v1628_v54  ;;  %v1631_v2 = vsel %vm1253_vm2, %v1433_v53, -inf }
 0x319   :  { %v1435_v60 = vpop.f32.mrf.mxu0 }
 0x31a   :  { %v5749_v62 = vpop.f32.mrf.mxu1 }
 0x31b   :  { %v5755_v1 = vpop.f32.mrf.mxu0 }
 0x31c   :  { %v1478_v3 = vpop.f32.mrf.mxu1  ;;  %1632 = vmax.xlane.f32.xlu0 %v1631_v2 }
 0x31d   :  { %v1479_v4 = vadd.f32 %v5489_v0, %v1478_v3  ;;  %v1524_v5 = vpop.f32.mrf.mxu0 }
 0x31e   :  { %v1525_v59 = vadd.f32 %v5489_v0, %v1524_v5  ;;  %v5760_v6 = vpop.f32.mrf.mxu1 }
 0x31f   :  { %v5766_v7 = vpop.f32.mrf.mxu0  ;;  %v1634_v9 = vsel %vm1253_vm2, %v1479_v4, -inf }
 0x320   :  { %v1481_v10 = vpop.f32.mrf.mxu1  ;;  %1635 = vmax.xlane.f32.xlu0 %v1634_v9  ;;  %v1637_v12 = vsel %vm1253_vm2, %v1525_v59, -inf }
 0x321   :  { %1638 = vmax.xlane.f32.xlu1 %v1637_v12  ;;  %v1527_v55 = vpop.f32.mrf.mxu0 }
 0x322   :  { %v5761_v56 = vpop.f32.mrf.mxu1 }
 0x323   :  { %v5767_v13 = vpop.f32.mrf.mxu0 }
 0x324   :  { %v1570_v14 = vpop.f32.mrf.mxu1 }
 0x325   :  { %v6686_v16 = vadd.f32 %v5489_v0, %v1570_v14  ;;  %v1616_v20 = vpop.f32.mrf.mxu0 }
 0x326   :  { %v6688_v21 = vadd.f32 %v5489_v0, %v1616_v20  ;;  %v5772_v22 = vpop.f32.mrf.mxu1 }
 0x327   :  { %v5778_v23 = vpop.f32.mrf.mxu0  ;;  %v1640_v24 = vsel %vm1253_vm2, %v6686_v16, -inf }
 0x328   :  { %v1573_v25 = vpop.f32.mrf.mxu1  ;;  %1641 = vmax.xlane.f32.xlu0 %v1640_v24  ;;  %v1643_v26 = vsel %vm1253_vm2, %v6688_v21, -inf }
 0x329   :  { %1644 = vmax.xlane.f32.xlu1 %v1643_v26  ;;  %v1619_v27 = vpop.f32.mrf.mxu0 }
 0x32a   :  { %v5773_v32 = vpop.f32.mrf.mxu1 }
 0x32b   :  { %v5779_v33 = vpop.f32.mrf.mxu0 }
 0x33a   :  { %955 = vrot.lane.b32.xlu1 %v6591_v44, %s6344_s14 }
 0x33e   :  { %949 = vrot.lane.b32.xlu0 %v6591_v44, %s6346_s0 }
 0x399   :  { %v1624_v63 = vpop.xlane.xlu0 %1623 }
 0x39a   :  { %v1646_v36 = vsub.f32 %v6677_v39, %v1624_v63  ;;  %v1627_v37 = vpop.xlane.xlu1 %1626 }
 0x39b   :  { %v1647_v38 = vsub.f32 %v1341_v41, %v1627_v37 }
 0x39c   :  { %v1654_v40 = vmul.f32 1.442695, %v1646_v36 }
 0x39d   :  { %v1656_v45 = vmul.f32 1.442695, %v1647_v38 }
 0x39e   :  { %6107 = vpow2.f32 %v1654_v40 }
 0x39f   :  { %6109 = vpow2.f32 %v1656_v45 }
 0x3a1   :  { %v1630_v46 = vpop.xlane.xlu0 %1629 }
 0x3a2   :  { %v1648_v28 = vsub.f32 %v1387_v50, %v1630_v46 }
 0x3a4   :  { %v1658_v29 = vmul.f32 1.442695, %v1648_v28 }
 0x3a5   :  { %v1633_v47 = vpop.xlane.xlu0 %1632 }
 0x3a6   :  { %6111 = vpow2.f32 %v1658_v29  ;;  %v1649_v30 = vsub.f32 %v1433_v53, %v1633_v47 }
 0x3a8   :  { %v1660_v31 = vmul.f32 1.442695, %v1649_v30 }
 0x3a9   :  { %v1636_v48 = vpop.xlane.xlu0 %1635 }
 0x3aa   :  { %6113 = vpow2.f32 %v1660_v31  ;;  %v1650_v49 = vsub.f32 %v1479_v4, %v1636_v48  ;;  %v1639_v51 = vpop.xlane.xlu1 %1638 }
 0x3ab   :  { %v6699_v52 = vpop.eup %6107  ;;  %v1651_v39 = vsub.f32 %v1525_v59, %v1639_v51 }
 0x3ac   :  { %v1662_v58 = vmul.f32 1.442695, %v1650_v49  ;;  %v1670_v41 = vsel %vm1253_vm2, %v6699_v52, 0.0  ;;  %v6703_v54 = vpop.eup %6109 }
 0x3ad   :  { %v1664_v57 = vmul.f32 1.442695, %v1651_v39  ;;  %1671 = vadd.xlane.f32.xlu1 %v1670_v41  ;;  %v1673_v50 = vsel %vm1253_vm2, %v6703_v54, 0.0 }
 0x3ae   :  { %6115 = vpow2.f32 %v1662_v58  ;;  %v6747_v58 = vadd.f32 %v6509_v61, %v6579_v34 }
 0x3af   :  { %6117 = vpow2.f32 %v1664_v57 }
 0x3b1   :  { %v6707_v53 = vpop.xlane.xlu0 %1641  ;;  %1674 = vadd.xlane.f32.xlu1 %v1673_v50 }
 0x3b2   :  { %v6709_v60 = vpop.xlane.xlu1 %1644  ;;  %v1652_v61 = vsub.f32 %v6686_v16, %v6707_v53 }
 0x3b3   :  { %v6711_v62 = vpop.eup %6111 }
 0x3b4   :  { %v1676_v0 = vsel %vm1253_vm2, %v6711_v62, 0.0  ;;  %v1666_v34 = vmul.f32 1.442695, %v1652_v61 }
 0x3b5   :  { %1677 = vadd.xlane.f32.xlu0 %v1676_v0  ;;  %v950_v1 = vpop.permute.xlu0 %949 }
 0x3b6   :  { %v961_v2 = vcombine.low %v6591_v44, %v950_v1  ;;  %v962_v3 = vcombine.high %v6591_v44, %v950_v1  ;;  %v956_v4 = vpop.permute.xlu1 %955  ;;  %6119 = vpow2.f32 %v1666_v34 }
 0x3b7   :  { %v6717_v5 = vpop.eup %6113  ;;  %v977_v59 = vcombine.low %v944_v35, %v956_v4  ;;  %v978_v6 = vcombine.high %v944_v35, %v956_v4 }
 0x3b8   :  { %v969_v7 = vrot.slane %v961_v2, %v6528_v8  ;;  %v976_v9 = vrot.slane %v962_v3, %v6528_v8  ;;  %v1679_v10 = vsel %vm1253_vm2, %v6717_v5, 0.0  ;;  %v1653_v3 = vsub.f32 %v6688_v21, %v6709_v60 }
 0x3b9   :  { %v985_v12 = vrot.slane %v977_v59, %v6528_v8  ;;  %v992_v55 = vrot.slane %v978_v6, %v6528_v8  ;;  %1680 = vadd.xlane.f32.xlu1 %v1679_v10 }
 0x3ba   :  { %v1668_v4 = vmul.f32 1.442695, %v1653_v3 }
 0x3bb   :  { %v6725_v56 = vpop.eup %6115  ;;  %v993_v44 = vcombine.low %v969_v7, %v985_v12  ;;  %v994_v13 = vcombine.high %v969_v7, %v985_v12  ;;  %v1009_v14 = vcombine.low %v976_v9, %v992_v55  ;;  %v1010_v20 = vcombine.high %v976_v9, %v992_v55 }
 0x3bc   :  { %v1682_v22 = vsel %vm1253_vm2, %v6725_v56, 0.0  ;;  %v6729_v23 = vpop.eup %6117  ;;  %6121 = vpow2.f32 %v1668_v4 }
 0x3bd   :  { %v1001_v24 = vrot.slane %v993_v44, %v6531_v19  ;;  %v1008_v25 = vrot.slane %v994_v13, %v6531_v19  ;;  %v1017_v26 = vrot.slane %v1009_v14, %v6531_v19  ;;  %v1024_v27 = vrot.slane %v1010_v20, %v6531_v19  ;;  %1683 = vadd.xlane.f32.xlu0 %v1682_v22 }
 0x3be   :  { %v1685_v36 = vsel %vm1253_vm2, %v6729_v23, 0.0 }
 0x3bf   :  { %v1097_v32 = vcombine.low %v1001_v24, %v1008_v25  ;;  %v5484_v33 = vcombine.high %v1001_v24, %v1008_v25  ;;  %v1113_v35 = vcombine.low %v1017_v26, %v1024_v27  ;;  %v5485_v63 = vcombine.high %v1017_v26, %v1024_v27 }
 0x3c1   :  { %v1104_v37 = vrot.slane %v1097_v32, %v6528_v8  ;;  %v1112_v38 = vrot.slane %v5484_v33, %v6528_v8  ;;  %v1120_v40 = vrot.slane %v1113_v35, %v6528_v8  ;;  %v1128_v45 = vrot.slane %v5485_v63, %v6528_v8  ;;  %1686 = vadd.xlane.f32.xlu0 %v1685_v36 }
 0x3c3   :  { %v1129_v46 = vcombine.low %v1104_v37, %v1112_v38  ;;  %v1145_v28 = vcombine.low %v1120_v40, %v1128_v45  ;;  %v1130_v29 = vcombine.high %v1104_v37, %v1112_v38  ;;  %v1146_v47 = vcombine.high %v1120_v40, %v1128_v45  ;;  %v6763_v59 = vpop.eup %6119 }
 0x3c4   :  { %v1688_v6 = vsel %vm1253_vm2, %v6763_v59, 0.0 }
 0x3c5   :  { %v1137_v30 = vrot.slane %v1129_v46, %v6531_v19  ;;  %v1153_v31 = vrot.slane %v1145_v28, %v6531_v19  ;;  %v1144_v48 = vrot.slane %v1130_v29, %v6531_v19  ;;  %v1160_v49 = vrot.slane %v1146_v47, %v6531_v19 }
 0x3c7   :  { %v1161_v51 = vcombine.low %v1137_v30, %v1153_v31  ;;  %v1162_v39 = vcombine.high %v1137_v30, %v1153_v31  ;;  %v1163_v41 = vcombine.low %v1144_v48, %v1160_v49  ;;  %v1164_v57 = vcombine.high %v1144_v48, %v1160_v49 }
 0x3c9   :  { %v1233_v50 = vpack.c.bf16 %v1161_v51, %v1161_v51  ;;  %v1234_v0 = vpack.c.bf16 %v1162_v39, %v1162_v39  ;;  %v6767_v7 = vpop.eup %6121  ;;  %v1235_v55 = vpack.c.bf16 %v1163_v41, %v1163_v41  ;;  %v1236_v25 = vpack.c.bf16 %v1164_v57, %v1164_v57 }
 0x3ca   :  { %951 = vrot.lane.b32.xlu1 %v6747_v58, %s6346_s0  ;;  %v1691_v9 = vsel %vm1253_vm2, %v6767_v7, 0.0 }
 0x3cb   :  { %v1723_v1 = vsel %vm1721_vm3, %v1233_v50, 0  ;;  %v1769_v2 = vsel %vm1721_vm3, %v1234_v0, 0  ;;  %v1815_v22 = vsel %vm1721_vm3, %v1235_v55, 0  ;;  %v1861_v35 = vsel %vm1721_vm3, %v1236_v25, 0 }
 0x3cc   :  { %5781 = vmatpush3.bf16.msra.mxu1 %v1723_v1  ;;  %5787 = vmatpush3.bf16.msra.mxu0 %v1769_v2 }
 0x3cd   :  { %5792 = vmatprep.subr.bf16.mxu1 %v6342_v11  ;;  %5798 = vmatprep.subr.bf16.mxu0 %v6342_v11 }
 0x3ce   :  { %957 = vrot.lane.b32.xlu1 %v6747_v58, %s6344_s14 }
 0x3d7   :  { %945 = vrot.lane.b32.xlu0 %v6747_v58, %s6345_s15 }
 0x3f2   :  { %1689 = vadd.xlane.f32.xlu1 %v1688_v6 }
 0x3f6   :  { %1692 = vadd.xlane.f32.xlu0 %v1691_v9 }
 0x436   :  { %v1672_v16 = vpop.xlane.xlu1 %1671 }
 0x437   :  { %6123 = vrcp.f32 %v1672_v16 }
 0x43a   :  { %v1675_v53 = vpop.xlane.xlu1 %1674 }
 0x43b   :  { %6125 = vrcp.f32 %v1675_v53 }
 0x43e   :  { %v1678_v21 = vpop.xlane.xlu0 %1677 }
 0x43f   :  { %6127 = vrcp.f32 %v1678_v21 }
 0x442   :  { %v1681_v60 = vpop.xlane.xlu1 %1680 }
 0x443   :  { %6129 = vrcp.f32 %v1681_v60 }
 0x444   :  { %v6124_v10 = vpop.eup %6123 }
 0x445   :  { %v1702_v12 = vmul.f32 %v6124_v10, %v6699_v52 }
 0x446   :  { %v1684_v44 = vpop.xlane.xlu0 %1683  ;;  %v952_v20 = vpop.permute.xlu1 %951 }
 0x447   :  { %v1710_v13 = vpack.c.bf16 %v1702_v12, %v1702_v12  ;;  %v1029_v32 = vcombine.low %v6747_v58, %v952_v20  ;;  %v1030_v33 = vcombine.high %v6747_v58, %v952_v20  ;;  %6131 = vrcp.f32 %v1684_v44 }
 0x448   :  { %v6126_v14 = vpop.eup %6125 }
 0x449   :  { %5783 = vmatmul.mubr.msk.bf16.vlgmr.msra.gmra.mxu1 %vm1253_vm2, %v1710_v13  ;;  %v1703_v24 = vmul.f32 %v6126_v14, %v6703_v54  ;;  %v1037_v46 = vrot.slane %v1029_v32, %v6528_v8  ;;  %v1044_v28 = vrot.slane %v1030_v33, %v6528_v8 }
 0x44a   :  { %5793 = vmatpush3.bf16.msra.mxu1 %v1815_v22  ;;  %v1687_v26 = vpop.xlane.xlu0 %1686  ;;  %5794 = vmatprep.mubr.msk.bf16.mxu1 %vm6343_vm1, %v6342_v11  ;;  %v958_v63 = vpop.permute.xlu1 %957 }
 0x44b   :  { %v1711_v27 = vpack.c.bf16 %v1703_v24, %v1703_v24  ;;  %5804 = vmatprep.subr.bf16.mxu1 %v6342_v11  ;;  %6133 = vrcp.f32 %v1687_v26 }
 0x44c   :  { %v6128_v52 = vpop.eup %6127 }
 0x44d   :  { %5789 = vmatmul.mubr.msk.bf16.vlgmr.msra.gmra.mxu0 %vm1253_vm2, %v1711_v27  ;;  %v1704_v54 = vmul.f32 %v6128_v52, %v6711_v62 }
 0x44e   :  { %5799 = vmatpush3.bf16.msra.mxu0 %v1861_v35  ;;  %v946_v36 = vpop.permute.xlu0 %945  ;;  %5800 = vmatprep.mubr.msk.bf16.mxu0 %vm6343_vm1, %v6342_v11 }
 0x44f   :  { %v1045_v37 = vcombine.low %v946_v36, %v958_v63  ;;  %v1046_v38 = vcombine.high %v946_v36, %v958_v63  ;;  %v1712_v40 = vpack.c.bf16 %v1704_v54, %v1704_v54  ;;  %5810 = vmatprep.subr.bf16.mxu0 %v6342_v11 }
 0x450   :  { %v6130_v45 = vpop.eup %6129 }
 0x451   :  { %v1053_v62 = vrot.slane %v1045_v37, %v6528_v8  ;;  %v1060_v29 = vrot.slane %v1046_v38, %v6528_v8  ;;  %5795 = vmatmul.mubr.msk.bf16.vlgmr.msra.gmra.mxu1 %vm1253_vm2, %v1712_v40  ;;  %v1705_v47 = vmul.f32 %v6130_v45, %v6717_v5 }
 0x452   :  { %5806 = vmatprep.mubr.msk.bf16.mxu1 %vm6343_vm1, %v6342_v11 }
 0x453   :  { %v1061_v30 = vcombine.low %v1037_v46, %v1053_v62  ;;  %v1062_v31 = vcombine.high %v1037_v46, %v1053_v62  ;;  %v1077_v48 = vcombine.low %v1044_v28, %v1060_v29  ;;  %v1078_v49 = vcombine.high %v1044_v28, %v1060_v29 }
 0x454   :  { %v1713_v51 = vpack.c.bf16 %v1705_v47, %v1705_v47  ;;  %v6132_v53 = vpop.eup %6131 }
 0x455   :  { %v1069_v39 = vrot.slane %v1061_v30, %v6531_v19  ;;  %v1076_v58 = vrot.slane %v1062_v31, %v6531_v19  ;;  %v1085_v41 = vrot.slane %v1077_v48, %v6531_v19  ;;  %v1092_v57 = vrot.slane %v1078_v49, %v6531_v19 }
 0x456   :  { %5801 = vmatmul.mubr.msk.bf16.vlgmr.msra.gmra.mxu0 %vm1253_vm2, %v1713_v51  ;;  %v1706_v25 = vmul.f32 %v6132_v53, %v6725_v56 }
 0x457   :  { %v1165_v50 = vcombine.low %v1069_v39, %v1076_v58  ;;  %v5486_v5 = vcombine.high %v1069_v39, %v1076_v58  ;;  %v1181_v0 = vcombine.low %v1085_v41, %v1092_v57  ;;  %v5487_v1 = vcombine.high %v1085_v41, %v1092_v57  ;;  %5812 = vmatprep.mubr.msk.bf16.mxu0 %vm6343_vm1, %v6342_v11 }
 0x458   :  { %v6134_v55 = vpop.eup %6133  ;;  %v1714_v35 = vpack.c.bf16 %v1706_v25, %v1706_v25 }
 0x459   :  { %v1172_v2 = vrot.slane %v1165_v50, %v6528_v8  ;;  %v1180_v61 = vrot.slane %v5486_v5, %v6528_v8  ;;  %v1188_v34 = vrot.slane %v1181_v0, %v6528_v8  ;;  %v1196_v3 = vrot.slane %v5487_v1, %v6528_v8 }
 0x45a   :  { %v1707_v26 = vmul.f32 %v6134_v55, %v6729_v23 }
 0x45b   :  { %v1197_v4 = vcombine.low %v1172_v2, %v1180_v61  ;;  %v1213_v6 = vcombine.low %v1188_v34, %v1196_v3  ;;  %v1198_v9 = vcombine.high %v1172_v2, %v1180_v61  ;;  %v1214_v16 = vcombine.high %v1188_v34, %v1196_v3 }
 0x45c   :  { %v1715_v54 = vpack.c.bf16 %v1707_v26, %v1707_v26 }
 0x45d   :  { %v1205_v21 = vrot.slane %v1197_v4, %v6531_v19  ;;  %v1221_v60 = vrot.slane %v1213_v6, %v6531_v19  ;;  %v1212_v10 = vrot.slane %v1198_v9, %v6531_v19  ;;  %v1228_v12 = vrot.slane %v1214_v16, %v6531_v19 }
 0x45f   :  { %v1229_v44 = vcombine.low %v1205_v21, %v1221_v60  ;;  %v1230_v13 = vcombine.high %v1205_v21, %v1221_v60  ;;  %v1231_v14 = vcombine.low %v1212_v10, %v1228_v12  ;;  %v1232_v20 = vcombine.high %v1212_v10, %v1228_v12 }
 0x461   :  { %v1237_v22 = vpack.c.bf16 %v1229_v44, %v1229_v44  ;;  %v1238_v24 = vpack.c.bf16 %v1230_v13, %v1230_v13  ;;  %v1239_v32 = vpack.c.bf16 %v1231_v14, %v1231_v14  ;;  %v1240_v33 = vpack.c.bf16 %v1232_v20, %v1232_v20 }
 0x463   :  { %v1907_v27 = vsel %vm1721_vm3, %v1237_v22, 0  ;;  %v1953_v52 = vsel %vm1721_vm3, %v1238_v24, 0  ;;  %v1999_v56 = vsel %vm1721_vm3, %v1239_v32, 0  ;;  %v2045_v23 = vsel %vm1721_vm3, %v1240_v33, 0 }
 0x464   :  { %5805 = vmatpush3.bf16.msra.mxu1 %v1907_v27  ;;  %5811 = vmatpush3.bf16.msra.mxu0 %v1953_v52 }
 0x465   :  { %5816 = vmatprep.subr.bf16.mxu1 %v6342_v11  ;;  %5822 = vmatprep.subr.bf16.mxu0 %v6342_v11 }
 0x467   :  { %5807 = vmatmul.mubr.msk.bf16.vlgmr.msra.gmra.mxu1 %vm1253_vm2, %v1714_v35  ;;  %5813 = vmatmul.mubr.msk.bf16.vlgmr.msra.gmra.mxu0 %vm1253_vm2, %v1715_v54 }
 0x468   :  { %5817 = vmatpush3.bf16.msra.mxu1 %v1999_v56  ;;  %5823 = vmatpush3.bf16.msra.mxu0 %v2045_v23 }
 0x469   :  { %5818 = vmatprep.mubr.msk.bf16.mxu1 %vm6343_vm1, %v6342_v11  ;;  %5824 = vmatprep.mubr.msk.bf16.mxu0 %vm6343_vm1, %v6342_v11 }
 0x46a   :  { %5828 = vmatprep.subr.bf16.mxu1 %v6342_v11  ;;  %5836 = vmatprep.subr.bf16.mxu0 %v6342_v11 }
 0x47b   :  { %v1690_v63 = vpop.xlane.xlu1 %1689 }
 0x47c   :  { %6135 = vrcp.f32 %v1690_v63 }
 0x47f   :  { %v1693_v36 = vpop.xlane.xlu0 %1692 }
 0x480   :  { %6137 = vrcp.f32 %v1693_v36 }
 0x489   :  { %v6136_v37 = vpop.eup %6135 }
 0x48a   :  { %v1708_v38 = vmul.f32 %v6136_v37, %v6763_v59 }
 0x48c   :  { %v1716_v40 = vpack.c.bf16 %v1708_v38, %v1708_v38 }
 0x48d   :  { %v6138_v45 = vpop.eup %6137 }
 0x48e   :  { %5819 = vmatmul.mubr.msk.bf16.vlgmr.msra.gmra.mxu1 %vm1253_vm2, %v1716_v40  ;;  %v1709_v46 = vmul.f32 %v6138_v45, %v6767_v7 }
 0x48f   :  { %5832 = vmatprep.mubr.msk.bf16.mxu1 %vm6343_vm1, %v6342_v11 }
 0x490   :  { %v1717_v28 = vpack.c.bf16 %v1709_v46, %v1709_v46 }
 0x492   :  { %5825 = vmatmul.mubr.msk.bf16.vlgmr.msra.gmra.mxu0 %vm1253_vm2, %v1717_v28 }
 0x493   :  { %5840 = vmatprep.mubr.msk.bf16.mxu0 %vm6343_vm1, %v6342_v11 }
 0x509   :  { %v1759_v62 = vpop.f32.mrf.mxu1 }
 0x50b   :  { %v5784_v29 = vpop.f32.mrf.mxu1 }
 0x50d   :  { %v1762_v47 = vpop.f32.mrf.mxu1  ;;  %v1805_v30 = vpop.f32.mrf.mxu0 }
 0x50f   :  { %v5785_v59 = vpop.f32.mrf.mxu1  ;;  %v5790_v31 = vpop.f32.mrf.mxu0 }
 0x511   :  { %v1808_v48 = vpop.f32.mrf.mxu0  ;;  %v1851_v49 = vpop.f32.mrf.mxu1 }
 0x512   :  { %v2087_v51 = vcombine.low %v1759_v62, %v1851_v49  ;;  %v2088_v39 = vcombine.high %v1759_v62, %v1851_v49 }
 0x513   :  { %v5791_v7 = vpop.f32.mrf.mxu0  ;;  %v5796_v58 = vpop.f32.mrf.mxu1 }
 0x514   :  { %v2095_v2 = vrot.slane %v2087_v51, %v6528_v8  ;;  %v2102_v61 = vrot.slane %v2088_v39, %v6528_v8 }
 0x515   :  { %v1854_v41 = vpop.f32.mrf.mxu1 }
 0x516   :  { %v1897_v57 = vpop.f32.mrf.mxu0 }
 0x517   :  { %v2103_v50 = vcombine.low %v1805_v30, %v1897_v57  ;;  %v2104_v5 = vcombine.high %v1805_v30, %v1897_v57  ;;  %v5797_v0 = vpop.f32.mrf.mxu1 }
 0x518   :  { %v5802_v1 = vpop.f32.mrf.mxu0 }
 0x519   :  { %v2111_v34 = vrot.slane %v2103_v50, %v6528_v8  ;;  %v2118_v3 = vrot.slane %v2104_v5, %v6528_v8 }
 0x51a   :  { %v1900_v4 = vpop.f32.mrf.mxu0 }
 0x51b   :  { %v2119_v6 = vcombine.low %v2095_v2, %v2111_v34  ;;  %v2120_v9 = vcombine.high %v2095_v2, %v2111_v34  ;;  %v2135_v16 = vcombine.low %v2102_v61, %v2118_v3  ;;  %v2136_v53 = vcombine.high %v2102_v61, %v2118_v3 }
 0x51c   :  { %v5803_v21 = vpop.f32.mrf.mxu0 }
 0x51d   :  { %v2127_v60 = vrot.slane %v2119_v6, %v6531_v19  ;;  %v2134_v10 = vrot.slane %v2120_v9, %v6531_v19  ;;  %v2143_v12 = vrot.slane %v2135_v16, %v6531_v19  ;;  %v2150_v55 = vrot.slane %v2136_v53, %v6531_v19 }
 0x51f   :  { %v2223_v44 = vcombine.low %v2127_v60, %v2134_v10  ;;  %v5506_v13 = vcombine.high %v2127_v60, %v2134_v10  ;;  %v2239_v14 = vcombine.low %v2143_v12, %v2150_v55  ;;  %v5507_v20 = vcombine.high %v2143_v12, %v2150_v55 }
 0x521   :  { %v2230_v22 = vrot.slane %v2223_v44, %v6528_v8  ;;  %v2238_v24 = vrot.slane %v5506_v13, %v6528_v8  ;;  %v2246_v25 = vrot.slane %v2239_v14, %v6528_v8  ;;  %v2254_v26 = vrot.slane %v5507_v20, %v6528_v8  ;;  %v6079_v44 = vld [vmem:[#allocation7 + $0x8] sm:$0xff]  }
 0x522   :  { %5829 = vmatpush3.bf16.msra.mxu1 %v6079_v44 }
 0x523   :  { %v2256_v27 = vcombine.high %v2230_v22, %v2238_v24  ;;  %v2272_v52 = vcombine.high %v2246_v25, %v2254_v26  ;;  %v2255_v32 = vcombine.low %v2230_v22, %v2238_v24  ;;  %v2271_v33 = vcombine.low %v2246_v25, %v2254_v26  ;;  %5830 = vmatprep.subr.bf16.mxu1 %v6342_v11 }
 0x525   :  { %v6846_v35 = vrot.slane %v2256_v27, %v6531_v19  ;;  %v6849_v54 = vrot.slane %v2272_v52, %v6531_v19  ;;  %v6852_v56 = vrot.slane %v2255_v32, %v6531_v19  ;;  %v6855_v23 = vrot.slane %v2271_v33, %v6531_v19 }
 0x527   :  { %v1943_v63 = vpop.f32.mrf.mxu1  ;;  %v1989_v36 = vpop.f32.mrf.mxu0  ;;  %v2289_v37 = vcombine.low %v6846_v35, %v6849_v54  ;;  %v2287_v38 = vcombine.low %v6852_v56, %v6855_v23  ;;  %v2288_v40 = vcombine.high %v6852_v56, %v6855_v23  ;;  %v2290_v45 = vcombine.high %v6846_v35, %v6849_v54  ;;  %v6080_v54 = vld [vmem:[#allocation7] sm:$0xff]  }
 0x528   :  { %5831 = vmatpush3.bf16.msra.mxu1 %v6080_v54 }
 0x529   :  { %v5808_v46 = vpop.f32.mrf.mxu1  ;;  %v5814_v28 = vpop.f32.mrf.mxu0  ;;  %5844 = vmatprep.subr.bf16.mxu1 %v6342_v11 }
 0x52b   :  { %v1946_v62 = vpop.f32.mrf.mxu1  ;;  %v1992_v29 = vpop.f32.mrf.mxu0 }
 0x52d   :  { %v5809_v47 = vpop.f32.mrf.mxu1  ;;  %v5815_v30 = vpop.f32.mrf.mxu0 }
 0x54e   :  { %v2035_v59 = vpop.f32.mrf.mxu1 }
 0x54f   :  { %v2155_v48 = vcombine.low %v1943_v63, %v2035_v59  ;;  %v2156_v49 = vcombine.high %v1943_v63, %v2035_v59 }
 0x550   :  { %v5820_v31 = vpop.f32.mrf.mxu1 }
 0x551   :  { %v2163_v50 = vrot.slane %v2155_v48, %v6528_v8  ;;  %v2170_v5 = vrot.slane %v2156_v49, %v6528_v8 }
 0x552   :  { %v2038_v51 = vpop.f32.mrf.mxu1  ;;  %v2081_v39 = vpop.f32.mrf.mxu0 }
 0x553   :  { %v2171_v7 = vcombine.low %v1989_v36, %v2081_v39  ;;  %v2172_v58 = vcombine.high %v1989_v36, %v2081_v39 }
 0x554   :  { %v5821_v41 = vpop.f32.mrf.mxu1  ;;  %v5826_v57 = vpop.f32.mrf.mxu0 }
 0x555   :  { %v2179_v0 = vrot.slane %v2171_v7, %v6528_v8  ;;  %v2186_v1 = vrot.slane %v2172_v58, %v6528_v8 }
 0x556   :  { %v2084_v2 = vpop.f32.mrf.mxu0 }
 0x557   :  { %v2187_v61 = vcombine.low %v2163_v50, %v2179_v0  ;;  %v2188_v34 = vcombine.high %v2163_v50, %v2179_v0  ;;  %v2203_v3 = vcombine.low %v2170_v5, %v2186_v1  ;;  %v2204_v4 = vcombine.high %v2170_v5, %v2186_v1 }
 0x558   :  { %v5827_v6 = vpop.f32.mrf.mxu0 }
 0x559   :  { %v2195_v9 = vrot.slane %v2187_v61, %v6531_v19  ;;  %v2202_v16 = vrot.slane %v2188_v34, %v6531_v19  ;;  %v2211_v53 = vrot.slane %v2203_v3, %v6531_v19  ;;  %v2218_v21 = vrot.slane %v2204_v4, %v6531_v19 }
 0x55b   :  { %v2291_v60 = vcombine.low %v2195_v9, %v2202_v16  ;;  %v5508_v10 = vcombine.high %v2195_v9, %v2202_v16  ;;  %v2307_v12 = vcombine.low %v2211_v53, %v2218_v21  ;;  %v5509_v55 = vcombine.high %v2211_v53, %v2218_v21  ;;  %v6082_v21 = vld [vmem:[#allocation8] sm:$0xff]  }
 0x55d   :  { %v2298_v13 = vrot.slane %v2291_v60, %v6528_v8  ;;  %v2306_v14 = vrot.slane %v5508_v10, %v6528_v8  ;;  %v2314_v20 = vrot.slane %v2307_v12, %v6528_v8  ;;  %v2322_v22 = vrot.slane %v5509_v55, %v6528_v8 }
 0x55f   :  { %v2324_v24 = vcombine.high %v2298_v13, %v2306_v14  ;;  %v2340_v25 = vcombine.high %v2314_v20, %v2322_v22  ;;  %v2323_v26 = vcombine.low %v2298_v13, %v2306_v14  ;;  %v2339_v27 = vcombine.low %v2314_v20, %v2322_v22 }
 0x561   :  { %v2338_v52 = vrot.slane %v2324_v24, %v6531_v19  ;;  %v2354_v32 = vrot.slane %v2340_v25, %v6531_v19  ;;  %v2331_v33 = vrot.slane %v2323_v26, %v6531_v19  ;;  %v2347_v35 = vrot.slane %v2339_v27, %v6531_v19 }
 0x563   :  { %v2357_v63 = vcombine.low %v2338_v52, %v2354_v32  ;;  %v2356_v36 = vcombine.high %v2331_v33, %v2347_v35  ;;  %v2355_v46 = vcombine.low %v2331_v33, %v2347_v35  ;;  %v2358_v29 = vcombine.high %v2338_v52, %v2354_v32 }
 0x565   :  { %v6048_v28 = vpack.i.bf16 %v2357_v63, %v2289_v37  ;;  %v6043_v62 = vpack.i.bf16 %v2356_v36, %v2288_v40  ;;  %v6053_v47 = vpack.i.bf16 %v2358_v29, %v2290_v45 }
 0x567   :  { %6049 = vrot.lane.b32.xlu1 %v6048_v28, %s6331_s12  ;;  %6044 = vrot.lane.b32.xlu0 %v6043_v62, %s6338_s26 }
 0x56b   :  { %6054 = vrot.lane.b32.xlu1 %v6053_v47, %s6349_s16  ;;  %2408 = vrot.lane.b32.xlu0 %v6470_v18, %s6350_s17 }
 0x5d9   :  { %v6050_v30 = vpop.permute.xlu1 %6049  ;;  %v6045_v59 = vpop.permute.xlu0 %6044 }
 0x5da   :  { %v6047_v31 = vunpack.i.h.bf16 %v6045_v59  ;;  %v6046_v48 = vunpack.i.l.bf16 %v6045_v59  ;;  %v6052_v49 = vunpack.i.h.bf16 %v6050_v30  ;;  %v6051_v37 = vunpack.i.l.bf16 %v6050_v30 }
 0x5dc   :  { %v2383_v40 = vsel %vm1253_vm2, %v2287_v38, %v6046_v48  ;;  %v2384_v45 = vsel %vm1253_vm2, %v2355_v46, %v6047_v31 }
 0x5dd   :  { %v6055_v51 = vpop.permute.xlu1 %6054  ;;  %v2386_v18 = vsel %vm2385_vm4, %v2383_v40, %v6051_v37  ;;  %v2387_v58 = vsel %vm2385_vm4, %v2384_v45, %v6052_v49  ;;  %v2409_v56 = vpop.permute.xlu0 %2408  ;;  %v6083_v37 = vld [vmem:[%s7479_s6 + $0x18] sm:$0xff]   ;;  %v6084_v40 = vld [vmem:[%s7479_s6 + $0x10] sm:$0xff]   ;;  %v6085_v45 = vld [vmem:[%s7479_s6 + $0x8] sm:$0xff]  }
 0x5de   :  { %v6057_v39 = vunpack.i.h.bf16 %v6055_v51  ;;  %v6056_v7 = vunpack.i.l.bf16 %v6055_v51  ;;  %v6086_v51 = vld [vmem:[%s7479_s6] sm:$0xff]  }
 0x5e0   :  { %v2389_v41 = vsel %vm2388_vm5, %v2386_v18, %v6056_v7  ;;  %v2390_v57 = vsel %vm2388_vm5, %v2387_v58, %v6057_v39 }
 0x5e1   :  { %v2391_v50 = vpack.c.bf16 %v2390_v57, %v2389_v41 }
 0x5e3   :  { %5833 = vmatmul.mubr.msk.bf16.vlgmr.msra.gmra.mxu1 %vm105_vm0, %v2391_v50 }
 0x5e4   :  { %5852 = vmatprep.mubr.msk.bf16.mxu1 %vm6343_vm1, %v6342_v11  ;;  %5845 = vmatpush3.bf16.msra.mxu1 %v6083_v37 }
 0x5e5   :  { %5846 = vmatprep.subr.bf16.mxu1 %v6342_v11 }
 0x5e8   :  { %5847 = vmatpush3.bf16.msra.mxu1 %v6084_v40 }
 0x5e9   :  { %5848 = vmatprep.subr.bf16.mxu1 %v6342_v11 }
 0x5ec   :  { %5849 = vmatpush3.bf16.msra.mxu1 %v6085_v45 }
 0x5ed   :  { %5850 = vmatprep.subr.bf16.mxu1 %v6342_v11 }
 0x5f0   :  { %5851 = vmatpush3.bf16.msra.mxu1 %v6086_v51 }
 0x5f1   :  { %5872 = vmatprep.subr.bf16.mxu1 %v6342_v11 }
 0x6a3   :  { %v2448_v23 = vpop.f32.mrf.mxu1 }
 0x6a4   :  { %v2449_v38 = vadd.f32 %v2448_v23, %v2409_v56 }
 0x6a5   :  { %v5834_v5 = vpop.f32.mrf.mxu1 }
 0x6a6   :  { %v2455_v0 = vadd.f32 %v2449_v38, %v6474_v42  ;;  %v6909_v42 = vld [vmem:[%s7480_s7] ss:$2 sm:$0x7] }
 0x6a7   :  { %v2451_v1 = vpop.f32.mrf.mxu1  ;;  %v2487_v32 = vrot.slane %v6909_v42, 1 }
 0x6a8   :  { %v2452_v2 = vadd.f32 %v2451_v1, %v2409_v56  ;;  %v2457_v61 = vsel %vm105_vm0, %v2455_v0, 0.0  ;;  %v2463_v34 = vmul.f32 %v2455_v0, %v2455_v0 }
 0x6a9   :  { %2458 = vadd.xlane.f32.xlu1 %v2457_v61  ;;  %v5835_v3 = vpop.f32.mrf.mxu1  ;;  %v2491_v36 = vrot.slane %v2487_v32, %v6467_v17 }
 0x6aa   :  { %v2456_v4 = vadd.f32 %v2452_v2, %v6476_v43  ;;  %v2465_v6 = vsel %vm105_vm0, %v2463_v34, 0.0  ;;  %v6081_v43 = vld [vmem:[#allocation8 + $0x8] sm:$0xff]  }
 0x6ab   :  { %2466 = vadd.xlane.f32.xlu0 %v2465_v6  ;;  %5837 = vmatpush3.bf16.msra.mxu0 %v6081_v43 }
 0x6ac   :  { %v2460_v9 = vsel %vm105_vm0, %v2456_v4, 0.0  ;;  %v2464_v16 = vmul.f32 %v2456_v4, %v2456_v4  ;;  %5838 = vmatprep.subr.bf16.mxu0 %v6342_v11 }
 0x6ae   :  { %v2468_v53 = vsel %vm105_vm0, %v2464_v16, 0.0 }
 0x6af   :  { %2461 = vadd.xlane.f32.xlu0 %v2460_v9  ;;  %5839 = vmatpush3.bf16.msra.mxu0 %v6082_v21 }
 0x6b0   :  { %5856 = vmatprep.subr.bf16.mxu0 %v6342_v11 }
 0x6b3   :  { %2469 = vadd.xlane.f32.xlu0 %v2468_v53 }
 0x6ba   :  { %2495 = vrot.lane.b32.xlu1 %v6909_v42, %s6341_s18 }
 0x6c9   :  { %2510 = vrot.lane.b32.xlu0 %v6909_v42, %s6335_s21 }
 0x732   :  { %v2459_v60 = vpop.xlane.xlu1 %2458 }
 0x733   :  { %v2471_v10 = vmul.f32 0.03125, %v2459_v60 }
 0x734   :  { %v2467_v12 = vpop.xlane.xlu0 %2466 }
 0x735   :  { %v2475_v55 = vmul.f32 %v2471_v10, %v2471_v10  ;;  %v2473_v44 = vmul.f32 0.03125, %v2467_v12  ;;  %v2479_v54 = vsub.f32 %v2455_v0, %v2471_v10 }
 0x736   :  { %v6918_v35 = vpop.permute.xlu1 %2495 }
 0x737   :  { %v2477_v13 = vsub.f32 %v2473_v44, %v2475_v55  ;;  %v2497_v46 = vrot.slane %v6918_v35, 1  ;;  %v2601_v44 = vrot.slane %v6909_v42, 2 }
 0x738   :  { %v2462_v14 = vpop.xlane.xlu0 %2461 }
 0x739   :  { %v2481_v20 = vadd.f32 1e-05, %v2477_v13  ;;  %v2472_v22 = vmul.f32 0.03125, %v2462_v14  ;;  %v2501_v30 = vrot.slane %v2497_v46, %v6467_v17  ;;  %v2605_v13 = vrot.slane %v2601_v44, %v6467_v17  ;;  %v6087_v46 = vld [vmem:[%s7476_s3 + $0x38] sm:$0xff]  }
 0x73b   :  { %6139 = vrsqrt.f32 %v2481_v20  ;;  %v2476_v25 = vmul.f32 %v2472_v22, %v2472_v22  ;;  %v2480_v28 = vsub.f32 %v2456_v4, %v2472_v22 }
 0x73c   :  { %v2470_v24 = vpop.xlane.xlu0 %2469 }
 0x73d   :  { %v2474_v26 = vmul.f32 0.03125, %v2470_v24 }
 0x73f   :  { %v2478_v27 = vsub.f32 %v2474_v26, %v2476_v25 }
 0x740   :  { %v6942_v39 = vpop.permute.xlu0 %2510 }
 0x741   :  { %v2482_v52 = vadd.f32 1e-05, %v2478_v27  ;;  %v2512_v7 = vrot.slane %v6942_v39, 1 }
 0x743   :  { %6141 = vrsqrt.f32 %v2482_v52  ;;  %v2516_v18 = vrot.slane %v2512_v7, %v6467_v17 }
 0x748   :  { %v6140_v33 = vpop.eup %6139 }
 0x749   :  { %v2485_v63 = vmul.f32 %v6140_v33, %v2479_v54 }
 0x74b   :  { %v2493_v29 = vmul.f32 %v2491_v36, %v2485_v63 }
 0x74d   :  { %v2503_v31 = vadd.f32 %v2501_v30, %v2493_v29  ;;  %v6090_v29 = vld [vmem:[%s7476_s3 + $0x50] sm:$0xff]  }
 0x750   :  { %v6142_v62 = vpop.eup %6141 }
 0x751   :  { %v2486_v47 = vmul.f32 %v6142_v62, %v2480_v28  ;;  %v6088_v28 = vld [vmem:[%s7476_s3 + $0x58] sm:$0xff]   ;;  %v6089_v62 = vld [vmem:[%s7476_s3 + $0x30] sm:$0xff]  }
 0x753   :  { %v2494_v59 = vmul.f32 %v2491_v36, %v2486_v47  ;;  %v5521_v47 = vld [vmem:[%s7480_s7 + $0x1] ss:$2 sm:$0x7] }
 0x755   :  { %v2504_v48 = vadd.f32 %v2501_v30, %v2494_v59  ;;  %v6975_v30 = vrot.slane %v5521_v47, %v6467_v17 }
 0x757   :  { %v2505_v49 = vpack.c.bf16 %v2504_v48, %v2503_v31 }
 0x759   :  { %5841 = vmatmul.mubr.msk.bf16.vlgmr.msra.gmra.mxu0 %vm105_vm0, %v2505_v49 }
 0x75a   :  { %5860 = vmatprep.mubr.msk.bf16.mxu0 %vm6343_vm1, %v6342_v11  ;;  %5857 = vmatpush3.bf16.msra.mxu0 %v6087_v46 }
 0x75b   :  { %5858 = vmatprep.subr.bf16.mxu0 %v6342_v11 }
 0x75e   :  { %5859 = vmatpush3.bf16.msra.mxu0 %v6089_v62 }
 0x75f   :  { %5864 = vmatprep.subr.bf16.mxu0 %v6342_v11 }
 0x819   :  { %v2567_v58 = vpop.f32.mrf.mxu0 }
 0x81a   :  { %v2568_v41 = vadd.f32 %v2567_v58, %v2516_v18 }
 0x81b   :  { %v5842_v57 = vpop.f32.mrf.mxu0 }
 0x81c   :  { %v2574_v50 = vmul.f32 %v2568_v41, %v2568_v41 }
 0x81d   :  { %v2570_v56 = vpop.f32.mrf.mxu0 }
 0x81e   :  { %v2576_v23 = vmul.f32 %v2574_v50, %v2568_v41  ;;  %v2571_v38 = vadd.f32 %v2570_v56, %v2516_v18  ;;  %v2708_v56 = vrot.slane %v6918_v35, 2  ;;  %v6091_v35 = vld [vmem:[%s7476_s3 + $0x48] sm:$0xff]  }
 0x81f   :  { %v5843_v5 = vpop.f32.mrf.mxu0 }
 0x820   :  { %v2578_v0 = vmul.f32 0.044715, %v2576_v23  ;;  %v2575_v1 = vmul.f32 %v2571_v38, %v2571_v38 }
 0x822   :  { %v2580_v2 = vadd.f32 %v2578_v0, %v2568_v41  ;;  %v2577_v61 = vmul.f32 %v2575_v1, %v2571_v38  ;;  %v2712_v0 = vrot.slane %v2708_v56, %v6467_v17  ;;  %v2716_v1 = vrot.slane %v6942_v39, 2  ;;  %v6092_v39 = vld [vmem:[%s7476_s3 + $0x40] sm:$0xff]  }
 0x824   :  { %v2582_v34 = vmul.f32 0.7978846, %v2580_v2  ;;  %v2579_v3 = vmul.f32 0.044715, %v2577_v61 }
 0x826   :  { %6143 = vtanh.f32 %v2582_v34  ;;  %v2581_v4 = vadd.f32 %v2579_v3, %v2571_v38 }
 0x828   :  { %v2583_v6 = vmul.f32 0.7978846, %v2581_v4  ;;  %v2720_v4 = vrot.slane %v2716_v1, %v6467_v17 }
 0x82a   :  { %6145 = vtanh.f32 %v2583_v6 }
 0x833   :  { %v6144_v9 = vpop.eup %6143 }
 0x834   :  { %v2586_v16 = vadd.f32 1.0, %v6144_v9 }
 0x836   :  { %v2588_v43 = vmul.f32 0.5, %v2586_v16 }
 0x837   :  { %v6146_v53 = vpop.eup %6145 }
 0x838   :  { %v2587_v21 = vadd.f32 1.0, %v6146_v53  ;;  %v2590_v10 = vmul.f32 %v2588_v43, %v2568_v41 }
 0x83a   :  { %v2589_v60 = vmul.f32 0.5, %v2587_v21 }
 0x83c   :  { %v2591_v12 = vmul.f32 %v2589_v60, %v2571_v38 }
 0x83e   :  { %v2592_v55 = vpack.c.bf16 %v2591_v12, %v2590_v10 }
 0x840   :  { %5853 = vmatmul.mubr.msk.bf16.vlgmr.msra.gmra.mxu1 %vm2631_vm6, %v2592_v55 }
 0x841   :  { %5876 = vmatprep.mubr.msk.bf16.mxu1 %vm6343_vm1, %v6342_v11  ;;  %5873 = vmatpush3.bf16.msra.mxu1 %v6088_v28 }
 0x842   :  { %5874 = vmatprep.subr.bf16.mxu1 %v6342_v11 }
 0x845   :  { %5875 = vmatpush3.bf16.msra.mxu1 %v6090_v29 }
 0x846   :  { %5886 = vmatprep.subr.bf16.mxu1 %v6342_v11 }
 0x900   :  { %v2669_v14 = vpop.f32.mrf.mxu1 }
 0x901   :  { %v2670_v20 = vadd.f32 %v2669_v14, %v2605_v13 }
 0x902   :  { %v5854_v22 = vpop.f32.mrf.mxu1 }
 0x903   :  { %v2676_v24 = vadd.f32 %v2670_v20, %v2503_v31 }
 0x904   :  { %v2672_v25 = vpop.f32.mrf.mxu1 }
 0x905   :  { %v2673_v26 = vadd.f32 %v2672_v25, %v2605_v13  ;;  %v2678_v27 = vsel %vm105_vm0, %v2676_v24, 0.0  ;;  %v2684_v52 = vmul.f32 %v2676_v24, %v2676_v24 }
 0x906   :  { %2679 = vadd.xlane.f32.xlu1 %v2678_v27  ;;  %v5855_v32 = vpop.f32.mrf.mxu1 }
 0x907   :  { %v2677_v33 = vadd.f32 %v2673_v26, %v2504_v48  ;;  %v2686_v54 = vsel %vm105_vm0, %v2684_v52, 0.0 }
 0x909   :  { %v2681_v63 = vsel %vm105_vm0, %v2677_v33, 0.0  ;;  %v2685_v36 = vmul.f32 %v2677_v33, %v2677_v33 }
 0x90a   :  { %2687 = vadd.xlane.f32.xlu1 %v2686_v54  ;;  %2682 = vadd.xlane.f32.xlu0 %v2681_v63 }
 0x90b   :  { %v2689_v42 = vsel %vm105_vm0, %v2685_v36, 0.0 }
 0x90e   :  { %2690 = vadd.xlane.f32.xlu0 %v2689_v42 }
 0x91b   :  { %2811 = vrot.lane.b32.xlu1 %v6975_v30, %s6341_s18 }
 0x98f   :  { %v2680_v59 = vpop.xlane.xlu1 %2679 }
 0x990   :  { %v2692_v31 = vmul.f32 0.03125, %v2680_v59 }
 0x992   :  { %v2696_v37 = vmul.f32 %v2692_v31, %v2692_v31  ;;  %v2700_v23 = vsub.f32 %v2676_v24, %v2692_v31 }
 0x993   :  { %v2688_v48 = vpop.xlane.xlu1 %2687  ;;  %v2683_v49 = vpop.xlane.xlu0 %2682 }
 0x994   :  { %v2694_v40 = vmul.f32 0.03125, %v2688_v48  ;;  %v2693_v45 = vmul.f32 0.03125, %v2683_v49 }
 0x996   :  { %v2698_v51 = vsub.f32 %v2694_v40, %v2696_v37  ;;  %v2697_v58 = vmul.f32 %v2693_v45, %v2693_v45  ;;  %v2701_v2 = vsub.f32 %v2677_v33, %v2693_v45 }
 0x997   :  { %v2691_v7 = vpop.xlane.xlu0 %2690  ;;  %v2812_v44 = vpop.permute.xlu1 %2811 }
 0x998   :  { %v2702_v18 = vadd.f32 1e-05, %v2698_v51  ;;  %v2695_v41 = vmul.f32 0.03125, %v2691_v7 }
 0x99a   :  { %6147 = vrsqrt.f32 %v2702_v18  ;;  %v2699_v57 = vsub.f32 %v2695_v41, %v2697_v58 }
 0x99c   :  { %v2703_v50 = vadd.f32 1e-05, %v2699_v57 }
 0x99e   :  { %6149 = vrsqrt.f32 %v2703_v50 }
 0x9a7   :  { %v6148_v38 = vpop.eup %6147 }
 0x9a8   :  { %v2706_v5 = vmul.f32 %v6148_v38, %v2700_v23 }
 0x9aa   :  { %v2714_v3 = vmul.f32 %v2712_v0, %v2706_v5 }
 0x9ab   :  { %v6150_v61 = vpop.eup %6149 }
 0x9ac   :  { %v2707_v34 = vmul.f32 %v6150_v61, %v2701_v2  ;;  %v6983_v9 = vadd.f32 %v2720_v4, %v2714_v3 }
 0x9ae   :  { %v2715_v6 = vmul.f32 %v2712_v0, %v2707_v34 }
 0x9b0   :  { %v6985_v16 = vadd.f32 %v2720_v4, %v2715_v6 }
 0x9b2   :  { %v2726_v53 = vpack.c.bf16 %v6985_v16, %v6983_v9 }
 0x9b4   :  { %5861 = vmatmul.mubr.msk.bf16.vlgmr.msra.gmra.mxu0 %vm105_vm0, %v2726_v53  ;;  %5877 = vmatmul.mubr.msk.bf16.vlgmr.msra.gmra.mxu1 %vm105_vm0, %v2726_v53 }
 0x9b5   :  { %5865 = vmatpush3.bf16.msra.mxu0 %v6091_v35  ;;  %5868 = vmatprep.mubr.msk.bf16.mxu0 %vm6343_vm1, %v6342_v11 }
 0x9b6   :  { %5866 = vmatprep.subr.bf16.mxu0 %v6342_v11  ;;  %5888 = vmatprep.mubr.msk.bf16.mxu1 %vm6343_vm1, %v6342_v11 }
 0x9b9   :  { %5867 = vmatpush3.bf16.msra.mxu0 %v6092_v39 }
 0x9ba   :  { %5880 = vmatprep.subr.bf16.mxu0 %v6342_v11 }
 0x9bc   :  { %5869 = vmatmul.mubr.msk.bf16.vlgmr.msra.gmra.mxu0 %vm105_vm0, %v2726_v53 }
 0x9bd   :  { %5882 = vmatprep.mubr.msk.bf16.mxu0 %vm6343_vm1, %v6342_v11 }
 0xa74   :  { %v2787_v43 = vpop.f32.mrf.mxu0  ;;  %v7006_v21 = vpop.f32.mrf.mxu1 }
 0xa75   :  { %v2788_v26 = vadd.f32 %v2787_v43, %v6975_v30 }
 0xa76   :  { %v5862_v60 = vpop.f32.mrf.mxu0  ;;  %v5878_v10 = vpop.f32.mrf.mxu1 }
 0xa78   :  { %v2790_v12 = vpop.f32.mrf.mxu0  ;;  %v7008_v55 = vpop.f32.mrf.mxu1 }
 0xa79   :  { %v7020_v32 = vadd.f32 %v2790_v12, %v6975_v30 }
 0xa7a   :  { %v5863_v13 = vpop.f32.mrf.mxu0  ;;  %v5879_v14 = vpop.f32.mrf.mxu1 }
 0xa7c   :  { %v2848_v20 = vpop.f32.mrf.mxu0 }
 0xa7d   :  { %v2849_v22 = vadd.f32 %v2848_v20, %v2812_v44 }
 0xa7e   :  { %v5870_v24 = vpop.f32.mrf.mxu0 }
 0xa7f   :  { %3224 = vrot.lane.b32.xlu1 %v2849_v22, %s6346_s0  ;;  %3218 = vrot.lane.b32.xlu0 %v2849_v22, %s6345_s15 }
 0xa80   :  { %v2851_v25 = vpop.f32.mrf.mxu0 }
 0xa81   :  { %v2852_v52 = vadd.f32 %v2851_v25, %v2812_v44 }
 0xa82   :  { %v5871_v27 = vpop.f32.mrf.mxu0 }
 0xa83   :  { %3230 = vrot.lane.b32.xlu1 %v2849_v22, %s6344_s14  ;;  %2924 = vrot.lane.b32.xlu0 %v2788_v26, %s6346_s0 }
 0xa87   :  { %2918 = vrot.lane.b32.xlu1 %v2788_v26, %s6345_s15  ;;  %3220 = vrot.lane.b32.xlu0 %v2852_v52, %s6345_s15 }
 0xa8b   :  { %2930 = vrot.lane.b32.xlu1 %v2788_v26, %s6344_s14  ;;  %3232 = vrot.lane.b32.xlu0 %v2852_v52, %s6344_s14 }
 0xa8f   :  { %3226 = vrot.lane.b32.xlu1 %v2852_v52, %s6346_s0  ;;  %2926 = vrot.lane.b32.xlu0 %v7020_v32, %s6346_s0 }
 0xa93   :  { %2920 = vrot.lane.b32.xlu1 %v7020_v32, %s6345_s15  ;;  %2872 = vrot.lane.b32.xlu0 %v6975_v30, %s6335_s21 }
 0xa97   :  { %2932 = vrot.lane.b32.xlu1 %v7020_v32, %s6344_s14 }
 0xaf1   :  { %v3225_v33 = vpop.permute.xlu1 %3224  ;;  %v3219_v54 = vpop.permute.xlu0 %3218 }
 0xaf2   :  { %v3236_v63 = vcombine.low %v2849_v22, %v3225_v33  ;;  %v3237_v36 = vcombine.high %v2849_v22, %v3225_v33 }
 0xaf4   :  { %v3244_v29 = vrot.slane %v3236_v63, %v6528_v8  ;;  %v3251_v47 = vrot.slane %v3237_v36, %v6528_v8 }
 0xaf5   :  { %v3231_v42 = vpop.permute.xlu1 %3230  ;;  %v2925_v46 = vpop.permute.xlu0 %2924 }
 0xaf6   :  { %v3252_v28 = vcombine.low %v3219_v54, %v3231_v42  ;;  %v3253_v62 = vcombine.high %v3219_v54, %v3231_v42  ;;  %v2936_v58 = vcombine.low %v2788_v26, %v2925_v46  ;;  %v2937_v41 = vcombine.high %v2788_v26, %v2925_v46 }
 0xaf8   :  { %v3260_v59 = vrot.slane %v3252_v28, %v6528_v8  ;;  %v3267_v31 = vrot.slane %v3253_v62, %v6528_v8  ;;  %v2944_v2 = vrot.slane %v2936_v58, %v6528_v8  ;;  %v2951_v61 = vrot.slane %v2937_v41, %v6528_v8 }
 0xaf9   :  { %v2919_v48 = vpop.permute.xlu1 %2918  ;;  %v3221_v49 = vpop.permute.xlu0 %3220 }
 0xafa   :  { %v3268_v37 = vcombine.low %v3244_v29, %v3260_v59  ;;  %v3269_v40 = vcombine.high %v3244_v29, %v3260_v59  ;;  %v3284_v45 = vcombine.low %v3251_v47, %v3267_v31  ;;  %v3285_v51 = vcombine.high %v3251_v47, %v3267_v31 }
 0xafc   :  { %v3276_v7 = vrot.slane %v3268_v37, %v6531_v19  ;;  %v3283_v18 = vrot.slane %v3269_v40, %v6531_v19  ;;  %v3292_v57 = vrot.slane %v3284_v45, %v6531_v19  ;;  %v3299_v50 = vrot.slane %v3285_v51, %v6531_v19 }
 0xafd   :  { %v2931_v56 = vpop.permute.xlu1 %2930  ;;  %v3233_v23 = vpop.permute.xlu0 %3232 }
 0xafe   :  { %v3372_v38 = vcombine.low %v3276_v7, %v3283_v18  ;;  %v5547_v5 = vcombine.high %v3276_v7, %v3283_v18  ;;  %v2952_v0 = vcombine.low %v2919_v48, %v2931_v56  ;;  %v2953_v1 = vcombine.high %v2919_v48, %v2931_v56 }
 0xaff   :  { %v3320_v34 = vcombine.low %v3221_v49, %v3233_v23  ;;  %v3321_v3 = vcombine.high %v3221_v49, %v3233_v23  ;;  %v3388_v4 = vcombine.low %v3292_v57, %v3299_v50  ;;  %v5548_v6 = vcombine.high %v3292_v57, %v3299_v50 }
 0xb00   :  { %v2960_v35 = vrot.slane %v2952_v0, %v6528_v8  ;;  %v2967_v53 = vrot.slane %v2953_v1, %v6528_v8  ;;  %v7044_v43 = vrot.slane %v3372_v38, %v6528_v8  ;;  %v7047_v60 = vrot.slane %v5547_v5, %v6528_v8 }
 0xb01   :  { %v3227_v39 = vpop.permute.xlu1 %3226  ;;  %v3328_v22 = vrot.slane %v3320_v34, %v6528_v8  ;;  %v3335_v24 = vrot.slane %v3321_v3, %v6528_v8  ;;  %v2927_v27 = vpop.permute.xlu0 %2926  ;;  %v3395_v58 = vrot.slane %v3388_v4, %v6528_v8  ;;  %v3403_v41 = vrot.slane %v5548_v6, %v6528_v8 }
 0xb02   :  { %v3304_v10 = vcombine.low %v2852_v52, %v3227_v39  ;;  %v3305_v12 = vcombine.high %v2852_v52, %v3227_v39  ;;  %v2968_v44 = vcombine.low %v2944_v2, %v2960_v35  ;;  %v2969_v13 = vcombine.high %v2944_v2, %v2960_v35 }
 0xb03   :  { %v2984_v14 = vcombine.low %v2951_v61, %v2967_v53  ;;  %v2985_v20 = vcombine.high %v2951_v61, %v2967_v53  ;;  %v3004_v37 = vcombine.low %v7020_v32, %v2927_v27  ;;  %v3005_v40 = vcombine.high %v7020_v32, %v2927_v27 }
 0xb04   :  { %v3312_v25 = vrot.slane %v3304_v10, %v6528_v8  ;;  %v3319_v26 = vrot.slane %v3305_v12, %v6528_v8  ;;  %v2976_v33 = vrot.slane %v2968_v44, %v6531_v19  ;;  %v2983_v54 = vrot.slane %v2969_v13, %v6531_v19 }
 0xb05   :  { %v2992_v63 = vrot.slane %v2984_v14, %v6531_v19  ;;  %v2999_v52 = vrot.slane %v2985_v20, %v6531_v19  ;;  %v2921_v36 = vpop.permute.xlu1 %2920  ;;  %v7077_v50 = vpop.permute.xlu0 %2872  ;;  %v3012_v5 = vrot.slane %v3004_v37, %v6528_v8  ;;  %v3019_v0 = vrot.slane %v3005_v40, %v6528_v8 }
 0xb06   :  { %v3336_v42 = vcombine.low %v3312_v25, %v3328_v22  ;;  %v3337_v46 = vcombine.high %v3312_v25, %v3328_v22  ;;  %v3352_v28 = vcombine.low %v3319_v26, %v3335_v24  ;;  %v3353_v62 = vcombine.high %v3319_v26, %v3335_v24 }
 0xb07   :  { %v3072_v29 = vcombine.low %v2976_v33, %v2983_v54  ;;  %v5543_v47 = vcombine.high %v2976_v33, %v2983_v54  ;;  %v3088_v59 = vcombine.low %v2992_v63, %v2999_v52  ;;  %v5544_v31 = vcombine.high %v2992_v63, %v2999_v52 }
 0xb08   :  { %v3344_v48 = vrot.slane %v3336_v42, %v6531_v19  ;;  %v3351_v49 = vrot.slane %v3337_v46, %v6531_v19  ;;  %v3360_v57 = vrot.slane %v3352_v28, %v6531_v19  ;;  %v3367_v32 = vrot.slane %v3353_v62, %v6531_v19 }
 0xb09   :  { %v7062_v45 = vrot.slane %v3072_v29, %v6528_v8  ;;  %v7065_v51 = vrot.slane %v5543_v47, %v6528_v8  ;;  %v7068_v7 = vrot.slane %v3088_v59, %v6528_v8  ;;  %v7071_v18 = vrot.slane %v5544_v31, %v6528_v8  ;;  %v2933_v56 = vpop.permute.xlu1 %2932 }
 0xb0a   :  { %v3440_v1 = vcombine.low %v3344_v48, %v3351_v49  ;;  %v7087_v2 = vadd.f32 %v7006_v21, %v7077_v50  ;;  %v3020_v61 = vcombine.low %v2921_v36, %v2933_v56  ;;  %v3021_v34 = vcombine.high %v2921_v36, %v2933_v56 }
 0xb0b   :  { %v3104_v23 = vcombine.low %v7062_v45, %v7065_v51  ;;  %v3120_v38 = vcombine.low %v7068_v7, %v7071_v18  ;;  %v5549_v3 = vcombine.high %v3344_v48, %v3351_v49  ;;  %v3456_v4 = vcombine.low %v3360_v57, %v3367_v32 }
 0xb0c   :  { %v3404_v6 = vcombine.low %v7044_v43, %v7047_v60  ;;  %v3420_v35 = vcombine.low %v3395_v58, %v3403_v41  ;;  %3518 = vrot.lane.b32.xlu1 %v7087_v2, %s6345_s15  ;;  %v3028_v53 = vrot.slane %v3020_v61, %v6528_v8  ;;  %v3035_v39 = vrot.slane %v3021_v34, %v6528_v8 }
 0xb0d   :  { %v3112_v10 = vrot.slane %v3104_v23, %v6531_v19  ;;  %v3128_v21 = vrot.slane %v3120_v38, %v6531_v19  ;;  %v3405_v13 = vcombine.high %v7044_v43, %v7047_v60  ;;  %v3421_v14 = vcombine.high %v3395_v58, %v3403_v41 }
 0xb0e   :  { %v3412_v12 = vrot.slane %v3404_v6, %v6531_v19  ;;  %v3428_v44 = vrot.slane %v3420_v35, %v6531_v19  ;;  %v3036_v20 = vcombine.low %v3012_v5, %v3028_v53  ;;  %v3037_v22 = vcombine.high %v3012_v5, %v3028_v53 }
 0xb0f   :  { %v3052_v24 = vcombine.low %v3019_v0, %v3035_v39  ;;  %v3053_v25 = vcombine.high %v3019_v0, %v3035_v39  ;;  %v7102_v26 = vrot.slane %v3440_v1, %v6528_v8  ;;  %v5550_v27 = vcombine.high %v3360_v57, %v3367_v32 }
 0xb10   :  { %v3436_v33 = vcombine.low %v3412_v12, %v3428_v44  ;;  %v3437_v54 = vcombine.high %v3412_v12, %v3428_v44  ;;  %v3044_v63 = vrot.slane %v3036_v20, %v6531_v19  ;;  %v3051_v52 = vrot.slane %v3037_v22, %v6531_v19 }
 0xb11   :  { %v3060_v36 = vrot.slane %v3052_v24, %v6531_v19  ;;  %v3067_v42 = vrot.slane %v3053_v25, %v6531_v19  ;;  %v3419_v46 = vrot.slane %v3405_v13, %v6531_v19  ;;  %v3435_v28 = vrot.slane %v3421_v14, %v6531_v19 }
 0xb12   :  { %v3508_v43 = vpack.c.bf16 %v3436_v33, %v3436_v33  ;;  %v3509_v60 = vpack.c.bf16 %v3437_v54, %v3437_v54  ;;  %v3455_v62 = vrot.slane %v5549_v3, %v6528_v8  ;;  %v3463_v29 = vrot.slane %v3456_v4, %v6528_v8 }
 0xb13   :  { %v3136_v47 = vcombine.low %v3112_v10, %v3128_v21  ;;  %v3137_v59 = vcombine.high %v3112_v10, %v3128_v21  ;;  %v3140_v31 = vcombine.low %v3044_v63, %v3051_v52  ;;  %v3438_v37 = vcombine.low %v3419_v46, %v3435_v28 }
 0xb14   :  { %v3820_v48 = vsel %vm1253_vm2, %v3508_v43, 0  ;;  %v3866_v49 = vsel %vm1253_vm2, %v3509_v60, 0  ;;  %v3471_v40 = vrot.slane %v5550_v27, %v6528_v8  ;;  %v5545_v58 = vcombine.high %v3044_v63, %v3051_v52 }
 0xb15   :  { %v3156_v41 = vcombine.low %v3060_v36, %v3067_v42  ;;  %5881 = vmatpush3.bf16.xpose.msra.mxu0 %v3820_v48  ;;  %v3439_v57 = vcombine.high %v3419_v46, %v3435_v28  ;;  %v3105_v32 = vcombine.high %v7062_v45, %v7065_v51  ;;  %v3121_v56 = vcombine.high %v7068_v7, %v7071_v18 }
 0xb16   :  { %v5546_v23 = vcombine.high %v3060_v36, %v3067_v42  ;;  %5887 = vmatpush3.bf16.xpose.msra.mxu1 %v3866_v49  ;;  %5892 = vmatprep.subr.bf16.mxu0 %v6342_v11  ;;  %v3208_v38 = vpack.c.bf16 %v3136_v47, %v3136_v47  ;;  %v3147_v5 = vrot.slane %v3140_v31, %v6528_v8 }
 0xb17   :  { %5898 = vmatprep.subr.bf16.mxu1 %v6342_v11  ;;  %v3209_v0 = vpack.c.bf16 %v3137_v59, %v3137_v59  ;;  %v3510_v1 = vpack.c.bf16 %v3438_v37, %v3438_v37  ;;  %v3472_v61 = vcombine.low %v7102_v26, %v3455_v62  ;;  %v3155_v34 = vrot.slane %v5545_v58, %v6528_v8 }
 0xb18   :  { %v3163_v45 = vrot.slane %v3156_v41, %v6528_v8  ;;  %v3511_v51 = vpack.c.bf16 %v3439_v57, %v3439_v57  ;;  %v3488_v3 = vcombine.low %v3463_v29, %v3471_v40  ;;  %v3171_v7 = vrot.slane %v5546_v23, %v6528_v8 }
 0xb19   :  { %v3119_v18 = vrot.slane %v3105_v32, %v6531_v19  ;;  %v3135_v4 = vrot.slane %v3121_v56, %v6531_v19  ;;  %v3480_v6 = vrot.slane %v3472_v61, %v6531_v19  ;;  %v3912_v53 = vsel %vm1253_vm2, %v3510_v1, 0 }
 0xb1a   :  { %v3496_v35 = vrot.slane %v3488_v3, %v6531_v19  ;;  %v3473_v39 = vcombine.high %v7102_v26, %v3455_v62  ;;  %v3489_v10 = vcombine.high %v3463_v29, %v3471_v40  ;;  %v3958_v21 = vsel %vm1253_vm2, %v3511_v51, 0 }
 0xb1b   :  { %v3172_v13 = vcombine.low %v3147_v5, %v3155_v34  ;;  %v3188_v14 = vcombine.low %v3163_v45, %v3171_v7  ;;  %v3138_v20 = vcombine.low %v3119_v18, %v3135_v4  ;;  %v3139_v22 = vcombine.high %v3119_v18, %v3135_v4 }
 0xb1c   :  { %5883 = vmatmul.mubr.msk.bf16.vlgmr.msra.gmra.mxu0 %vm1253_vm2, %v3208_v38  ;;  %v3504_v12 = vcombine.low %v3480_v6, %v3496_v35  ;;  %v3505_v44 = vcombine.high %v3480_v6, %v3496_v35  ;;  %v3487_v25 = vrot.slane %v3473_v39, %v6531_v19  ;;  %v3503_v26 = vrot.slane %v3489_v10, %v6531_v19  ;;  %v6198_v38 = vld [vmem:[#allocation5] ss:$0 sm:$0xff] }
 0xb1d   :  { %5889 = vmatmul.mubr.msk.bf16.vlgmr.msra.gmra.mxu1 %vm1253_vm2, %v3209_v0  ;;  %5893 = vmatpush3.bf16.xpose.msra.mxu0 %v3912_v53  ;;  %v3210_v33 = vpack.c.bf16 %v3138_v20, %v3138_v20  ;;  %v3180_v54 = vrot.slane %v3172_v13, %v6531_v19  ;;  %v3196_v63 = vrot.slane %v3188_v14, %v6531_v19 }
 0xb1e   :  { %5899 = vmatpush3.bf16.xpose.msra.mxu1 %v3958_v21  ;;  %5894 = vmatprep.mubr.msk.bf16.mxu0 %vm6343_vm1, %v6342_v11  ;;  %v3512_v24 = vpack.c.bf16 %v3504_v12, %v3504_v12  ;;  %v3513_v27 = vpack.c.bf16 %v3505_v44, %v3505_v44  ;;  %v3211_v52 = vpack.c.bf16 %v3139_v22, %v3139_v22 }
 0xb1f   :  { %5900 = vmatprep.mubr.msk.bf16.mxu1 %vm6343_vm1, %v6342_v11  ;;  %5904 = vmatprep.subr.bf16.mxu0 %v6342_v11  ;;  %v3506_v42 = vcombine.low %v3487_v25, %v3503_v26  ;;  %v3507_v60 = vcombine.high %v3487_v25, %v3503_v26  ;;  %v3173_v46 = vcombine.high %v3147_v5, %v3155_v34  ;;  %v6199_v26 = vld [vmem:[#allocation5 + $0x1] ss:$0 sm:$0xff] }
 0xb20   :  { %5910 = vmatprep.subr.bf16.mxu1 %v6342_v11  ;;  %v4004_v36 = vsel %vm1253_vm2, %v3512_v24, 0  ;;  %v4050_v43 = vsel %vm1253_vm2, %v3513_v27, 0  ;;  %v3189_v28 = vcombine.high %v3163_v45, %v3171_v7  ;;  %v3204_v62 = vcombine.low %v3180_v54, %v3196_v63 }
 0xb21   :  { %v3205_v29 = vcombine.high %v3180_v54, %v3196_v63  ;;  %v3514_v47 = vpack.c.bf16 %v3506_v42, %v3506_v42  ;;  %v3515_v59 = vpack.c.bf16 %v3507_v60, %v3507_v60  ;;  %v3187_v48 = vrot.slane %v3173_v46, %v6531_v19 }
 0xb22   :  { %v3212_v31 = vpack.c.bf16 %v3204_v62, %v3204_v62  ;;  %v3203_v49 = vrot.slane %v3189_v28, %v6531_v19 }
 0xb23   :  { %v3213_v37 = vpack.c.bf16 %v3205_v29, %v3205_v29  ;;  %v4096_v40 = vsel %vm1253_vm2, %v3514_v47, 0  ;;  %v4142_v58 = vsel %vm1253_vm2, %v3515_v59, 0 }
 0xb24   :  { %5895 = vmatmul.mubr.msk.bf16.vlgmr.msra.gmra.mxu0 %vm1253_vm2, %v3210_v33  ;;  %v3206_v41 = vcombine.low %v3187_v48, %v3203_v49  ;;  %v3207_v57 = vcombine.high %v3187_v48, %v3203_v49 }
 0xb25   :  { %5901 = vmatmul.mubr.msk.bf16.vlgmr.msra.gmra.mxu1 %vm1253_vm2, %v3211_v52  ;;  %5905 = vmatpush3.bf16.xpose.msra.mxu0 %v4004_v36 }
 0xb26   :  { %5911 = vmatpush3.bf16.xpose.msra.mxu1 %v4050_v43  ;;  %5906 = vmatprep.mubr.msk.bf16.mxu0 %vm6343_vm1, %v6342_v11  ;;  %v3214_v32 = vpack.c.bf16 %v3206_v41, %v3206_v41  ;;  %v3215_v56 = vpack.c.bf16 %v3207_v57, %v3207_v57 }
 0xb27   :  { %5912 = vmatprep.mubr.msk.bf16.mxu1 %vm6343_vm1, %v6342_v11  ;;  %5916 = vmatprep.subr.bf16.mxu0 %v6342_v11 }
 0xb28   :  { %5922 = vmatprep.subr.bf16.mxu1 %v6342_v11 }
 0xb2c   :  { %5907 = vmatmul.mubr.msk.bf16.vlgmr.msra.gmra.mxu0 %vm1253_vm2, %v3212_v31 }
 0xb2d   :  { %5913 = vmatmul.mubr.msk.bf16.vlgmr.msra.gmra.mxu1 %vm1253_vm2, %v3213_v37  ;;  %5917 = vmatpush3.bf16.xpose.msra.mxu0 %v4096_v40 }
 0xb2e   :  { %5923 = vmatpush3.bf16.xpose.msra.mxu1 %v4142_v58  ;;  %5918 = vmatprep.mubr.msk.bf16.mxu0 %vm6343_vm1, %v6342_v11 }
 0xb2f   :  { %5924 = vmatprep.mubr.msk.bf16.mxu1 %vm6343_vm1, %v6342_v11  ;;  %5928 = vmatprep.subr.bf16.mxu0 %v6342_v11 }
 0xb30   :  { %5934 = vmatprep.subr.bf16.mxu1 %v6342_v11 }
 0xb34   :  { %5919 = vmatmul.mubr.msk.bf16.vlgmr.msra.gmra.mxu0 %vm1253_vm2, %v3214_v32 }
 0xb35   :  { %5925 = vmatmul.mubr.msk.bf16.vlgmr.msra.gmra.mxu1 %vm1253_vm2, %v3215_v56  ;;  %5930 = vmatprep.mubr.msk.bf16.mxu0 %vm6343_vm1, %v6342_v11 }
 0xb36   :  { %5936 = vmatprep.mubr.msk.bf16.mxu1 %vm6343_vm1, %v6342_v11 }
 0xb7e   :  { %v3519_v57 = vpop.permute.xlu1 %3518 }
 0xbdc   :  { %v3856_v23 = vpop.f32.mrf.mxu0 }
 0xbdd   :  { %v7173_v5 = vadd.f32 %v6198_v38, %v3856_v23  ;;  %v3902_v0 = vpop.f32.mrf.mxu1 }
 0xbde   :  { %v3903_v1 = vadd.f32 %v6198_v38, %v3902_v0  ;;  %v5884_v61 = vpop.f32.mrf.mxu0 }
 0xbdf   :  { %v5890_v34 = vpop.f32.mrf.mxu1  ;;  %v4184_v45 = vsel %vm1253_vm2, %v7173_v5, -inf }
 0xbe0   :  { %v4187_v51 = vsel %vm1253_vm2, %v3903_v1, -inf  ;;  %4185 = vmax.xlane.f32.xlu0 %v4184_v45  ;;  %v3859_v3 = vpop.f32.mrf.mxu0 }
 0xbe1   :  { %v3905_v7 = vpop.f32.mrf.mxu1  ;;  %4188 = vmax.xlane.f32.xlu1 %v4187_v51 }
 0xbe2   :  { %v5885_v18 = vpop.f32.mrf.mxu0 }
 0xbe3   :  { %v5891_v4 = vpop.f32.mrf.mxu1 }
 0xbe4   :  { %v3948_v6 = vpop.f32.mrf.mxu0 }
 0xbe5   :  { %v3949_v35 = vadd.f32 %v6198_v38, %v3948_v6  ;;  %v3994_v53 = vpop.f32.mrf.mxu1 }
 0xbe6   :  { %v5896_v39 = vpop.f32.mrf.mxu0  ;;  %v3995_v10 = vadd.f32 %v6198_v38, %v3994_v53 }
 0xbe7   :  { %v5902_v21 = vpop.f32.mrf.mxu1  ;;  %v4190_v12 = vsel %vm1253_vm2, %v3949_v35, -inf }
 0xbe8   :  { %4191 = vmax.xlane.f32.xlu0 %v4190_v12  ;;  %v3951_v44 = vpop.f32.mrf.mxu0  ;;  %v4193_v22 = vsel %vm1253_vm2, %v3995_v10, -inf }
 0xbe9   :  { %v3997_v13 = vpop.f32.mrf.mxu1 }
 0xbea   :  { %v5897_v14 = vpop.f32.mrf.mxu0 }
 0xbeb   :  { %v5903_v20 = vpop.f32.mrf.mxu1 }
 0xbec   :  { %4194 = vmax.xlane.f32.xlu0 %v4193_v22  ;;  %v4040_v24 = vpop.f32.mrf.mxu0 }
 0xbed   :  { %v4086_v25 = vpop.f32.mrf.mxu1  ;;  %v4041_v27 = vadd.f32 %v6199_v26, %v4040_v24 }
 0xbee   :  { %v4087_v33 = vadd.f32 %v6199_v26, %v4086_v25  ;;  %v5908_v54 = vpop.f32.mrf.mxu0 }
 0xbef   :  { %v5914_v63 = vpop.f32.mrf.mxu1  ;;  %v4196_v52 = vsel %vm1253_vm2, %v4041_v27, -inf }
 0xbf0   :  { %v4199_v36 = vsel %vm1253_vm2, %v4087_v33, -inf  ;;  %4197 = vmax.xlane.f32.xlu0 %v4196_v52  ;;  %v4043_v42 = vpop.f32.mrf.mxu0 }
 0xbf1   :  { %v4089_v43 = vpop.f32.mrf.mxu1  ;;  %4200 = vmax.xlane.f32.xlu1 %v4199_v36 }
 0xbf2   :  { %v5909_v60 = vpop.f32.mrf.mxu0 }
 0xbf3   :  { %v5915_v46 = vpop.f32.mrf.mxu1 }
 0xbf4   :  { %v4132_v28 = vpop.f32.mrf.mxu0 }
 0xbf5   :  { %v7182_v62 = vadd.f32 %v6199_v26, %v4132_v28  ;;  %v4178_v29 = vpop.f32.mrf.mxu1 }
 0xbf6   :  { %v7184_v47 = vadd.f32 %v6199_v26, %v4178_v29  ;;  %v5920_v59 = vpop.f32.mrf.mxu0 }
 0xbf7   :  { %v5926_v31 = vpop.f32.mrf.mxu1  ;;  %v4202_v48 = vsel %vm1253_vm2, %v7182_v62, -inf }
 0xbf8   :  { %v4205_v49 = vsel %vm1253_vm2, %v7184_v47, -inf  ;;  %4203 = vmax.xlane.f32.xlu0 %v4202_v48  ;;  %v4135_v37 = vpop.f32.mrf.mxu0 }
 0xbf9   :  { %v4181_v40 = vpop.f32.mrf.mxu1  ;;  %4206 = vmax.xlane.f32.xlu1 %v4205_v49 }
 0xbfa   :  { %v5921_v58 = vpop.f32.mrf.mxu0 }
 0xbfb   :  { %v5927_v41 = vpop.f32.mrf.mxu1 }
 0xc0a   :  { %3530 = vrot.lane.b32.xlu1 %v7087_v2, %s6344_s14 }
 0xc0e   :  { %3524 = vrot.lane.b32.xlu0 %v7087_v2, %s6346_s0 }
 0xc69   :  { %v4186_v32 = vpop.xlane.xlu0 %4185 }
 0xc6a   :  { %v4189_v56 = vpop.xlane.xlu1 %4188  ;;  %v4208_v23 = vsub.f32 %v7173_v5, %v4186_v32 }
 0xc6b   :  { %v4209_v38 = vsub.f32 %v3903_v1, %v4189_v56 }
 0xc6c   :  { %v4216_v0 = vmul.f32 1.442695, %v4208_v23 }
 0xc6d   :  { %v4218_v61 = vmul.f32 1.442695, %v4209_v38 }
 0xc6e   :  { %6151 = vpow2.f32 %v4216_v0 }
 0xc6f   :  { %6153 = vpow2.f32 %v4218_v61 }
 0xc71   :  { %v4192_v34 = vpop.xlane.xlu0 %4191 }
 0xc72   :  { %v4210_v45 = vsub.f32 %v3949_v35, %v4192_v34 }
 0xc74   :  { %v4220_v51 = vmul.f32 1.442695, %v4210_v45 }
 0xc75   :  { %v4195_v3 = vpop.xlane.xlu0 %4194 }
 0xc76   :  { %6155 = vpow2.f32 %v4220_v51  ;;  %v4211_v7 = vsub.f32 %v3995_v10, %v4195_v3 }
 0xc78   :  { %v4222_v18 = vmul.f32 1.442695, %v4211_v7 }
 0xc79   :  { %v4198_v4 = vpop.xlane.xlu0 %4197 }
 0xc7a   :  { %6157 = vpow2.f32 %v4222_v18  ;;  %v4201_v6 = vpop.xlane.xlu1 %4200  ;;  %v4212_v53 = vsub.f32 %v4041_v27, %v4198_v4 }
 0xc7b   :  { %v7195_v39 = vpop.eup %6151  ;;  %v4213_v21 = vsub.f32 %v4087_v33, %v4201_v6 }
 0xc7c   :  { %v4224_v5 = vmul.f32 1.442695, %v4212_v53  ;;  %v4232_v1 = vsel %vm1253_vm2, %v7195_v39, 0.0  ;;  %v7199_v12 = vpop.eup %6153 }
 0xc7d   :  { %v4226_v44 = vmul.f32 1.442695, %v4213_v21  ;;  %4233 = vadd.xlane.f32.xlu1 %v4232_v1  ;;  %v4235_v35 = vsel %vm1253_vm2, %v7199_v12, 0.0 }
 0xc7e   :  { %6159 = vpow2.f32 %v4224_v5  ;;  %v7243_v5 = vadd.f32 %v7008_v55, %v7077_v50 }
 0xc7f   :  { %6161 = vpow2.f32 %v4226_v44 }
 0xc81   :  { %4236 = vadd.xlane.f32.xlu1 %v4235_v35  ;;  %v7203_v10 = vpop.xlane.xlu0 %4203 }
 0xc82   :  { %v7205_v13 = vpop.xlane.xlu1 %4206  ;;  %v4214_v55 = vsub.f32 %v7182_v62, %v7203_v10 }
 0xc83   :  { %v7207_v14 = vpop.eup %6155  ;;  %v4215_v50 = vsub.f32 %v7184_v47, %v7205_v13 }
 0xc84   :  { %v4238_v20 = vsel %vm1253_vm2, %v7207_v14, 0.0 }
 0xc85   :  { %4239 = vadd.xlane.f32.xlu0 %v4238_v20  ;;  %v3525_v22 = vpop.permute.xlu0 %3524 }
 0xc86   :  { %v3531_v24 = vpop.permute.xlu1 %3530  ;;  %v3536_v25 = vcombine.low %v7087_v2, %v3525_v22  ;;  %v3537_v26 = vcombine.high %v7087_v2, %v3525_v22 }
 0xc87   :  { %v7213_v27 = vpop.eup %6157  ;;  %v3552_v33 = vcombine.low %v3519_v57, %v3531_v24  ;;  %v3553_v54 = vcombine.high %v3519_v57, %v3531_v24 }
 0xc88   :  { %v3544_v63 = vrot.slane %v3536_v25, %v6528_v8  ;;  %v3551_v52 = vrot.slane %v3537_v26, %v6528_v8  ;;  %v4241_v36 = vsel %vm1253_vm2, %v7213_v27, 0.0  ;;  %v4228_v25 = vmul.f32 1.442695, %v4214_v55 }
 0xc89   :  { %v3560_v42 = vrot.slane %v3552_v33, %v6528_v8  ;;  %v3567_v43 = vrot.slane %v3553_v54, %v6528_v8  ;;  %4242 = vadd.xlane.f32.xlu1 %v4241_v36  ;;  %v4230_v26 = vmul.f32 1.442695, %v4215_v50 }
 0xc8a   :  { %6163 = vpow2.f32 %v4228_v25 }
 0xc8b   :  { %v7221_v60 = vpop.eup %6159  ;;  %v3568_v46 = vcombine.low %v3544_v63, %v3560_v42  ;;  %v3569_v2 = vcombine.high %v3544_v63, %v3560_v42  ;;  %v3584_v28 = vcombine.low %v3551_v52, %v3567_v43  ;;  %v3585_v29 = vcombine.high %v3551_v52, %v3567_v43 }
 0xc8c   :  { %v4244_v59 = vsel %vm1253_vm2, %v7221_v60, 0.0  ;;  %v7225_v31 = vpop.eup %6161  ;;  %6165 = vpow2.f32 %v4230_v26 }
 0xc8d   :  { %v3576_v48 = vrot.slane %v3568_v46, %v6531_v19  ;;  %v3583_v49 = vrot.slane %v3569_v2, %v6531_v19  ;;  %v3592_v37 = vrot.slane %v3584_v28, %v6531_v19  ;;  %v3599_v40 = vrot.slane %v3585_v29, %v6531_v19  ;;  %4245 = vadd.xlane.f32.xlu0 %v4244_v59 }
 0xc8e   :  { %v4247_v56 = vsel %vm1253_vm2, %v7225_v31, 0.0 }
 0xc8f   :  { %v3672_v58 = vcombine.low %v3576_v48, %v3583_v49  ;;  %v5551_v41 = vcombine.high %v3576_v48, %v3583_v49  ;;  %v3688_v57 = vcombine.low %v3592_v37, %v3599_v40  ;;  %v5552_v32 = vcombine.high %v3592_v37, %v3599_v40 }
 0xc91   :  { %v3679_v23 = vrot.slane %v3672_v58, %v6528_v8  ;;  %v3687_v38 = vrot.slane %v5551_v41, %v6528_v8  ;;  %v3695_v0 = vrot.slane %v3688_v57, %v6528_v8  ;;  %v3703_v61 = vrot.slane %v5552_v32, %v6528_v8  ;;  %4248 = vadd.xlane.f32.xlu0 %v4247_v56 }
 0xc93   :  { %v3704_v34 = vcombine.low %v3679_v23, %v3687_v38  ;;  %v3720_v45 = vcombine.low %v3695_v0, %v3703_v61  ;;  %v3705_v51 = vcombine.high %v3679_v23, %v3687_v38  ;;  %v3721_v3 = vcombine.high %v3695_v0, %v3703_v61 }
 0xc95   :  { %v3712_v7 = vrot.slane %v3704_v34, %v6531_v19  ;;  %v3728_v18 = vrot.slane %v3720_v45, %v6531_v19  ;;  %v3719_v4 = vrot.slane %v3705_v51, %v6531_v19  ;;  %v3735_v6 = vrot.slane %v3721_v3, %v6531_v19 }
 0xc97   :  { %v3736_v53 = vcombine.low %v3712_v7, %v3728_v18  ;;  %v3737_v21 = vcombine.high %v3712_v7, %v3728_v18  ;;  %v3738_v1 = vcombine.low %v3719_v4, %v3735_v6  ;;  %v3739_v44 = vcombine.high %v3719_v4, %v3735_v6  ;;  %v7259_v33 = vpop.eup %6163 }
 0xc98   :  { %v4250_v54 = vsel %vm1253_vm2, %v7259_v33, 0.0 }
 0xc99   :  { %v3808_v35 = vpack.c.bf16 %v3736_v53, %v3736_v53  ;;  %v3809_v20 = vpack.c.bf16 %v3737_v21, %v3737_v21  ;;  %v7263_v63 = vpop.eup %6165  ;;  %v3810_v43 = vpack.c.bf16 %v3738_v1, %v3738_v1  ;;  %v3811_v49 = vpack.c.bf16 %v3739_v44, %v3739_v44 }
 0xc9a   :  { %3526 = vrot.lane.b32.xlu1 %v7243_v5, %s6346_s0  ;;  %v4253_v52 = vsel %vm1253_vm2, %v7263_v63, 0.0 }
 0xc9b   :  { %v4284_v22 = vsel %vm1721_vm3, %v3808_v35, 0  ;;  %v4330_v24 = vsel %vm1721_vm3, %v3809_v20, 0  ;;  %v4376_v59 = vsel %vm1721_vm3, %v3810_v43, 0  ;;  %v4422_v57 = vsel %vm1721_vm3, %v3811_v49, 0 }
 0xc9c   :  { %5929 = vmatpush3.bf16.msra.mxu0 %v4284_v22  ;;  %5935 = vmatpush3.bf16.msra.mxu1 %v4330_v24 }
 0xc9d   :  { %5940 = vmatprep.subr.bf16.mxu0 %v6342_v11  ;;  %5946 = vmatprep.subr.bf16.mxu1 %v6342_v11 }
 0xc9e   :  { %3532 = vrot.lane.b32.xlu1 %v7243_v5, %s6344_s14 }
 0xca7   :  { %3520 = vrot.lane.b32.xlu0 %v7243_v5, %s6345_s15 }
 0xcc2   :  { %4251 = vadd.xlane.f32.xlu1 %v4250_v54 }
 0xcc6   :  { %4254 = vadd.xlane.f32.xlu0 %v4253_v52 }
 0xd06   :  { %v4234_v62 = vpop.xlane.xlu1 %4233 }
 0xd07   :  { %6167 = vrcp.f32 %v4234_v62 }
 0xd0a   :  { %v4237_v10 = vpop.xlane.xlu1 %4236 }
 0xd0b   :  { %6169 = vrcp.f32 %v4237_v10 }
 0xd0e   :  { %v4240_v47 = vpop.xlane.xlu0 %4239 }
 0xd0f   :  { %6171 = vrcp.f32 %v4240_v47 }
 0xd12   :  { %v4243_v13 = vpop.xlane.xlu1 %4242 }
 0xd13   :  { %6173 = vrcp.f32 %v4243_v13 }
 0xd14   :  { %v6168_v36 = vpop.eup %6167 }
 0xd15   :  { %v4264_v42 = vmul.f32 %v6168_v36, %v7195_v39 }
 0xd16   :  { %v4246_v46 = vpop.xlane.xlu0 %4245  ;;  %v3527_v29 = vpop.permute.xlu1 %3526 }
 0xd17   :  { %v4272_v2 = vpack.c.bf16 %v4264_v42, %v4264_v42  ;;  %v3604_v58 = vcombine.low %v7243_v5, %v3527_v29  ;;  %v3605_v41 = vcombine.high %v7243_v5, %v3527_v29  ;;  %6175 = vrcp.f32 %v4246_v46 }
 0xd18   :  { %v6170_v28 = vpop.eup %6169 }
 0xd19   :  { %5931 = vmatmul.mubr.msk.bf16.vlgmr.msra.gmra.mxu0 %vm1253_vm2, %v4272_v2  ;;  %v4265_v48 = vmul.f32 %v6170_v28, %v7199_v12  ;;  %v3612_v34 = vrot.slane %v3604_v58, %v6528_v8  ;;  %v3619_v45 = vrot.slane %v3605_v41, %v6528_v8 }
 0xd1a   :  { %5941 = vmatpush3.bf16.msra.mxu0 %v4376_v59  ;;  %v4249_v37 = vpop.xlane.xlu0 %4248  ;;  %5942 = vmatprep.mubr.msk.bf16.mxu0 %vm6343_vm1, %v6342_v11  ;;  %v3533_v32 = vpop.permute.xlu1 %3532 }
 0xd1b   :  { %v4273_v40 = vpack.c.bf16 %v4265_v48, %v4265_v48  ;;  %5952 = vmatprep.subr.bf16.mxu0 %v6342_v11  ;;  %6177 = vrcp.f32 %v4249_v37 }
 0xd1c   :  { %v6172_v39 = vpop.eup %6171 }
 0xd1d   :  { %5937 = vmatmul.mubr.msk.bf16.vlgmr.msra.gmra.mxu1 %vm1253_vm2, %v4273_v40  ;;  %v4266_v12 = vmul.f32 %v6172_v39, %v7207_v14 }
 0xd1e   :  { %5947 = vmatpush3.bf16.msra.mxu1 %v4422_v57  ;;  %v3521_v56 = vpop.permute.xlu0 %3520  ;;  %5948 = vmatprep.mubr.msk.bf16.mxu1 %vm6343_vm1, %v6342_v11 }
 0xd1f   :  { %v3620_v23 = vcombine.low %v3521_v56, %v3533_v32  ;;  %v3621_v38 = vcombine.high %v3521_v56, %v3533_v32  ;;  %v4274_v0 = vpack.c.bf16 %v4266_v12, %v4266_v12  ;;  %5958 = vmatprep.subr.bf16.mxu1 %v6342_v11 }
 0xd20   :  { %v6174_v61 = vpop.eup %6173 }
 0xd21   :  { %v3628_v14 = vrot.slane %v3620_v23, %v6528_v8  ;;  %v3635_v51 = vrot.slane %v3621_v38, %v6528_v8  ;;  %5943 = vmatmul.mubr.msk.bf16.vlgmr.msra.gmra.mxu0 %vm1253_vm2, %v4274_v0  ;;  %v4267_v3 = vmul.f32 %v6174_v61, %v7213_v27 }
 0xd22   :  { %5954 = vmatprep.mubr.msk.bf16.mxu0 %vm6343_vm1, %v6342_v11 }
 0xd23   :  { %v3636_v7 = vcombine.low %v3612_v34, %v3628_v14  ;;  %v3637_v18 = vcombine.high %v3612_v34, %v3628_v14  ;;  %v3652_v4 = vcombine.low %v3619_v45, %v3635_v51  ;;  %v3653_v6 = vcombine.high %v3619_v45, %v3635_v51 }
 0xd24   :  { %v4275_v53 = vpack.c.bf16 %v4267_v3, %v4267_v3  ;;  %v6176_v10 = vpop.eup %6175 }
 0xd25   :  { %v3644_v21 = vrot.slane %v3636_v7, %v6531_v19  ;;  %v3651_v5 = vrot.slane %v3637_v18, %v6531_v19  ;;  %v3660_v1 = vrot.slane %v3652_v4, %v6531_v19  ;;  %v3667_v44 = vrot.slane %v3653_v6, %v6531_v19 }
 0xd26   :  { %5949 = vmatmul.mubr.msk.bf16.vlgmr.msra.gmra.mxu1 %vm1253_vm2, %v4275_v53  ;;  %v4268_v49 = vmul.f32 %v6176_v10, %v7221_v60 }
 0xd27   :  { %v3740_v35 = vcombine.low %v3644_v21, %v3651_v5  ;;  %v5553_v27 = vcombine.high %v3644_v21, %v3651_v5  ;;  %v3756_v20 = vcombine.low %v3660_v1, %v3667_v44  ;;  %v5554_v22 = vcombine.high %v3660_v1, %v3667_v44  ;;  %5960 = vmatprep.mubr.msk.bf16.mxu1 %vm6343_vm1, %v6342_v11 }
 0xd28   :  { %v6178_v43 = vpop.eup %6177  ;;  %v4276_v57 = vpack.c.bf16 %v4268_v49, %v4268_v49 }
 0xd29   :  { %v3747_v24 = vrot.slane %v3740_v35, %v6528_v8  ;;  %v3755_v55 = vrot.slane %v5553_v27, %v6528_v8  ;;  %v3763_v50 = vrot.slane %v3756_v20, %v6528_v8  ;;  %v3771_v25 = vrot.slane %v5554_v22, %v6528_v8 }
 0xd2a   :  { %v4269_v37 = vmul.f32 %v6178_v43, %v7225_v31 }
 0xd2b   :  { %v3772_v26 = vcombine.low %v3747_v24, %v3755_v55  ;;  %v3788_v54 = vcombine.low %v3763_v50, %v3771_v25  ;;  %v3773_v52 = vcombine.high %v3747_v24, %v3755_v55  ;;  %v3789_v62 = vcombine.high %v3763_v50, %v3771_v25 }
 0xd2c   :  { %v4277_v12 = vpack.c.bf16 %v4269_v37, %v4269_v37 }
 0xd2d   :  { %v3780_v47 = vrot.slane %v3772_v26, %v6531_v19  ;;  %v3796_v13 = vrot.slane %v3788_v54, %v6531_v19  ;;  %v3787_v36 = vrot.slane %v3773_v52, %v6531_v19  ;;  %v3803_v42 = vrot.slane %v3789_v62, %v6531_v19 }
 0xd2f   :  { %v3804_v46 = vcombine.low %v3780_v47, %v3796_v13  ;;  %v3805_v2 = vcombine.high %v3780_v47, %v3796_v13  ;;  %v3806_v28 = vcombine.low %v3787_v36, %v3803_v42  ;;  %v3807_v29 = vcombine.high %v3787_v36, %v3803_v42 }
 0xd31   :  { %v3812_v59 = vpack.c.bf16 %v3804_v46, %v3804_v46  ;;  %v3813_v48 = vpack.c.bf16 %v3805_v2, %v3805_v2  ;;  %v3814_v58 = vpack.c.bf16 %v3806_v28, %v3806_v28  ;;  %v3815_v41 = vpack.c.bf16 %v3807_v29, %v3807_v29 }
 0xd33   :  { %v4468_v40 = vsel %vm1721_vm3, %v3812_v59, 0  ;;  %v4514_v39 = vsel %vm1721_vm3, %v3813_v48, 0  ;;  %v4560_v60 = vsel %vm1721_vm3, %v3814_v58, 0  ;;  %v4606_v31 = vsel %vm1721_vm3, %v3815_v41, 0 }
 0xd34   :  { %5953 = vmatpush3.bf16.msra.mxu0 %v4468_v40  ;;  %5959 = vmatpush3.bf16.msra.mxu1 %v4514_v39 }
 0xd35   :  { %5964 = vmatprep.subr.bf16.mxu0 %v6342_v11  ;;  %5970 = vmatprep.subr.bf16.mxu1 %v6342_v11 }
 0xd37   :  { %5955 = vmatmul.mubr.msk.bf16.vlgmr.msra.gmra.mxu0 %vm1253_vm2, %v4276_v57  ;;  %5961 = vmatmul.mubr.msk.bf16.vlgmr.msra.gmra.mxu1 %vm1253_vm2, %v4277_v12 }
 0xd38   :  { %5965 = vmatpush3.bf16.msra.mxu0 %v4560_v60  ;;  %5971 = vmatpush3.bf16.msra.mxu1 %v4606_v31 }
 0xd39   :  { %5966 = vmatprep.mubr.msk.bf16.mxu0 %vm6343_vm1, %v6342_v11  ;;  %5972 = vmatprep.mubr.msk.bf16.mxu1 %vm6343_vm1, %v6342_v11 }
 0xd3a   :  { %5976 = vmatprep.subr.bf16.mxu0 %v6342_v11  ;;  %5984 = vmatprep.subr.bf16.mxu1 %v6342_v11 }
 0xd4b   :  { %v4252_v32 = vpop.xlane.xlu1 %4251 }
 0xd4c   :  { %6179 = vrcp.f32 %v4252_v32 }
 0xd4f   :  { %v4255_v56 = vpop.xlane.xlu0 %4254 }
 0xd50   :  { %6181 = vrcp.f32 %v4255_v56 }
 0xd59   :  { %v6180_v23 = vpop.eup %6179 }
 0xd5a   :  { %v4270_v38 = vmul.f32 %v6180_v23, %v7259_v33 }
 0xd5c   :  { %v4278_v0 = vpack.c.bf16 %v4270_v38, %v4270_v38 }
 0xd5d   :  { %v6182_v61 = vpop.eup %6181 }
 0xd5e   :  { %5967 = vmatmul.mubr.msk.bf16.vlgmr.msra.gmra.mxu0 %vm1253_vm2, %v4278_v0  ;;  %v4271_v34 = vmul.f32 %v6182_v61, %v7263_v63 }
 0xd5f   :  { %5980 = vmatprep.mubr.msk.bf16.mxu0 %vm6343_vm1, %v6342_v11 }
 0xd60   :  { %v4279_v45 = vpack.c.bf16 %v4271_v34, %v4271_v34 }
 0xd62   :  { %5973 = vmatmul.mubr.msk.bf16.vlgmr.msra.gmra.mxu1 %vm1253_vm2, %v4279_v45 }
 0xd63   :  { %5988 = vmatprep.mubr.msk.bf16.mxu1 %vm6343_vm1, %v6342_v11 }
 0xdd9   :  { %v4320_v14 = vpop.f32.mrf.mxu0 }
 0xddb   :  { %v5932_v51 = vpop.f32.mrf.mxu0 }
 0xddd   :  { %v4323_v3 = vpop.f32.mrf.mxu0  ;;  %v4366_v7 = vpop.f32.mrf.mxu1 }
 0xddf   :  { %v5933_v33 = vpop.f32.mrf.mxu0  ;;  %v5938_v18 = vpop.f32.mrf.mxu1 }
 0xde1   :  { %v4369_v4 = vpop.f32.mrf.mxu1  ;;  %v4412_v6 = vpop.f32.mrf.mxu0 }
 0xde2   :  { %v4648_v53 = vcombine.low %v4320_v14, %v4412_v6  ;;  %v4649_v21 = vcombine.high %v4320_v14, %v4412_v6 }
 0xde3   :  { %v5939_v63 = vpop.f32.mrf.mxu1  ;;  %v5944_v5 = vpop.f32.mrf.mxu0 }
 0xde4   :  { %v4656_v24 = vrot.slane %v4648_v53, %v6528_v8  ;;  %v4663_v55 = vrot.slane %v4649_v21, %v6528_v8 }
 0xde5   :  { %v4415_v1 = vpop.f32.mrf.mxu0 }
 0xde6   :  { %v4458_v44 = vpop.f32.mrf.mxu1 }
 0xde7   :  { %v4664_v35 = vcombine.low %v4366_v7, %v4458_v44  ;;  %v4665_v27 = vcombine.high %v4366_v7, %v4458_v44  ;;  %v5945_v20 = vpop.f32.mrf.mxu0 }
 0xde8   :  { %v5950_v22 = vpop.f32.mrf.mxu1 }
 0xde9   :  { %v4672_v50 = vrot.slane %v4664_v35, %v6528_v8  ;;  %v4679_v25 = vrot.slane %v4665_v27, %v6528_v8 }
 0xdea   :  { %v4461_v26 = vpop.f32.mrf.mxu1 }
 0xdeb   :  { %v4680_v54 = vcombine.low %v4656_v24, %v4672_v50  ;;  %v4681_v52 = vcombine.high %v4656_v24, %v4672_v50  ;;  %v4696_v62 = vcombine.low %v4663_v55, %v4679_v25  ;;  %v4697_v10 = vcombine.high %v4663_v55, %v4679_v25 }
 0xdec   :  { %v5951_v47 = vpop.f32.mrf.mxu1 }
 0xded   :  { %v4688_v13 = vrot.slane %v4680_v54, %v6531_v19  ;;  %v4695_v36 = vrot.slane %v4681_v52, %v6531_v19  ;;  %v4704_v42 = vrot.slane %v4696_v62, %v6531_v19  ;;  %v4711_v43 = vrot.slane %v4697_v10, %v6531_v19 }
 0xdef   :  { %v4784_v46 = vcombine.low %v4688_v13, %v4695_v36  ;;  %v5571_v2 = vcombine.high %v4688_v13, %v4695_v36  ;;  %v4800_v28 = vcombine.low %v4704_v42, %v4711_v43  ;;  %v5572_v29 = vcombine.high %v4704_v42, %v4711_v43 }
 0xdf1   :  { %v4791_v59 = vrot.slane %v4784_v46, %v6528_v8  ;;  %v4799_v48 = vrot.slane %v5571_v2, %v6528_v8  ;;  %v4807_v49 = vrot.slane %v4800_v28, %v6528_v8  ;;  %v4815_v37 = vrot.slane %v5572_v29, %v6528_v8  ;;  %v6093_v46 = vld [vmem:[#allocation7 + $0x18] sm:$0xff]  }
 0xdf2   :  { %5977 = vmatpush3.bf16.msra.mxu0 %v6093_v46 }
 0xdf3   :  { %v4817_v40 = vcombine.high %v4791_v59, %v4799_v48  ;;  %v4833_v39 = vcombine.high %v4807_v49, %v4815_v37  ;;  %v4816_v58 = vcombine.low %v4791_v59, %v4799_v48  ;;  %v4832_v41 = vcombine.low %v4807_v49, %v4815_v37  ;;  %5978 = vmatprep.subr.bf16.mxu0 %v6342_v11 }
 0xdf5   :  { %v7342_v57 = vrot.slane %v4817_v40, %v6531_v19  ;;  %v7345_v12 = vrot.slane %v4833_v39, %v6531_v19  ;;  %v7348_v60 = vrot.slane %v4816_v58, %v6531_v19  ;;  %v7351_v31 = vrot.slane %v4832_v41, %v6531_v19 }
 0xdf7   :  { %v4504_v32 = vpop.f32.mrf.mxu0  ;;  %v4550_v56 = vpop.f32.mrf.mxu1  ;;  %v4850_v23 = vcombine.low %v7342_v57, %v7345_v12  ;;  %v4848_v38 = vcombine.low %v7348_v60, %v7351_v31  ;;  %v4849_v0 = vcombine.high %v7348_v60, %v7351_v31  ;;  %v4851_v61 = vcombine.high %v7342_v57, %v7345_v12  ;;  %v6094_v12 = vld [vmem:[#allocation7 + $0x10] sm:$0xff]  }
 0xdf8   :  { %5979 = vmatpush3.bf16.msra.mxu0 %v6094_v12 }
 0xdf9   :  { %v5956_v34 = vpop.f32.mrf.mxu0  ;;  %v5962_v45 = vpop.f32.mrf.mxu1  ;;  %5992 = vmatprep.subr.bf16.mxu0 %v6342_v11 }
 0xdfb   :  { %v4507_v14 = vpop.f32.mrf.mxu0  ;;  %v4553_v51 = vpop.f32.mrf.mxu1 }
 0xdfd   :  { %v5957_v3 = vpop.f32.mrf.mxu0  ;;  %v5963_v7 = vpop.f32.mrf.mxu1 }
 0xe1e   :  { %v4596_v33 = vpop.f32.mrf.mxu0 }
 0xe1f   :  { %v4716_v4 = vcombine.low %v4504_v32, %v4596_v33  ;;  %v4717_v6 = vcombine.high %v4504_v32, %v4596_v33 }
 0xe20   :  { %v5968_v18 = vpop.f32.mrf.mxu0 }
 0xe21   :  { %v4724_v35 = vrot.slane %v4716_v4, %v6528_v8  ;;  %v4731_v27 = vrot.slane %v4717_v6, %v6528_v8 }
 0xe22   :  { %v4599_v53 = vpop.f32.mrf.mxu0  ;;  %v4642_v21 = vpop.f32.mrf.mxu1 }
 0xe23   :  { %v4732_v63 = vcombine.low %v4550_v56, %v4642_v21  ;;  %v4733_v5 = vcombine.high %v4550_v56, %v4642_v21 }
 0xe24   :  { %v5969_v1 = vpop.f32.mrf.mxu0  ;;  %v5974_v44 = vpop.f32.mrf.mxu1 }
 0xe25   :  { %v4740_v20 = vrot.slane %v4732_v63, %v6528_v8  ;;  %v4747_v22 = vrot.slane %v4733_v5, %v6528_v8 }
 0xe26   :  { %v4645_v24 = vpop.f32.mrf.mxu1 }
 0xe27   :  { %v4748_v55 = vcombine.low %v4724_v35, %v4740_v20  ;;  %v4749_v50 = vcombine.high %v4724_v35, %v4740_v20  ;;  %v4764_v25 = vcombine.low %v4731_v27, %v4747_v22  ;;  %v4765_v26 = vcombine.high %v4731_v27, %v4747_v22 }
 0xe28   :  { %v5975_v54 = vpop.f32.mrf.mxu1 }
 0xe29   :  { %v4756_v52 = vrot.slane %v4748_v55, %v6531_v19  ;;  %v4763_v62 = vrot.slane %v4749_v50, %v6531_v19  ;;  %v4772_v10 = vrot.slane %v4764_v25, %v6531_v19  ;;  %v4779_v47 = vrot.slane %v4765_v26, %v6531_v19 }
 0xe2b   :  { %v4852_v13 = vcombine.low %v4756_v52, %v4763_v62  ;;  %v5573_v36 = vcombine.high %v4756_v52, %v4763_v62  ;;  %v4868_v42 = vcombine.low %v4772_v10, %v4779_v47  ;;  %v5574_v43 = vcombine.high %v4772_v10, %v4779_v47  ;;  %v6096_v62 = vld [vmem:[#allocation8 + $0x10] sm:$0xff]  }
 0xe2d   :  { %v4859_v2 = vrot.slane %v4852_v13, %v6528_v8  ;;  %v4867_v28 = vrot.slane %v5573_v36, %v6528_v8  ;;  %v4875_v29 = vrot.slane %v4868_v42, %v6528_v8  ;;  %v4883_v59 = vrot.slane %v5574_v43, %v6528_v8 }
 0xe2f   :  { %v4885_v48 = vcombine.high %v4859_v2, %v4867_v28  ;;  %v4901_v49 = vcombine.high %v4875_v29, %v4883_v59  ;;  %v4884_v37 = vcombine.low %v4859_v2, %v4867_v28  ;;  %v4900_v40 = vcombine.low %v4875_v29, %v4883_v59 }
 0xe31   :  { %v4899_v39 = vrot.slane %v4885_v48, %v6531_v19  ;;  %v4915_v58 = vrot.slane %v4901_v49, %v6531_v19  ;;  %v4892_v41 = vrot.slane %v4884_v37, %v6531_v19  ;;  %v4908_v57 = vrot.slane %v4900_v40, %v6531_v19 }
 0xe33   :  { %v4918_v32 = vcombine.low %v4899_v39, %v4915_v58  ;;  %v4917_v56 = vcombine.high %v4892_v41, %v4908_v57  ;;  %v4916_v34 = vcombine.low %v4892_v41, %v4908_v57  ;;  %v4919_v14 = vcombine.high %v4899_v39, %v4915_v58 }
 0xe35   :  { %v6063_v8 = vpack.i.bf16 %v4918_v32, %v4850_v23  ;;  %v6058_v45 = vpack.i.bf16 %v4917_v56, %v4849_v0  ;;  %v6068_v51 = vpack.i.bf16 %v4919_v14, %v4851_v61 }
 0xe37   :  { %6064 = vrot.lane.b32.xlu1 %v6063_v8, %s6331_s12  ;;  %6059 = vrot.lane.b32.xlu0 %v6058_v45, %s6338_s26 }
 0xe3b   :  { %6069 = vrot.lane.b32.xlu1 %v6068_v51, %s6349_s16  ;;  %4968 = vrot.lane.b32.xlu0 %v6975_v30, %s6350_s17 }
 0xea9   :  { %v6065_v19 = vpop.permute.xlu1 %6064  ;;  %v6060_v3 = vpop.permute.xlu0 %6059 }
 0xeaa   :  { %v6062_v7 = vunpack.i.h.bf16 %v6060_v3  ;;  %v6061_v33 = vunpack.i.l.bf16 %v6060_v3  ;;  %v6067_v18 = vunpack.i.h.bf16 %v6065_v19  ;;  %v6066_v4 = vunpack.i.l.bf16 %v6065_v19 }
 0xeac   :  { %v4944_v23 = vsel %vm1253_vm2, %v4848_v38, %v6061_v33  ;;  %v4945_v0 = vsel %vm1253_vm2, %v4916_v34, %v6062_v7  ;;  %v6097_v33 = vld [vmem:[%s7479_s6 + $0x38] sm:$0xff]  }
 0xead   :  { %v6070_v6 = vpop.permute.xlu1 %6069  ;;  %v4946_v21 = vsel %vm2385_vm4, %v4944_v23, %v6066_v4  ;;  %v4947_v30 = vsel %vm2385_vm4, %v4945_v0, %v6067_v18  ;;  %v4969_v60 = vpop.permute.xlu0 %4968  ;;  %v6098_v18 = vld [vmem:[%s7479_s6 + $0x30] sm:$0xff]   ;;  %v6099_v4 = vld [vmem:[%s7479_s6 + $0x28] sm:$0xff]   ;;  %v6100_v23 = vld [vmem:[%s7479_s6 + $0x20] sm:$0xff]  }
 0xeae   :  { %v6072_v61 = vunpack.i.h.bf16 %v6070_v6  ;;  %v6071_v53 = vunpack.i.l.bf16 %v6070_v6 }
 0xeb0   :  { %v4948_v63 = vsel %vm2388_vm5, %v4946_v21, %v6071_v53  ;;  %v4949_v5 = vsel %vm2388_vm5, %v4947_v30, %v6072_v61 }
 0xeb1   :  { %v4950_v1 = vpack.c.bf16 %v4949_v5, %v4948_v63 }
 0xeb3   :  { %5981 = vmatmul.mubr.msk.bf16.vlgmr.msra.gmra.mxu0 %vm105_vm0, %v4950_v1 }
 0xeb4   :  { %6000 = vmatprep.mubr.msk.bf16.mxu0 %vm6343_vm1, %v6342_v11  ;;  %5993 = vmatpush3.bf16.msra.mxu0 %v6097_v33 }
 0xeb5   :  { %5994 = vmatprep.subr.bf16.mxu0 %v6342_v11 }
 0xeb8   :  { %5995 = vmatpush3.bf16.msra.mxu0 %v6098_v18 }
 0xeb9   :  { %5996 = vmatprep.subr.bf16.mxu0 %v6342_v11 }
 0xebc   :  { %5997 = vmatpush3.bf16.msra.mxu0 %v6099_v4 }
 0xebd   :  { %5998 = vmatprep.subr.bf16.mxu0 %v6342_v11 }
 0xec0   :  { %5999 = vmatpush3.bf16.msra.mxu0 %v6100_v23 }
 0xf73   :  { %v5008_v31 = vpop.f32.mrf.mxu0 }
 0xf74   :  { %v5009_v38 = vadd.f32 %v5008_v31, %v4969_v60 }
 0xf75   :  { %v5982_v44 = vpop.f32.mrf.mxu0 }
 0xf76   :  { %v5015_v35 = vadd.f32 %v5009_v38, %v6983_v9  ;;  %v7405_v9 = vld [vmem:[%s7480_s7 + $0x1] ss:$2 sm:$0x7] }
 0xf77   :  { %v5011_v27 = vpop.f32.mrf.mxu0  ;;  %v5047_v40 = vrot.slane %v7405_v9, 1 }
 0xf78   :  { %v5012_v20 = vadd.f32 %v5011_v27, %v4969_v60  ;;  %v5017_v22 = vsel %vm105_vm0, %v5015_v35, 0.0  ;;  %v5023_v24 = vmul.f32 %v5015_v35, %v5015_v35 }
 0xf79   :  { %5018 = vadd.xlane.f32.xlu1 %v5017_v22  ;;  %v5983_v55 = vpop.f32.mrf.mxu0  ;;  %v5051_v12 = vrot.slane %v5047_v40, %v6467_v17 }
 0xf7a   :  { %v5016_v50 = vadd.f32 %v5012_v20, %v6985_v16  ;;  %v5025_v25 = vsel %vm105_vm0, %v5023_v24, 0.0  ;;  %v6095_v16 = vld [vmem:[#allocation8 + $0x18] sm:$0xff]  }
 0xf7b   :  { %5026 = vadd.xlane.f32.xlu0 %v5025_v25  ;;  %5985 = vmatpush3.bf16.msra.mxu1 %v6095_v16 }
 0xf7c   :  { %v5020_v26 = vsel %vm105_vm0, %v5016_v50, 0.0  ;;  %v5024_v54 = vmul.f32 %v5016_v50, %v5016_v50  ;;  %5986 = vmatprep.subr.bf16.mxu1 %v6342_v11 }
 0xf7e   :  { %v5028_v52 = vsel %vm105_vm0, %v5024_v54, 0.0 }
 0xf7f   :  { %5021 = vadd.xlane.f32.xlu0 %v5020_v26  ;;  %5987 = vmatpush3.bf16.msra.mxu1 %v6096_v62 }
 0xf80   :  { %6004 = vmatprep.subr.bf16.mxu1 %v6342_v11 }
 0xf83   :  { %5029 = vadd.xlane.f32.xlu0 %v5028_v52 }
 0xf8a   :  { %5055 = vrot.lane.b32.xlu1 %v7405_v9, %s6341_s18 }
 0xf99   :  { %5071 = vrot.lane.b32.xlu0 %v7405_v9, %s6335_s21 }
0x1002   :  { %v5019_v10 = vpop.xlane.xlu1 %5018 }
0x1003   :  { %v5031_v47 = vmul.f32 0.03125, %v5019_v10 }
0x1004   :  { %v5027_v13 = vpop.xlane.xlu0 %5026 }
0x1005   :  { %v5035_v36 = vmul.f32 %v5031_v47, %v5031_v47  ;;  %v5033_v42 = vmul.f32 0.03125, %v5027_v13  ;;  %v5039_v41 = vsub.f32 %v5015_v35, %v5031_v47  ;;  %v5163_v13 = vrot.slane %v7405_v9, 2 }
0x1006   :  { %v7414_v58 = vpop.permute.xlu1 %5055 }
0x1007   :  { %v5037_v43 = vsub.f32 %v5033_v42, %v5035_v36  ;;  %v5057_v32 = vrot.slane %v7414_v58, 1  ;;  %v5167_v36 = vrot.slane %v5163_v13, %v6467_v17 }
0x1008   :  { %v5022_v46 = vpop.xlane.xlu0 %5021 }
0x1009   :  { %v5041_v2 = vadd.f32 1e-05, %v5037_v43  ;;  %v5032_v28 = vmul.f32 0.03125, %v5022_v46  ;;  %v5061_v14 = vrot.slane %v5057_v32, %v6467_v17  ;;  %v6102_v32 = vld [vmem:[#allocation10] sm:$0xff]  }
0x100b   :  { %6183 = vrsqrt.f32 %v5041_v2  ;;  %v5036_v59 = vmul.f32 %v5032_v28, %v5032_v28  ;;  %v5040_v56 = vsub.f32 %v5016_v50, %v5032_v28 }
0x100c   :  { %v5030_v29 = vpop.xlane.xlu0 %5029 }
0x100d   :  { %v5034_v48 = vmul.f32 0.03125, %v5030_v29 }
0x100f   :  { %v5038_v49 = vsub.f32 %v5034_v48, %v5036_v59 }
0x1010   :  { %v7437_v0 = vpop.permute.xlu0 %5071 }
0x1011   :  { %v5042_v37 = vadd.f32 1e-05, %v5038_v49  ;;  %v5073_v6 = vrot.slane %v7437_v0, 1 }
0x1013   :  { %6185 = vrsqrt.f32 %v5042_v37  ;;  %v5077_v61 = vrot.slane %v5073_v6, %v6467_v17 }
0x1018   :  { %v6184_v39 = vpop.eup %6183 }
0x1019   :  { %v5045_v57 = vmul.f32 %v6184_v39, %v5039_v41 }
0x101b   :  { %v5053_v8 = vmul.f32 %v5051_v12, %v5045_v57  ;;  %v6201_v57 = vld [vmem:[%s7475_s2] ss:$0 sm:$0xff]  ;;  %s6352_s2 = smov [#allocation11]  }
0x101d   :  { %v5063_v19 = vadd.f32 %v5061_v14, %v5053_v8 }
0x1020   :  { %v6186_v34 = vpop.eup %6185 }
0x1021   :  { %v5046_v45 = vmul.f32 %v6186_v34, %v5040_v56 }
0x1023   :  { %v5054_v51 = vmul.f32 %v5051_v12, %v5046_v45  ;;  %v6101_v12 = vld [vmem:[#allocation10 + $0x8] sm:$0xff]  }
0x1025   :  { %v5064_v3 = vadd.f32 %v5061_v14, %v5054_v51 }
0x1027   :  { %v5065_v7 = vpack.c.bf16 %v5064_v3, %v5063_v19 }
0x1029   :  { %5989 = vmatmul.mubr.msk.bf16.vlgmr.msra.gmra.mxu1 %vm105_vm0, %v5065_v7 }
0x102a   :  { %6008 = vmatprep.mubr.msk.bf16.mxu1 %vm6343_vm1, %v6342_v11  ;;  %6005 = vmatpush3.bf16.msra.mxu1 %v6101_v12 }
0x102b   :  { %6006 = vmatprep.subr.bf16.mxu1 %v6342_v11 }
0x102e   :  { %6007 = vmatpush3.bf16.msra.mxu1 %v6102_v32 }
0x102f   :  { %6012 = vmatprep.subr.bf16.mxu1 %v6342_v11 }
0x10e9   :  { %v5128_v53 = vpop.f32.mrf.mxu1 }
0x10ea   :  { %v5129_v21 = vadd.f32 %v5128_v53, %v5077_v61 }
0x10eb   :  { %v5990_v30 = vpop.f32.mrf.mxu1 }
0x10ec   :  { %v5135_v63 = vmul.f32 %v5129_v21, %v5129_v21 }
0x10ed   :  { %v5131_v5 = vpop.f32.mrf.mxu1 }
0x10ee   :  { %v5137_v1 = vmul.f32 %v5135_v63, %v5129_v21  ;;  %v5132_v60 = vadd.f32 %v5131_v5, %v5077_v61  ;;  %v5269_v61 = vrot.slane %v7414_v58, 2  ;;  %v5277_v63 = vrot.slane %v7437_v0, 2 }
0x10ef   :  { %v5991_v31 = vpop.f32.mrf.mxu1 }
0x10f0   :  { %v5139_v38 = vmul.f32 0.044715, %v5137_v1  ;;  %v5136_v44 = vmul.f32 %v5132_v60, %v5132_v60  ;;  %v5273_v30 = vrot.slane %v5269_v61, %v6467_v17 }
0x10f2   :  { %v5141_v35 = vadd.f32 %v5139_v38, %v5129_v21  ;;  %v5138_v27 = vmul.f32 %v5136_v44, %v5132_v60  ;;  %v5281_v38 = vrot.slane %v5277_v63, %v6467_v17 }
0x10f4   :  { %v5143_v20 = vmul.f32 0.7978846, %v5141_v35  ;;  %v5140_v22 = vmul.f32 0.044715, %v5138_v27 }
0x10f6   :  { %6187 = vtanh.f32 %v5143_v20  ;;  %v5142_v24 = vadd.f32 %v5140_v22, %v5132_v60 }
0x10f8   :  { %v5144_v55 = vmul.f32 0.7978846, %v5142_v24 }
0x10fa   :  { %6189 = vtanh.f32 %v5144_v55 }
0x1103   :  { %v6188_v50 = vpop.eup %6187 }
0x1104   :  { %v5147_v25 = vadd.f32 1.0, %v6188_v50 }
0x1106   :  { %v5149_v54 = vmul.f32 0.5, %v5147_v25 }
0x1107   :  { %v6190_v26 = vpop.eup %6189 }
0x1108   :  { %v5148_v52 = vadd.f32 1.0, %v6190_v26  ;;  %v5151_v62 = vmul.f32 %v5149_v54, %v5129_v21 }
0x110a   :  { %v5150_v16 = vmul.f32 0.5, %v5148_v52 }
0x110c   :  { %v5152_v10 = vmul.f32 %v5150_v16, %v5132_v60 }
0x110e   :  { %v5153_v47 = vpack.c.bf16 %v5152_v10, %v5151_v62 }
0x1110   :  { %6001 = vmatmul.mubr.msk.bf16.vlgmr.msra.gmra.mxu0 %vm2631_vm6, %v5153_v47 }
0x11d0   :  { %v5230_v42 = vpop.f32.mrf.mxu0 }
0x11d1   :  { %v5231_v43 = vadd.f32 %v5230_v42, %v5167_v36  ;;  %v6351_v42 = vmov 1966171168  }
0x11d2   :  { %v6002_v46 = vpop.f32.mrf.mxu0 }
0x11d3   :  { %v5237_v2 = vadd.f32 %v5231_v43, %v5063_v19  ;;  %v5413_v43 = vunpack.c.l.s4 %v6351_v42 }
0x11d4   :  { %v5233_v28 = vpop.f32.mrf.mxu0 }
0x11d5   :  { %v5234_v29 = vadd.f32 %v5233_v28, %v5167_v36  ;;  %v5239_v59 = vsel %vm105_vm0, %v5237_v2, 0.0  ;;  %v5245_v48 = vmul.f32 %v5237_v2, %v5237_v2  ;;  %v5414_v46 = vunpack.c.0.s8 %v5413_v43 }
0x11d6   :  { %5240 = vadd.xlane.f32.xlu0 %v5239_v59  ;;  %v6003_v49 = vpop.f32.mrf.mxu0 }
0x11d7   :  { %v5238_v37 = vadd.f32 %v5234_v29, %v5064_v3  ;;  %v5247_v40 = vsel %vm105_vm0, %v5245_v48, 0.0  ;;  %v5417_v28 = vsub.s32 %v5414_v46, %v6461_v15 }
0x11d9   :  { %v5242_v39 = vsel %vm105_vm0, %v5238_v37, 0.0  ;;  %v5246_v41 = vmul.f32 %v5238_v37, %v5238_v37 }
0x11da   :  { %5248 = vadd.xlane.f32.xlu0 %v5247_v40  ;;  %5243 = vadd.xlane.f32.xlu1 %v5242_v39 }
0x11db   :  { %v5250_v9 = vsel %vm105_vm0, %v5246_v41, 0.0 }
0x11de   :  { %5251 = vadd.xlane.f32.xlu1 %v5250_v9 }
0x11ef   :  { %5311 = vrot.lane.b32.xlu1 %v6201_v57, %s6335_s21  ;;  %s5444_s21 = sshll.u32 %s6352_s2, 4  ;;  %s5445_s21 = int_to_ptr.vmem [resolvable:$true] %s5444_s21 }
0x11f0   :  { %5361 = vrot.lane.b32.xlu0 %v6101_v12, %s6341_s18  ;;  %p6307_p12 = scmp.lt.s32.totalorder %s5445_s21, %s5445_s21 }
0x11f3   :  { %5359 = vrot.lane.b32.xlu1 %v6102_v32, %s6341_s18  ;;  %s6302_s18 = scalar_lea.vmem %s5445_s21, 32 }
0x11f4   :  { %p6303_p11 = scmp.ne.s32.totalorder %s5445_s21, %s6302_s18  ;;  %p6308_p13 = scmp.lt.s32.totalorder %s6302_s18, %s6302_s18 }
0x11f6   :  { %p6309_p0 = por %p6308_p13, %p6307_p12 }
0x11f7   :  { %5365 = vrot.lane.b32.xlu1 %v6201_v57, %s6350_s17 }
0x11f8   :  { %p6310_p1 = pnand %p6309_p0, %p6303_p11 }
0x125f   :  { %v5241_v56 = vpop.xlane.xlu0 %5240 }
0x1260   :  { %v5253_v34 = vmul.f32 0.03125, %v5241_v56 }
0x1262   :  { %v5257_v14 = vmul.f32 %v5253_v34, %v5253_v34  ;;  %v5261_v53 = vsub.f32 %v5237_v2, %v5253_v34 }
0x1263   :  { %v5249_v8 = vpop.xlane.xlu0 %5248  ;;  %v5244_v45 = vpop.xlane.xlu1 %5243 }
0x1264   :  { %v5255_v51 = vmul.f32 0.03125, %v5249_v8  ;;  %v5254_v19 = vmul.f32 0.03125, %v5244_v45 }
0x1266   :  { %v5259_v3 = vsub.f32 %v5255_v51, %v5257_v14  ;;  %v5258_v18 = vmul.f32 %v5254_v19, %v5254_v19  ;;  %v5262_v60 = vsub.f32 %v5238_v37, %v5254_v19 }
0x1267   :  { %v5252_v7 = vpop.xlane.xlu1 %5251  ;;  %v5362_v54 = vpop.permute.xlu0 %5361 }
0x1268   :  { %v5263_v33 = vadd.f32 1e-05, %v5259_v3  ;;  %v5256_v4 = vmul.f32 0.03125, %v5252_v7 }
0x126a   :  { %6191 = vrsqrt.f32 %v5263_v33  ;;  %v5260_v23 = vsub.f32 %v5256_v4, %v5258_v18 }
0x126b   :  { %v5312_v0 = vpop.permute.xlu1 %5311 }
0x126c   :  { %v5264_v6 = vadd.f32 1e-05, %v5260_v23 }
0x126e   :  { %6193 = vrsqrt.f32 %v5264_v6 }
0x126f   :  { %v5360_v17 = vpop.permute.xlu1 %5359 }
0x1273   :  { %v5366_v2 = vpop.permute.xlu1 %5365 }
0x1277   :  { %v6192_v21 = vpop.eup %6191 }
0x1278   :  { %v5267_v5 = vmul.f32 %v6192_v21, %v5261_v53 }
0x127a   :  { %v5275_v1 = vmul.f32 %v5273_v30, %v5267_v5 }
0x127b   :  { %v6194_v31 = vpop.eup %6193 }
0x127c   :  { %v5268_v44 = vmul.f32 %v6194_v31, %v5262_v60  ;;  %v5283_v27 = vadd.f32 %v5281_v38, %v5275_v1 }
0x127e   :  { %v5276_v35 = vmul.f32 %v5273_v30, %v5268_v44  ;;  %v5289_v22 = vpack.c.bf16 %v5283_v27, %v5283_v27 }
0x1280   :  { %v5284_v20 = vadd.f32 %v5281_v38, %v5276_v35  ;;  %v5293_v58 = vunpack.c.l.b16 %v5289_v22 }
0x1282   :  { %v5290_v24 = vpack.c.bf16 %v5284_v20, %v5284_v20 }
0x1284   :  { %v5294_v55 = vunpack.c.l.b16 %v5290_v24 }
0x1286   :  { %v5295_v50 = vrot.slane %v5294_v55, 7 }
0x1288   :  { %v5297_v25 = vsel %vm5296_vm7, %v5295_v50, %v5293_v58 }
0x1289   :  { %v5298_v26 = vpack.c.b16 %v5297_v25, %v5297_v25 }
0x128b   :  { %6009 = vmatmul.mubr.msk.bf16.vlgmr.msra.gmra.mxu1 %vm105_vm0, %v5298_v26 }
0x128c   :  { %6016 = vmatprep.mubr.msk.bf16.mxu1 %vm6343_vm1, %v6342_v11  ;;  %6013 = vmatpush3.bf16.msra.mxu1 %v5362_v54 }
0x128d   :  { %6014 = vmatprep.subr.bf16.mxu1 %v6342_v11 }
0x1290   :  { %6015 = vmatpush3.bf16.msra.mxu1 %v5360_v17 }
0x134b   :  { %v5351_v52 = vpop.f32.mrf.mxu1 }
0x134c   :  { %v5352_v16 = vadd.f32 %v5351_v52, %v5312_v0 }
0x134d   :  { %v6010_v62 = vpop.f32.mrf.mxu1 }
0x134e   :  { %6195 = vtanh.f32 %v5352_v16 }
0x134f   :  { %v5354_v10 = vpop.f32.mrf.mxu1 }
0x1351   :  { %v6011_v47 = vpop.f32.mrf.mxu1 }
0x135b   :  { %v6196_v13 = vpop.eup %6195 }
0x135c   :  { %v5358_v36 = vpack.c.bf16 %v6196_v13, %v6196_v13 }
0x135e   :  { %6017 = vmatmul.mubr.msk.bf16.vlgmr.msra.gmra.mxu1 %vm105_vm0, %v5358_v36 }
0x141e   :  { %v5405_v29 = vpop.f32.mrf.mxu1 }
0x141f   :  { %v5406_v11 = vadd.f32 %v5405_v29, %v5366_v2 }
0x1420   :  { %v6018_v59 = vpop.f32.mrf.mxu1 }
0x1421   :  { %v5418_v48 = vrot.slane %v5406_v11, %v5417_v28 }
0x1422   :  { %v5408_v49 = vpop.f32.mrf.mxu1 }
0x1423   :  { %v5419_v37 = vcombine.high %v5418_v48, %v5418_v48  ;;  %v5426_v40 = vrot.slane %v5418_v48, %v5417_v28 }
0x1424   :  { %v6019_v39 = vpop.f32.mrf.mxu1 }
0x1425   :  { %v5433_v41 = vrot.slane %v5419_v37, %v5417_v28  ;;  %5437 = vst.msk [vmem:[#allocation11] sm:$0x1] %vm5436_vm8, %v5426_v40 }
0x1427   :  { %5438 = vst.msk [vmem:[#allocation11 + $0x1] sm:$0x1] %vm5436_vm8, %v5433_v41 }
0x1428   :  { %6313 = shalt.err (!%p6310_p1)
}
0x1429   :  { %5450 = dma.vmem_to_hbm [thread:$0]  %s5445_s21, 32, %s7482_s9, [#allocation4], %s6331_s12, %s6331_s12, %s6332_s13  }
0x142a   :  { %6328 = dma.done.wait [#allocation4], 32  }
0x142b   :  { %6329 = vsyncadd [#allocation4], 4294967264 }
0x142c   :  { %5454 = vsyncpa [#allocation3], 1 }
0x142d   :  { %5455 = vsyncpa [#allocation6], 1 }
0x142e   :  { %5456 = vsyncpa [#allocation9], 1 }
0x142f   :  { %5457 = vsyncpa [#allocation4], 1 }

</bundles_post_ra>
